<compile_context>
chip_gen: v6e
topology: v6e:2x2x1
jax: 0.10.0
libtpu: 0.0.40
codegen_flags: <defaults>
</compile_context>

<pallas_src>
import numpy as np
import jax
import jax.numpy as jnp
from jax.experimental import pallas as pl
from jax.experimental.pallas import tpu as pltpu


# ------------------------------- in-kernel math --------------------------------------

def _erf_f32(x):
    # Rational-polynomial erf for float32 (Eigen/XLA-style coefficients); built only from
    # mul/add/div/clip so it lowers cleanly on the VPU.  Max abs error ~1e-7, i.e. it
    # matches torch.nn.GELU() (exact erf GELU) to float32 precision.
    x = jnp.clip(x, -4.0, 4.0)
    x2 = x * x
    p = jnp.float32(-2.72614225801306e-10)
    for c in (2.77068142495902e-08, -2.10102402082508e-06, -5.69250639462346e-05,
              -7.34990630326855e-04, -2.95459980854025e-03, -1.60960333262415e-02):
        p = p * x2 + jnp.float32(c)
    p = p * x
    q = jnp.float32(-1.45660718464996e-05)
    for c in (-2.13374055278905e-04, -1.68282697438203e-03, -7.37332916720468e-03,
              -1.42647390514189e-02):
        q = q * x2 + jnp.float32(c)
    return p / q


def _gelu(x):
    # Exact (erf-based) GELU, matching torch.nn.GELU(approximate='none').
    return 0.5 * x * (1.0 + _erf_f32(x * jnp.float32(0.7071067811865476)))


# ------------------------------- fused CNN kernel ------------------------------------

_NUM_3X3 = 7          # seven valid 3x3 convs (Cout = 16)
_CMID = 16            # hidden channel count
_NTAP = 9             # 3x3 taps


def _build_cnn_kernel(h, w, n):
    """Kernel: whole batch, 7x (3x3 conv + GELU) + (1x1 conv + GELU), fully in VMEM."""
    hw = h * w
    smax = 2 * w + 2                                   # largest tap offset (dy=dx=2)
    lw = [hw - k * smax for k in range(_NUM_3X3 + 1)]  # lane prefix computed per layer
    taps = [dy * w + dx for dy in range(3) for dx in range(3)]   # tap t = dy*3+dx

    def kernel(x_ref, w0_ref, wconv_ref, bconv_ref, w1_ref, b1_ref, o_ref):
        f32 = jnp.float32
        x = x_ref[...].astype(f32)                                   # (n, hw)

        for b in range(n):                                           # unrolled over images
            # ---- layer 0: Conv2d(1 -> 16, 3x3) as ONE (16,16)@(16,lw1) MXU matmul.
            xb = x[b:b + 1, :]                                       # (1, hw)
            n_out = lw[1]
            slab = jnp.concatenate(
                [xb[:, s:s + n_out] for s in taps]
                + [jnp.zeros((_CMID - _NTAP, n_out), f32)], axis=0)  # (16, lw1), taps in rows
            a = _gelu(jnp.dot(w0_ref[...], slab, preferred_element_type=f32)
                      + bconv_ref[0])                                # (16, lw1)

            # ---- layers 1..6: ONE (16,144)@(144,n_out) matmul per layer (im2col slab).
            for l in range(1, _NUM_3X3):
                n_out = lw[l + 1]
                # slab row t*16+cin = a[cin, col + taps[t]]  (each shift formed once)
                slab = jnp.concatenate([a[:, s:s + n_out] for s in taps],
                                       axis=0)                       # (144, n_out)
                a = _gelu(jnp.dot(wconv_ref[l - 1], slab, preferred_element_type=f32)
                          + bconv_ref[l])                            # (16, n_out)

            # ---- head: Conv2d(16 -> 1, 1x1) + GELU as a (1,16)@(16,lw7) matmul.
            y = _gelu(jnp.dot(w1_ref[...], a, preferred_element_type=f32)
                      + b1_ref[...])                                 # (1, lw7)

            # Single store of the whole computed lane prefix for this image; the tiny
            # (ho, wo) valid-window extraction happens in the JAX wrapper.
            o_ref[b] = y.astype(o_ref.dtype)

    return kernel


def pack_params(params):
    """Pack torch-layout params once (outside jit) into lane-dense MXU-friendly slabs."""
    # Layer 0: (16, 1, 3, 3) -> (16, 16) with the 9 taps in columns 0..8 (rest zero).
    w0, b0 = params[0]
    w0p = jnp.pad(w0.reshape(_CMID, _NTAP),
                  ((0, 0), (0, _CMID - _NTAP))).astype(jnp.float32)          # (16, 16)
    wmats, bs = [], [b0.reshape(_CMID, 1)]
    # Layers 1..6: (16, 16, 3, 3) -> (16, 144) with column index = tap*16 + cin.
    for l in range(1, _NUM_3X3):
        wgt, b = params[l]
        co, ci, kh, kw = wgt.shape
        wmats.append(jnp.transpose(wgt, (0, 2, 3, 1)).reshape(co, kh * kw * ci))
        bs.append(b.reshape(_CMID, 1))
    wconv = jnp.stack(wmats).astype(jnp.float32)           # (6, 16, 144)
    bconv = jnp.stack(bs).astype(jnp.float32)              # (7, 16, 1)
    w1, b1 = params[_NUM_3X3]                              # (1, 16, 1, 1), (1,)
    w1p = w1.reshape(1, _CMID).astype(jnp.float32)         # (1, 16)
    b1p = b1.reshape(1, 1).astype(jnp.float32)             # (1, 1)
    return w0p, wconv, bconv, w1p, b1p


def _cnn_encoder_impl(x, packed):
    w0p, wconv, bconv, w1p, b1p = packed
    n, cin, h, w = x.shape
    assert cin == 1, "CNNEncoder expects a single input channel"
    hw = h * w
    lw7 = hw - _NUM_3X3 * (2 * w + 2)                      # final computed lane prefix
    ho, wo = h - 2 * _NUM_3X3, w - 2 * _NUM_3X3            # final valid spatial extent
    assert ho >= 1 and wo >= 1 and lw7 >= 1
    assert (ho - 1) * w + wo <= lw7                        # last valid flat idx in prefix

    out = pl.pallas_call(
        _build_cnn_kernel(h, w, n),
        out_shape=jax.ShapeDtypeStruct((n, 1, lw7), x.dtype),
        grid=(1,),                                         # one step: whole batch at once
        in_specs=[
            pl.BlockSpec((n, hw), lambda i: (0, 0)),                 # all images
            pl.BlockSpec(w0p.shape, lambda i: (0, 0)),               # weights loaded once
            pl.BlockSpec(wconv.shape, lambda i: (0, 0, 0)),
            pl.BlockSpec(bconv.shape, lambda i: (0, 0, 0)),
            pl.BlockSpec(w1p.shape, lambda i: (0, 0)),
            pl.BlockSpec(b1p.shape, lambda i: (0, 0)),
        ],
        out_specs=pl.BlockSpec((n, 1, lw7), lambda i: (0, 0, 0)),
        compiler_params=pltpu.CompilerParams(
            dimension_semantics=("arbitrary",)),
    )(x.reshape(n, hw), w0p, wconv, bconv, w1p, b1p)

    # nn.Flatten(): pull the (ho, wo) valid window out of the flat (h*w)-indexed prefix.
    y = out.reshape(n, lw7)
    y = jnp.concatenate([y[:, hh * w:hh * w + wo] for hh in range(ho)], axis=1)
    return y                                               # (n, ho * wo)


cnn_encoder = jax.jit(_cnn_encoder_impl)


# ------------------------------- init & reference ------------------------------------

def init_params(key):
    # Deterministic init mimicking PyTorch's default uniform(-1/sqrt(fan_in), 1/sqrt(fan_in)).
    specs = [(16, 1, 3, 3)] + [(16, 16, 3, 3)] * 6 + [(1, 16, 1, 1)]
    params = []
    for i, (co, ci, kh, kw) in enumerate(specs):
        kwk, kbk = jax.random.split(jax.random.fold_in(key, i))
        bound = 1.0 / np.sqrt(ci * kh * kw)
        wgt = jax.random.uniform(kwk, (co, ci, kh, kw), jnp.float32, -bound, bound)
        b = jax.random.uniform(kbk, (co,), jnp.float32, -bound, bound)
        params.append((wgt, b))
    return params


def cnn_encoder_ref(x, params):
    # Pure-JAX reference (XLA conv + exact erf GELU) for correctness checking.
    y = x
    for wgt, b in params:
        y = jax.lax.conv_general_dilated(
            y, wgt, window_strides=(1, 1), padding="VALID",
            dimension_numbers=("NCHW", "OIHW", "NCHW"))
        y = y + b[None, :, None, None]
        y = 0.5 * y * (1.0 + jax.lax.erf(y / np.sqrt(2.0)))
    return y.reshape(y.shape[0], -1)


if __name__ == "__main__":
    key = jax.random.PRNGKey(0)
    params = init_params(key)
    # Input consistent with Conv2d(1, 16, 3): (batch=2, channels=1, 16, 16).
    x = jax.random.normal(jax.random.fold_in(key, 999), (2, 1, 16, 16), jnp.float32)

    # Sanity-check the in-kernel erf approximation against lax.erf on a dense grid.
    t = jnp.linspace(-6.0, 6.0, 4097, dtype=jnp.float32)
    np.testing.assert_allclose(np.asarray(_erf_f32(t)), np.asarray(jax.lax.erf(t)),
                               atol=5e-6, rtol=0)

    packed = pack_params(params)
    out = jax.block_until_ready(cnn_encoder(x, packed))
    ref = jax.block_until_ready(cnn_encoder_ref(x, params))

    assert out.shape == (2, 4), out.shape   # 16 -> 2 after seven valid 3x3 convs; 1*2*2 flat
    np.testing.assert_allclose(np.asarray(out), np.asarray(ref), atol=1e-4, rtol=1e-4)
    print("KERNEL_OK")
</pallas_src>

<mosaic_0001>
module attributes {stable_mosaic.version = 11 : i64} {
  func.func @kernel(%arg0: i32, %arg1: memref<2x256xf32, #tpu.memory_space<vmem>>, %arg2: memref<16x16xf32, #tpu.memory_space<vmem>>, %arg3: memref<6x16x144xf32, #tpu.memory_space<vmem>>, %arg4: memref<7x16x1xf32, #tpu.memory_space<vmem>>, %arg5: memref<1x16xf32, #tpu.memory_space<vmem>>, %arg6: memref<1x1xf32, #tpu.memory_space<vmem>>, %arg7: memref<2x1x18xf32, #tpu.memory_space<vmem>>) attributes {dimension_semantics = [#tpu.dimension_semantics<arbitrary>], iteration_bounds = array<i64: 1>, scalar_prefetch = 0 : i64, scratch_operands = 0 : i64, tpu.core_type = #tpu.core_type<tc>, window_params = [{pipeline_mode = #tpu.pipeline_mode<synchronous>, transform_indices = @transform_0, window_bounds = array<i64: 2, 256>}, {pipeline_mode = #tpu.pipeline_mode<synchronous>, transform_indices = @transform_1, window_bounds = array<i64: 16, 16>}, {pipeline_mode = #tpu.pipeline_mode<synchronous>, transform_indices = @transform_2, window_bounds = array<i64: 6, 16, 144>}, {pipeline_mode = #tpu.pipeline_mode<synchronous>, transform_indices = @transform_3, window_bounds = array<i64: 7, 16, 1>}, {pipeline_mode = #tpu.pipeline_mode<synchronous>, transform_indices = @transform_4, window_bounds = array<i64: 1, 16>}, {pipeline_mode = #tpu.pipeline_mode<synchronous>, transform_indices = @transform_5, window_bounds = array<i64: 1, 1>}, {pipeline_mode = #tpu.pipeline_mode<synchronous>, transform_indices = @transform_6, window_bounds = array<i64: 2, 1, 18>}]} {
    %c0 = arith.constant 0 : index
    %c0_0 = arith.constant 0 : index
    %0 = vector.load %arg1[%c0, %c0_0] : memref<2x256xf32, #tpu.memory_space<vmem>>, vector<2x256xf32>
    %1 = vector.extract_strided_slice %0 {offsets = [0, 0], sizes = [1, 256], strides = [1, 1]} : vector<2x256xf32> to vector<1x256xf32>
    %2 = vector.extract_strided_slice %1 {offsets = [0, 0], sizes = [1, 222], strides = [1, 1]} : vector<1x256xf32> to vector<1x222xf32>
    %3 = vector.extract_strided_slice %1 {offsets = [0, 1], sizes = [1, 222], strides = [1, 1]} : vector<1x256xf32> to vector<1x222xf32>
    %4 = vector.extract_strided_slice %1 {offsets = [0, 2], sizes = [1, 222], strides = [1, 1]} : vector<1x256xf32> to vector<1x222xf32>
    %5 = vector.extract_strided_slice %1 {offsets = [0, 16], sizes = [1, 222], strides = [1, 1]} : vector<1x256xf32> to vector<1x222xf32>
    %6 = vector.extract_strided_slice %1 {offsets = [0, 17], sizes = [1, 222], strides = [1, 1]} : vector<1x256xf32> to vector<1x222xf32>
    %7 = vector.extract_strided_slice %1 {offsets = [0, 18], sizes = [1, 222], strides = [1, 1]} : vector<1x256xf32> to vector<1x222xf32>
    %8 = vector.extract_strided_slice %1 {offsets = [0, 32], sizes = [1, 222], strides = [1, 1]} : vector<1x256xf32> to vector<1x222xf32>
    %9 = vector.extract_strided_slice %1 {offsets = [0, 33], sizes = [1, 222], strides = [1, 1]} : vector<1x256xf32> to vector<1x222xf32>
    %10 = vector.extract_strided_slice %1 {offsets = [0, 34], sizes = [1, 222], strides = [1, 1]} : vector<1x256xf32> to vector<1x222xf32>
    %cst = arith.constant 0.000000e+00 : f32
    %11 = vector.broadcast %cst : f32 to vector<7x222xf32>
    %12 = tpu.concatenate %2, %3, %4, %5, %6, %7, %8, %9, %10, %11 in 0 : vector<1x222xf32>, vector<1x222xf32>, vector<1x222xf32>, vector<1x222xf32>, vector<1x222xf32>, vector<1x222xf32>, vector<1x222xf32>, vector<1x222xf32>, vector<1x222xf32>, vector<7x222xf32> -> vector<16x222xf32>
    %c0_1 = arith.constant 0 : index
    %c0_2 = arith.constant 0 : index
    %13 = vector.load %arg2[%c0_1, %c0_2] : memref<16x16xf32, #tpu.memory_space<vmem>>, vector<16x16xf32>
    %cst_3 = arith.constant dense<0.000000e+00> : vector<16x222xf32>
    %14 = tpu.matmul %13, %12, %cst_3 {dimension_numbers = #tpu.dot_dimension_numbers<[1], [0], [0], [1], [0, 0, 1, 1], [], []>} : vector<16x16xf32>, vector<16x222xf32>, vector<16x222xf32> -> vector<16x222xf32>
    %c0_4 = arith.constant 0 : index
    %c0_5 = arith.constant 0 : index
    %c0_6 = arith.constant 0 : index
    %15 = vector.load %arg4[%c0_4, %c0_5, %c0_6] : memref<7x16x1xf32, #tpu.memory_space<vmem>>, vector<1x16x1xf32>
    %16 = vector.shape_cast %15 : vector<1x16x1xf32> to vector<16x1xf32>
    %17 = vector.broadcast %16 : vector<16x1xf32> to vector<16x222xf32>
    %18 = arith.addf %14, %17 : vector<16x222xf32>
    %cst_7 = arith.constant 5.000000e-01 : f32
    %19 = vector.broadcast %cst_7 : f32 to vector<16x222xf32>
    %20 = arith.mulf %19, %18 : vector<16x222xf32>
    %cst_8 = arith.constant 0.707106769 : f32
    %21 = vector.broadcast %cst_8 : f32 to vector<16x222xf32>
    %22 = arith.mulf %18, %21 : vector<16x222xf32>
    %cst_9 = arith.constant -4.000000e+00 : f32
    %cst_10 = arith.constant 4.000000e+00 : f32
    %23 = vector.broadcast %cst_9 : f32 to vector<16x222xf32>
    %24 = arith.maximumf %23, %22 : vector<16x222xf32>
    %25 = vector.broadcast %cst_10 : f32 to vector<16x222xf32>
    %26 = arith.minimumf %25, %24 : vector<16x222xf32>
    %27 = arith.mulf %26, %26 : vector<16x222xf32>
    %cst_11 = arith.constant -2.72614237E-10 : f32
    %28 = vector.broadcast %cst_11 : f32 to vector<16x222xf32>
    %29 = arith.mulf %28, %27 : vector<16x222xf32>
    %cst_12 = arith.constant 2.77068146E-8 : f32
    %30 = vector.broadcast %cst_12 : f32 to vector<16x222xf32>
    %31 = arith.addf %29, %30 : vector<16x222xf32>
    %32 = arith.mulf %31, %27 : vector<16x222xf32>
    %cst_13 = arith.constant -2.10102394E-6 : f32
    %33 = vector.broadcast %cst_13 : f32 to vector<16x222xf32>
    %34 = arith.addf %32, %33 : vector<16x222xf32>
    %35 = arith.mulf %34, %27 : vector<16x222xf32>
    %cst_14 = arith.constant -5.69250624E-5 : f32
    %36 = vector.broadcast %cst_14 : f32 to vector<16x222xf32>
    %37 = arith.addf %35, %36 : vector<16x222xf32>
    %38 = arith.mulf %37, %27 : vector<16x222xf32>
    %cst_15 = arith.constant -7.34990637E-4 : f32
    %39 = vector.broadcast %cst_15 : f32 to vector<16x222xf32>
    %40 = arith.addf %38, %39 : vector<16x222xf32>
    %41 = arith.mulf %40, %27 : vector<16x222xf32>
    %cst_16 = arith.constant -2.954600e-03 : f32
    %42 = vector.broadcast %cst_16 : f32 to vector<16x222xf32>
    %43 = arith.addf %41, %42 : vector<16x222xf32>
    %44 = arith.mulf %43, %27 : vector<16x222xf32>
    %cst_17 = arith.constant -0.0160960332 : f32
    %45 = vector.broadcast %cst_17 : f32 to vector<16x222xf32>
    %46 = arith.addf %44, %45 : vector<16x222xf32>
    %47 = arith.mulf %46, %26 : vector<16x222xf32>
    %cst_18 = arith.constant -1.45660715E-5 : f32
    %48 = vector.broadcast %cst_18 : f32 to vector<16x222xf32>
    %49 = arith.mulf %48, %27 : vector<16x222xf32>
    %cst_19 = arith.constant -2.13374049E-4 : f32
    %50 = vector.broadcast %cst_19 : f32 to vector<16x222xf32>
    %51 = arith.addf %49, %50 : vector<16x222xf32>
    %52 = arith.mulf %51, %27 : vector<16x222xf32>
    %cst_20 = arith.constant -0.00168282702 : f32
    %53 = vector.broadcast %cst_20 : f32 to vector<16x222xf32>
    %54 = arith.addf %52, %53 : vector<16x222xf32>
    %55 = arith.mulf %54, %27 : vector<16x222xf32>
    %cst_21 = arith.constant -0.00737332925 : f32
    %56 = vector.broadcast %cst_21 : f32 to vector<16x222xf32>
    %57 = arith.addf %55, %56 : vector<16x222xf32>
    %58 = arith.mulf %57, %27 : vector<16x222xf32>
    %cst_22 = arith.constant -0.0142647391 : f32
    %59 = vector.broadcast %cst_22 : f32 to vector<16x222xf32>
    %60 = arith.addf %58, %59 : vector<16x222xf32>
    %61 = arith.divf %47, %60 : vector<16x222xf32>
    %cst_23 = arith.constant 1.000000e+00 : f32
    %62 = vector.broadcast %cst_23 : f32 to vector<16x222xf32>
    %63 = arith.addf %62, %61 : vector<16x222xf32>
    %64 = arith.mulf %20, %63 : vector<16x222xf32>
    %65 = vector.extract_strided_slice %64 {offsets = [0, 0], sizes = [16, 188], strides = [1, 1]} : vector<16x222xf32> to vector<16x188xf32>
    %66 = vector.extract_strided_slice %64 {offsets = [0, 1], sizes = [16, 188], strides = [1, 1]} : vector<16x222xf32> to vector<16x188xf32>
    %67 = vector.extract_strided_slice %64 {offsets = [0, 2], sizes = [16, 188], strides = [1, 1]} : vector<16x222xf32> to vector<16x188xf32>
    %68 = vector.extract_strided_slice %64 {offsets = [0, 16], sizes = [16, 188], strides = [1, 1]} : vector<16x222xf32> to vector<16x188xf32>
    %69 = vector.extract_strided_slice %64 {offsets = [0, 17], sizes = [16, 188], strides = [1, 1]} : vector<16x222xf32> to vector<16x188xf32>
    %70 = vector.extract_strided_slice %64 {offsets = [0, 18], sizes = [16, 188], strides = [1, 1]} : vector<16x222xf32> to vector<16x188xf32>
    %71 = vector.extract_strided_slice %64 {offsets = [0, 32], sizes = [16, 188], strides = [1, 1]} : vector<16x222xf32> to vector<16x188xf32>
    %72 = vector.extract_strided_slice %64 {offsets = [0, 33], sizes = [16, 188], strides = [1, 1]} : vector<16x222xf32> to vector<16x188xf32>
    %73 = vector.extract_strided_slice %64 {offsets = [0, 34], sizes = [16, 188], strides = [1, 1]} : vector<16x222xf32> to vector<16x188xf32>
    %74 = tpu.concatenate %65, %66, %67, %68, %69, %70, %71, %72, %73 in 0 : vector<16x188xf32>, vector<16x188xf32>, vector<16x188xf32>, vector<16x188xf32>, vector<16x188xf32>, vector<16x188xf32>, vector<16x188xf32>, vector<16x188xf32>, vector<16x188xf32> -> vector<144x188xf32>
    %c0_24 = arith.constant 0 : index
    %c0_25 = arith.constant 0 : index
    %c0_26 = arith.constant 0 : index
    %75 = vector.load %arg3[%c0_24, %c0_25, %c0_26] : memref<6x16x144xf32, #tpu.memory_space<vmem>>, vector<1x16x144xf32>
    %76 = vector.shape_cast %75 : vector<1x16x144xf32> to vector<16x144xf32>
    %cst_27 = arith.constant dense<0.000000e+00> : vector<16x188xf32>
    %77 = tpu.matmul %76, %74, %cst_27 {dimension_numbers = #tpu.dot_dimension_numbers<[1], [0], [0], [1], [0, 0, 1, 1], [], []>} : vector<16x144xf32>, vector<144x188xf32>, vector<16x188xf32> -> vector<16x188xf32>
    %c1 = arith.constant 1 : index
    %c0_28 = arith.constant 0 : index
    %c0_29 = arith.constant 0 : index
    %78 = vector.load %arg4[%c1, %c0_28, %c0_29] : memref<7x16x1xf32, #tpu.memory_space<vmem>>, vector<1x16x1xf32>
    %79 = vector.shape_cast %78 : vector<1x16x1xf32> to vector<16x1xf32>
    %80 = vector.broadcast %79 : vector<16x1xf32> to vector<16x188xf32>
    %81 = arith.addf %77, %80 : vector<16x188xf32>
    %cst_30 = arith.constant 5.000000e-01 : f32
    %82 = vector.broadcast %cst_30 : f32 to vector<16x188xf32>
    %83 = arith.mulf %82, %81 : vector<16x188xf32>
    %cst_31 = arith.constant 0.707106769 : f32
    %84 = vector.broadcast %cst_31 : f32 to vector<16x188xf32>
    %85 = arith.mulf %81, %84 : vector<16x188xf32>
    %cst_32 = arith.constant -4.000000e+00 : f32
    %cst_33 = arith.constant 4.000000e+00 : f32
    %86 = vector.broadcast %cst_32 : f32 to vector<16x188xf32>
    %87 = arith.maximumf %86, %85 : vector<16x188xf32>
    %88 = vector.broadcast %cst_33 : f32 to vector<16x188xf32>
    %89 = arith.minimumf %88, %87 : vector<16x188xf32>
    %90 = arith.mulf %89, %89 : vector<16x188xf32>
    %cst_34 = arith.constant -2.72614237E-10 : f32
    %91 = vector.broadcast %cst_34 : f32 to vector<16x188xf32>
    %92 = arith.mulf %91, %90 : vector<16x188xf32>
    %cst_35 = arith.constant 2.77068146E-8 : f32
    %93 = vector.broadcast %cst_35 : f32 to vector<16x188xf32>
    %94 = arith.addf %92, %93 : vector<16x188xf32>
    %95 = arith.mulf %94, %90 : vector<16x188xf32>
    %cst_36 = arith.constant -2.10102394E-6 : f32
    %96 = vector.broadcast %cst_36 : f32 to vector<16x188xf32>
    %97 = arith.addf %95, %96 : vector<16x188xf32>
    %98 = arith.mulf %97, %90 : vector<16x188xf32>
    %cst_37 = arith.constant -5.69250624E-5 : f32
    %99 = vector.broadcast %cst_37 : f32 to vector<16x188xf32>
    %100 = arith.addf %98, %99 : vector<16x188xf32>
    %101 = arith.mulf %100, %90 : vector<16x188xf32>
    %cst_38 = arith.constant -7.34990637E-4 : f32
    %102 = vector.broadcast %cst_38 : f32 to vector<16x188xf32>
    %103 = arith.addf %101, %102 : vector<16x188xf32>
    %104 = arith.mulf %103, %90 : vector<16x188xf32>
    %cst_39 = arith.constant -2.954600e-03 : f32
    %105 = vector.broadcast %cst_39 : f32 to vector<16x188xf32>
    %106 = arith.addf %104, %105 : vector<16x188xf32>
    %107 = arith.mulf %106, %90 : vector<16x188xf32>
    %cst_40 = arith.constant -0.0160960332 : f32
    %108 = vector.broadcast %cst_40 : f32 to vector<16x188xf32>
    %109 = arith.addf %107, %108 : vector<16x188xf32>
    %110 = arith.mulf %109, %89 : vector<16x188xf32>
    %cst_41 = arith.constant -1.45660715E-5 : f32
    %111 = vector.broadcast %cst_41 : f32 to vector<16x188xf32>
    %112 = arith.mulf %111, %90 : vector<16x188xf32>
    %cst_42 = arith.constant -2.13374049E-4 : f32
    %113 = vector.broadcast %cst_42 : f32 to vector<16x188xf32>
    %114 = arith.addf %112, %113 : vector<16x188xf32>
    %115 = arith.mulf %114, %90 : vector<16x188xf32>
    %cst_43 = arith.constant -0.00168282702 : f32
    %116 = vector.broadcast %cst_43 : f32 to vector<16x188xf32>
    %117 = arith.addf %115, %116 : vector<16x188xf32>
    %118 = arith.mulf %117, %90 : vector<16x188xf32>
    %cst_44 = arith.constant -0.00737332925 : f32
    %119 = vector.broadcast %cst_44 : f32 to vector<16x188xf32>
    %120 = arith.addf %118, %119 : vector<16x188xf32>
    %121 = arith.mulf %120, %90 : vector<16x188xf32>
    %cst_45 = arith.constant -0.0142647391 : f32
    %122 = vector.broadcast %cst_45 : f32 to vector<16x188xf32>
    %123 = arith.addf %121, %122 : vector<16x188xf32>
    %124 = arith.divf %110, %123 : vector<16x188xf32>
    %cst_46 = arith.constant 1.000000e+00 : f32
    %125 = vector.broadcast %cst_46 : f32 to vector<16x188xf32>
    %126 = arith.addf %125, %124 : vector<16x188xf32>
    %127 = arith.mulf %83, %126 : vector<16x188xf32>
    %128 = vector.extract_strided_slice %127 {offsets = [0, 0], sizes = [16, 154], strides = [1, 1]} : vector<16x188xf32> to vector<16x154xf32>
    %129 = vector.extract_strided_slice %127 {offsets = [0, 1], sizes = [16, 154], strides = [1, 1]} : vector<16x188xf32> to vector<16x154xf32>
    %130 = vector.extract_strided_slice %127 {offsets = [0, 2], sizes = [16, 154], strides = [1, 1]} : vector<16x188xf32> to vector<16x154xf32>
    %131 = vector.extract_strided_slice %127 {offsets = [0, 16], sizes = [16, 154], strides = [1, 1]} : vector<16x188xf32> to vector<16x154xf32>
    %132 = vector.extract_strided_slice %127 {offsets = [0, 17], sizes = [16, 154], strides = [1, 1]} : vector<16x188xf32> to vector<16x154xf32>
    %133 = vector.extract_strided_slice %127 {offsets = [0, 18], sizes = [16, 154], strides = [1, 1]} : vector<16x188xf32> to vector<16x154xf32>
    %134 = vector.extract_strided_slice %127 {offsets = [0, 32], sizes = [16, 154], strides = [1, 1]} : vector<16x188xf32> to vector<16x154xf32>
    %135 = vector.extract_strided_slice %127 {offsets = [0, 33], sizes = [16, 154], strides = [1, 1]} : vector<16x188xf32> to vector<16x154xf32>
    %136 = vector.extract_strided_slice %127 {offsets = [0, 34], sizes = [16, 154], strides = [1, 1]} : vector<16x188xf32> to vector<16x154xf32>
    %137 = tpu.concatenate %128, %129, %130, %131, %132, %133, %134, %135, %136 in 0 : vector<16x154xf32>, vector<16x154xf32>, vector<16x154xf32>, vector<16x154xf32>, vector<16x154xf32>, vector<16x154xf32>, vector<16x154xf32>, vector<16x154xf32>, vector<16x154xf32> -> vector<144x154xf32>
    %c1_47 = arith.constant 1 : index
    %c0_48 = arith.constant 0 : index
    %c0_49 = arith.constant 0 : index
    %138 = vector.load %arg3[%c1_47, %c0_48, %c0_49] : memref<6x16x144xf32, #tpu.memory_space<vmem>>, vector<1x16x144xf32>
    %139 = vector.shape_cast %138 : vector<1x16x144xf32> to vector<16x144xf32>
    %cst_50 = arith.constant dense<0.000000e+00> : vector<16x154xf32>
    %140 = tpu.matmul %139, %137, %cst_50 {dimension_numbers = #tpu.dot_dimension_numbers<[1], [0], [0], [1], [0, 0, 1, 1], [], []>} : vector<16x144xf32>, vector<144x154xf32>, vector<16x154xf32> -> vector<16x154xf32>
    %c2 = arith.constant 2 : index
    %c0_51 = arith.constant 0 : index
    %c0_52 = arith.constant 0 : index
    %141 = vector.load %arg4[%c2, %c0_51, %c0_52] : memref<7x16x1xf32, #tpu.memory_space<vmem>>, vector<1x16x1xf32>
    %142 = vector.shape_cast %141 : vector<1x16x1xf32> to vector<16x1xf32>
    %143 = vector.broadcast %142 : vector<16x1xf32> to vector<16x154xf32>
    %144 = arith.addf %140, %143 : vector<16x154xf32>
    %cst_53 = arith.constant 5.000000e-01 : f32
    %145 = vector.broadcast %cst_53 : f32 to vector<16x154xf32>
    %146 = arith.mulf %145, %144 : vector<16x154xf32>
    %cst_54 = arith.constant 0.707106769 : f32
    %147 = vector.broadcast %cst_54 : f32 to vector<16x154xf32>
    %148 = arith.mulf %144, %147 : vector<16x154xf32>
    %cst_55 = arith.constant -4.000000e+00 : f32
    %cst_56 = arith.constant 4.000000e+00 : f32
    %149 = vector.broadcast %cst_55 : f32 to vector<16x154xf32>
    %150 = arith.maximumf %149, %148 : vector<16x154xf32>
    %151 = vector.broadcast %cst_56 : f32 to vector<16x154xf32>
    %152 = arith.minimumf %151, %150 : vector<16x154xf32>
    %153 = arith.mulf %152, %152 : vector<16x154xf32>
    %cst_57 = arith.constant -2.72614237E-10 : f32
    %154 = vector.broadcast %cst_57 : f32 to vector<16x154xf32>
    %155 = arith.mulf %154, %153 : vector<16x154xf32>
    %cst_58 = arith.constant 2.77068146E-8 : f32
    %156 = vector.broadcast %cst_58 : f32 to vector<16x154xf32>
    %157 = arith.addf %155, %156 : vector<16x154xf32>
    %158 = arith.mulf %157, %153 : vector<16x154xf32>
    %cst_59 = arith.constant -2.10102394E-6 : f32
    %159 = vector.broadcast %cst_59 : f32 to vector<16x154xf32>
    %160 = arith.addf %158, %159 : vector<16x154xf32>
    %161 = arith.mulf %160, %153 : vector<16x154xf32>
    %cst_60 = arith.constant -5.69250624E-5 : f32
    %162 = vector.broadcast %cst_60 : f32 to vector<16x154xf32>
    %163 = arith.addf %161, %162 : vector<16x154xf32>
    %164 = arith.mulf %163, %153 : vector<16x154xf32>
    %cst_61 = arith.constant -7.34990637E-4 : f32
    %165 = vector.broadcast %cst_61 : f32 to vector<16x154xf32>
    %166 = arith.addf %164, %165 : vector<16x154xf32>
    %167 = arith.mulf %166, %153 : vector<16x154xf32>
    %cst_62 = arith.constant -2.954600e-03 : f32
    %168 = vector.broadcast %cst_62 : f32 to vector<16x154xf32>
    %169 = arith.addf %167, %168 : vector<16x154xf32>
    %170 = arith.mulf %169, %153 : vector<16x154xf32>
    %cst_63 = arith.constant -0.0160960332 : f32
    %171 = vector.broadcast %cst_63 : f32 to vector<16x154xf32>
    %172 = arith.addf %170, %171 : vector<16x154xf32>
    %173 = arith.mulf %172, %152 : vector<16x154xf32>
    %cst_64 = arith.constant -1.45660715E-5 : f32
    %174 = vector.broadcast %cst_64 : f32 to vector<16x154xf32>
    %175 = arith.mulf %174, %153 : vector<16x154xf32>
    %cst_65 = arith.constant -2.13374049E-4 : f32
    %176 = vector.broadcast %cst_65 : f32 to vector<16x154xf32>
    %177 = arith.addf %175, %176 : vector<16x154xf32>
    %178 = arith.mulf %177, %153 : vector<16x154xf32>
    %cst_66 = arith.constant -0.00168282702 : f32
    %179 = vector.broadcast %cst_66 : f32 to vector<16x154xf32>
    %180 = arith.addf %178, %179 : vector<16x154xf32>
    %181 = arith.mulf %180, %153 : vector<16x154xf32>
    %cst_67 = arith.constant -0.00737332925 : f32
    %182 = vector.broadcast %cst_67 : f32 to vector<16x154xf32>
    %183 = arith.addf %181, %182 : vector<16x154xf32>
    %184 = arith.mulf %183, %153 : vector<16x154xf32>
    %cst_68 = arith.constant -0.0142647391 : f32
    %185 = vector.broadcast %cst_68 : f32 to vector<16x154xf32>
    %186 = arith.addf %184, %185 : vector<16x154xf32>
    %187 = arith.divf %173, %186 : vector<16x154xf32>
    %cst_69 = arith.constant 1.000000e+00 : f32
    %188 = vector.broadcast %cst_69 : f32 to vector<16x154xf32>
    %189 = arith.addf %188, %187 : vector<16x154xf32>
    %190 = arith.mulf %146, %189 : vector<16x154xf32>
    %191 = vector.extract_strided_slice %190 {offsets = [0, 0], sizes = [16, 120], strides = [1, 1]} : vector<16x154xf32> to vector<16x120xf32>
    %192 = vector.extract_strided_slice %190 {offsets = [0, 1], sizes = [16, 120], strides = [1, 1]} : vector<16x154xf32> to vector<16x120xf32>
    %193 = vector.extract_strided_slice %190 {offsets = [0, 2], sizes = [16, 120], strides = [1, 1]} : vector<16x154xf32> to vector<16x120xf32>
    %194 = vector.extract_strided_slice %190 {offsets = [0, 16], sizes = [16, 120], strides = [1, 1]} : vector<16x154xf32> to vector<16x120xf32>
    %195 = vector.extract_strided_slice %190 {offsets = [0, 17], sizes = [16, 120], strides = [1, 1]} : vector<16x154xf32> to vector<16x120xf32>
    %196 = vector.extract_strided_slice %190 {offsets = [0, 18], sizes = [16, 120], strides = [1, 1]} : vector<16x154xf32> to vector<16x120xf32>
    %197 = vector.extract_strided_slice %190 {offsets = [0, 32], sizes = [16, 120], strides = [1, 1]} : vector<16x154xf32> to vector<16x120xf32>
    %198 = vector.extract_strided_slice %190 {offsets = [0, 33], sizes = [16, 120], strides = [1, 1]} : vector<16x154xf32> to vector<16x120xf32>
    %199 = vector.extract_strided_slice %190 {offsets = [0, 34], sizes = [16, 120], strides = [1, 1]} : vector<16x154xf32> to vector<16x120xf32>
    %200 = tpu.concatenate %191, %192, %193, %194, %195, %196, %197, %198, %199 in 0 : vector<16x120xf32>, vector<16x120xf32>, vector<16x120xf32>, vector<16x120xf32>, vector<16x120xf32>, vector<16x120xf32>, vector<16x120xf32>, vector<16x120xf32>, vector<16x120xf32> -> vector<144x120xf32>
    %c2_70 = arith.constant 2 : index
    %c0_71 = arith.constant 0 : index
    %c0_72 = arith.constant 0 : index
    %201 = vector.load %arg3[%c2_70, %c0_71, %c0_72] : memref<6x16x144xf32, #tpu.memory_space<vmem>>, vector<1x16x144xf32>
    %202 = vector.shape_cast %201 : vector<1x16x144xf32> to vector<16x144xf32>
    %cst_73 = arith.constant dense<0.000000e+00> : vector<16x120xf32>
    %203 = tpu.matmul %202, %200, %cst_73 {dimension_numbers = #tpu.dot_dimension_numbers<[1], [0], [0], [1], [0, 0, 1, 1], [], []>} : vector<16x144xf32>, vector<144x120xf32>, vector<16x120xf32> -> vector<16x120xf32>
    %c3 = arith.constant 3 : index
    %c0_74 = arith.constant 0 : index
    %c0_75 = arith.constant 0 : index
    %204 = vector.load %arg4[%c3, %c0_74, %c0_75] : memref<7x16x1xf32, #tpu.memory_space<vmem>>, vector<1x16x1xf32>
    %205 = vector.shape_cast %204 : vector<1x16x1xf32> to vector<16x1xf32>
    %206 = vector.broadcast %205 : vector<16x1xf32> to vector<16x120xf32>
    %207 = arith.addf %203, %206 : vector<16x120xf32>
    %cst_76 = arith.constant 5.000000e-01 : f32
    %208 = vector.broadcast %cst_76 : f32 to vector<16x120xf32>
    %209 = arith.mulf %208, %207 : vector<16x120xf32>
    %cst_77 = arith.constant 0.707106769 : f32
    %210 = vector.broadcast %cst_77 : f32 to vector<16x120xf32>
    %211 = arith.mulf %207, %210 : vector<16x120xf32>
    %cst_78 = arith.constant -4.000000e+00 : f32
    %cst_79 = arith.constant 4.000000e+00 : f32
    %212 = vector.broadcast %cst_78 : f32 to vector<16x120xf32>
    %213 = arith.maximumf %212, %211 : vector<16x120xf32>
    %214 = vector.broadcast %cst_79 : f32 to vector<16x120xf32>
    %215 = arith.minimumf %214, %213 : vector<16x120xf32>
    %216 = arith.mulf %215, %215 : vector<16x120xf32>
    %cst_80 = arith.constant -2.72614237E-10 : f32
    %217 = vector.broadcast %cst_80 : f32 to vector<16x120xf32>
    %218 = arith.mulf %217, %216 : vector<16x120xf32>
    %cst_81 = arith.constant 2.77068146E-8 : f32
    %219 = vector.broadcast %cst_81 : f32 to vector<16x120xf32>
    %220 = arith.addf %218, %219 : vector<16x120xf32>
    %221 = arith.mulf %220, %216 : vector<16x120xf32>
    %cst_82 = arith.constant -2.10102394E-6 : f32
    %222 = vector.broadcast %cst_82 : f32 to vector<16x120xf32>
    %223 = arith.addf %221, %222 : vector<16x120xf32>
    %224 = arith.mulf %223, %216 : vector<16x120xf32>
    %cst_83 = arith.constant -5.69250624E-5 : f32
    %225 = vector.broadcast %cst_83 : f32 to vector<16x120xf32>
    %226 = arith.addf %224, %225 : vector<16x120xf32>
    %227 = arith.mulf %226, %216 : vector<16x120xf32>
    %cst_84 = arith.constant -7.34990637E-4 : f32
    %228 = vector.broadcast %cst_84 : f32 to vector<16x120xf32>
    %229 = arith.addf %227, %228 : vector<16x120xf32>
    %230 = arith.mulf %229, %216 : vector<16x120xf32>
    %cst_85 = arith.constant -2.954600e-03 : f32
    %231 = vector.broadcast %cst_85 : f32 to vector<16x120xf32>
    %232 = arith.addf %230, %231 : vector<16x120xf32>
    %233 = arith.mulf %232, %216 : vector<16x120xf32>
    %cst_86 = arith.constant -0.0160960332 : f32
    %234 = vector.broadcast %cst_86 : f32 to vector<16x120xf32>
    %235 = arith.addf %233, %234 : vector<16x120xf32>
    %236 = arith.mulf %235, %215 : vector<16x120xf32>
    %cst_87 = arith.constant -1.45660715E-5 : f32
    %237 = vector.broadcast %cst_87 : f32 to vector<16x120xf32>
    %238 = arith.mulf %237, %216 : vector<16x120xf32>
    %cst_88 = arith.constant -2.13374049E-4 : f32
    %239 = vector.broadcast %cst_88 : f32 to vector<16x120xf32>
    %240 = arith.addf %238, %239 : vector<16x120xf32>
    %241 = arith.mulf %240, %216 : vector<16x120xf32>
    %cst_89 = arith.constant -0.00168282702 : f32
    %242 = vector.broadcast %cst_89 : f32 to vector<16x120xf32>
    %243 = arith.addf %241, %242 : vector<16x120xf32>
    %244 = arith.mulf %243, %216 : vector<16x120xf32>
    %cst_90 = arith.constant -0.00737332925 : f32
    %245 = vector.broadcast %cst_90 : f32 to vector<16x120xf32>
    %246 = arith.addf %244, %245 : vector<16x120xf32>
    %247 = arith.mulf %246, %216 : vector<16x120xf32>
    %cst_91 = arith.constant -0.0142647391 : f32
    %248 = vector.broadcast %cst_91 : f32 to vector<16x120xf32>
    %249 = arith.addf %247, %248 : vector<16x120xf32>
    %250 = arith.divf %236, %249 : vector<16x120xf32>
    %cst_92 = arith.constant 1.000000e+00 : f32
    %251 = vector.broadcast %cst_92 : f32 to vector<16x120xf32>
    %252 = arith.addf %251, %250 : vector<16x120xf32>
    %253 = arith.mulf %209, %252 : vector<16x120xf32>
    %254 = vector.extract_strided_slice %253 {offsets = [0, 0], sizes = [16, 86], strides = [1, 1]} : vector<16x120xf32> to vector<16x86xf32>
    %255 = vector.extract_strided_slice %253 {offsets = [0, 1], sizes = [16, 86], strides = [1, 1]} : vector<16x120xf32> to vector<16x86xf32>
    %256 = vector.extract_strided_slice %253 {offsets = [0, 2], sizes = [16, 86], strides = [1, 1]} : vector<16x120xf32> to vector<16x86xf32>
    %257 = vector.extract_strided_slice %253 {offsets = [0, 16], sizes = [16, 86], strides = [1, 1]} : vector<16x120xf32> to vector<16x86xf32>
    %258 = vector.extract_strided_slice %253 {offsets = [0, 17], sizes = [16, 86], strides = [1, 1]} : vector<16x120xf32> to vector<16x86xf32>
    %259 = vector.extract_strided_slice %253 {offsets = [0, 18], sizes = [16, 86], strides = [1, 1]} : vector<16x120xf32> to vector<16x86xf32>
    %260 = vector.extract_strided_slice %253 {offsets = [0, 32], sizes = [16, 86], strides = [1, 1]} : vector<16x120xf32> to vector<16x86xf32>
    %261 = vector.extract_strided_slice %253 {offsets = [0, 33], sizes = [16, 86], strides = [1, 1]} : vector<16x120xf32> to vector<16x86xf32>
    %262 = vector.extract_strided_slice %253 {offsets = [0, 34], sizes = [16, 86], strides = [1, 1]} : vector<16x120xf32> to vector<16x86xf32>
    %263 = tpu.concatenate %254, %255, %256, %257, %258, %259, %260, %261, %262 in 0 : vector<16x86xf32>, vector<16x86xf32>, vector<16x86xf32>, vector<16x86xf32>, vector<16x86xf32>, vector<16x86xf32>, vector<16x86xf32>, vector<16x86xf32>, vector<16x86xf32> -> vector<144x86xf32>
    %c3_93 = arith.constant 3 : index
    %c0_94 = arith.constant 0 : index
    %c0_95 = arith.constant 0 : index
    %264 = vector.load %arg3[%c3_93, %c0_94, %c0_95] : memref<6x16x144xf32, #tpu.memory_space<vmem>>, vector<1x16x144xf32>
    %265 = vector.shape_cast %264 : vector<1x16x144xf32> to vector<16x144xf32>
    %cst_96 = arith.constant dense<0.000000e+00> : vector<16x86xf32>
    %266 = tpu.matmul %265, %263, %cst_96 {dimension_numbers = #tpu.dot_dimension_numbers<[1], [0], [0], [1], [0, 0, 1, 1], [], []>} : vector<16x144xf32>, vector<144x86xf32>, vector<16x86xf32> -> vector<16x86xf32>
    %c4 = arith.constant 4 : index
    %c0_97 = arith.constant 0 : index
    %c0_98 = arith.constant 0 : index
    %267 = vector.load %arg4[%c4, %c0_97, %c0_98] : memref<7x16x1xf32, #tpu.memory_space<vmem>>, vector<1x16x1xf32>
    %268 = vector.shape_cast %267 : vector<1x16x1xf32> to vector<16x1xf32>
    %269 = vector.broadcast %268 : vector<16x1xf32> to vector<16x86xf32>
    %270 = arith.addf %266, %269 : vector<16x86xf32>
    %cst_99 = arith.constant 5.000000e-01 : f32
    %271 = vector.broadcast %cst_99 : f32 to vector<16x86xf32>
    %272 = arith.mulf %271, %270 : vector<16x86xf32>
    %cst_100 = arith.constant 0.707106769 : f32
    %273 = vector.broadcast %cst_100 : f32 to vector<16x86xf32>
    %274 = arith.mulf %270, %273 : vector<16x86xf32>
    %cst_101 = arith.constant -4.000000e+00 : f32
    %cst_102 = arith.constant 4.000000e+00 : f32
    %275 = vector.broadcast %cst_101 : f32 to vector<16x86xf32>
    %276 = arith.maximumf %275, %274 : vector<16x86xf32>
    %277 = vector.broadcast %cst_102 : f32 to vector<16x86xf32>
    %278 = arith.minimumf %277, %276 : vector<16x86xf32>
    %279 = arith.mulf %278, %278 : vector<16x86xf32>
    %cst_103 = arith.constant -2.72614237E-10 : f32
    %280 = vector.broadcast %cst_103 : f32 to vector<16x86xf32>
    %281 = arith.mulf %280, %279 : vector<16x86xf32>
    %cst_104 = arith.constant 2.77068146E-8 : f32
    %282 = vector.broadcast %cst_104 : f32 to vector<16x86xf32>
    %283 = arith.addf %281, %282 : vector<16x86xf32>
    %284 = arith.mulf %283, %279 : vector<16x86xf32>
    %cst_105 = arith.constant -2.10102394E-6 : f32
    %285 = vector.broadcast %cst_105 : f32 to vector<16x86xf32>
    %286 = arith.addf %284, %285 : vector<16x86xf32>
    %287 = arith.mulf %286, %279 : vector<16x86xf32>
    %cst_106 = arith.constant -5.69250624E-5 : f32
    %288 = vector.broadcast %cst_106 : f32 to vector<16x86xf32>
    %289 = arith.addf %287, %288 : vector<16x86xf32>
    %290 = arith.mulf %289, %279 : vector<16x86xf32>
    %cst_107 = arith.constant -7.34990637E-4 : f32
    %291 = vector.broadcast %cst_107 : f32 to vector<16x86xf32>
    %292 = arith.addf %290, %291 : vector<16x86xf32>
    %293 = arith.mulf %292, %279 : vector<16x86xf32>
    %cst_108 = arith.constant -2.954600e-03 : f32
    %294 = vector.broadcast %cst_108 : f32 to vector<16x86xf32>
    %295 = arith.addf %293, %294 : vector<16x86xf32>
    %296 = arith.mulf %295, %279 : vector<16x86xf32>
    %cst_109 = arith.constant -0.0160960332 : f32
    %297 = vector.broadcast %cst_109 : f32 to vector<16x86xf32>
    %298 = arith.addf %296, %297 : vector<16x86xf32>
    %299 = arith.mulf %298, %278 : vector<16x86xf32>
    %cst_110 = arith.constant -1.45660715E-5 : f32
    %300 = vector.broadcast %cst_110 : f32 to vector<16x86xf32>
    %301 = arith.mulf %300, %279 : vector<16x86xf32>
    %cst_111 = arith.constant -2.13374049E-4 : f32
    %302 = vector.broadcast %cst_111 : f32 to vector<16x86xf32>
    %303 = arith.addf %301, %302 : vector<16x86xf32>
    %304 = arith.mulf %303, %279 : vector<16x86xf32>
    %cst_112 = arith.constant -0.00168282702 : f32
    %305 = vector.broadcast %cst_112 : f32 to vector<16x86xf32>
    %306 = arith.addf %304, %305 : vector<16x86xf32>
    %307 = arith.mulf %306, %279 : vector<16x86xf32>
    %cst_113 = arith.constant -0.00737332925 : f32
    %308 = vector.broadcast %cst_113 : f32 to vector<16x86xf32>
    %309 = arith.addf %307, %308 : vector<16x86xf32>
    %310 = arith.mulf %309, %279 : vector<16x86xf32>
    %cst_114 = arith.constant -0.0142647391 : f32
    %311 = vector.broadcast %cst_114 : f32 to vector<16x86xf32>
    %312 = arith.addf %310, %311 : vector<16x86xf32>
    %313 = arith.divf %299, %312 : vector<16x86xf32>
    %cst_115 = arith.constant 1.000000e+00 : f32
    %314 = vector.broadcast %cst_115 : f32 to vector<16x86xf32>
    %315 = arith.addf %314, %313 : vector<16x86xf32>
    %316 = arith.mulf %272, %315 : vector<16x86xf32>
    %317 = vector.extract_strided_slice %316 {offsets = [0, 0], sizes = [16, 52], strides = [1, 1]} : vector<16x86xf32> to vector<16x52xf32>
    %318 = vector.extract_strided_slice %316 {offsets = [0, 1], sizes = [16, 52], strides = [1, 1]} : vector<16x86xf32> to vector<16x52xf32>
    %319 = vector.extract_strided_slice %316 {offsets = [0, 2], sizes = [16, 52], strides = [1, 1]} : vector<16x86xf32> to vector<16x52xf32>
    %320 = vector.extract_strided_slice %316 {offsets = [0, 16], sizes = [16, 52], strides = [1, 1]} : vector<16x86xf32> to vector<16x52xf32>
    %321 = vector.extract_strided_slice %316 {offsets = [0, 17], sizes = [16, 52], strides = [1, 1]} : vector<16x86xf32> to vector<16x52xf32>
    %322 = vector.extract_strided_slice %316 {offsets = [0, 18], sizes = [16, 52], strides = [1, 1]} : vector<16x86xf32> to vector<16x52xf32>
    %323 = vector.extract_strided_slice %316 {offsets = [0, 32], sizes = [16, 52], strides = [1, 1]} : vector<16x86xf32> to vector<16x52xf32>
    %324 = vector.extract_strided_slice %316 {offsets = [0, 33], sizes = [16, 52], strides = [1, 1]} : vector<16x86xf32> to vector<16x52xf32>
    %325 = vector.extract_strided_slice %316 {offsets = [0, 34], sizes = [16, 52], strides = [1, 1]} : vector<16x86xf32> to vector<16x52xf32>
    %326 = tpu.concatenate %317, %318, %319, %320, %321, %322, %323, %324, %325 in 0 : vector<16x52xf32>, vector<16x52xf32>, vector<16x52xf32>, vector<16x52xf32>, vector<16x52xf32>, vector<16x52xf32>, vector<16x52xf32>, vector<16x52xf32>, vector<16x52xf32> -> vector<144x52xf32>
    %c4_116 = arith.constant 4 : index
    %c0_117 = arith.constant 0 : index
    %c0_118 = arith.constant 0 : index
    %327 = vector.load %arg3[%c4_116, %c0_117, %c0_118] : memref<6x16x144xf32, #tpu.memory_space<vmem>>, vector<1x16x144xf32>
    %328 = vector.shape_cast %327 : vector<1x16x144xf32> to vector<16x144xf32>
    %cst_119 = arith.constant dense<0.000000e+00> : vector<16x52xf32>
    %329 = tpu.matmul %328, %326, %cst_119 {dimension_numbers = #tpu.dot_dimension_numbers<[1], [0], [0], [1], [0, 0, 1, 1], [], []>} : vector<16x144xf32>, vector<144x52xf32>, vector<16x52xf32> -> vector<16x52xf32>
    %c5 = arith.constant 5 : index
    %c0_120 = arith.constant 0 : index
    %c0_121 = arith.constant 0 : index
    %330 = vector.load %arg4[%c5, %c0_120, %c0_121] : memref<7x16x1xf32, #tpu.memory_space<vmem>>, vector<1x16x1xf32>
    %331 = vector.shape_cast %330 : vector<1x16x1xf32> to vector<16x1xf32>
    %332 = vector.broadcast %331 : vector<16x1xf32> to vector<16x52xf32>
    %333 = arith.addf %329, %332 : vector<16x52xf32>
    %cst_122 = arith.constant 5.000000e-01 : f32
    %334 = vector.broadcast %cst_122 : f32 to vector<16x52xf32>
    %335 = arith.mulf %334, %333 : vector<16x52xf32>
    %cst_123 = arith.constant 0.707106769 : f32
    %336 = vector.broadcast %cst_123 : f32 to vector<16x52xf32>
    %337 = arith.mulf %333, %336 : vector<16x52xf32>
    %cst_124 = arith.constant -4.000000e+00 : f32
    %cst_125 = arith.constant 4.000000e+00 : f32
    %338 = vector.broadcast %cst_124 : f32 to vector<16x52xf32>
    %339 = arith.maximumf %338, %337 : vector<16x52xf32>
    %340 = vector.broadcast %cst_125 : f32 to vector<16x52xf32>
    %341 = arith.minimumf %340, %339 : vector<16x52xf32>
    %342 = arith.mulf %341, %341 : vector<16x52xf32>
    %cst_126 = arith.constant -2.72614237E-10 : f32
    %343 = vector.broadcast %cst_126 : f32 to vector<16x52xf32>
    %344 = arith.mulf %343, %342 : vector<16x52xf32>
    %cst_127 = arith.constant 2.77068146E-8 : f32
    %345 = vector.broadcast %cst_127 : f32 to vector<16x52xf32>
    %346 = arith.addf %344, %345 : vector<16x52xf32>
    %347 = arith.mulf %346, %342 : vector<16x52xf32>
    %cst_128 = arith.constant -2.10102394E-6 : f32
    %348 = vector.broadcast %cst_128 : f32 to vector<16x52xf32>
    %349 = arith.addf %347, %348 : vector<16x52xf32>
    %350 = arith.mulf %349, %342 : vector<16x52xf32>
    %cst_129 = arith.constant -5.69250624E-5 : f32
    %351 = vector.broadcast %cst_129 : f32 to vector<16x52xf32>
    %352 = arith.addf %350, %351 : vector<16x52xf32>
    %353 = arith.mulf %352, %342 : vector<16x52xf32>
    %cst_130 = arith.constant -7.34990637E-4 : f32
    %354 = vector.broadcast %cst_130 : f32 to vector<16x52xf32>
    %355 = arith.addf %353, %354 : vector<16x52xf32>
    %356 = arith.mulf %355, %342 : vector<16x52xf32>
    %cst_131 = arith.constant -2.954600e-03 : f32
    %357 = vector.broadcast %cst_131 : f32 to vector<16x52xf32>
    %358 = arith.addf %356, %357 : vector<16x52xf32>
    %359 = arith.mulf %358, %342 : vector<16x52xf32>
    %cst_132 = arith.constant -0.0160960332 : f32
    %360 = vector.broadcast %cst_132 : f32 to vector<16x52xf32>
    %361 = arith.addf %359, %360 : vector<16x52xf32>
    %362 = arith.mulf %361, %341 : vector<16x52xf32>
    %cst_133 = arith.constant -1.45660715E-5 : f32
    %363 = vector.broadcast %cst_133 : f32 to vector<16x52xf32>
    %364 = arith.mulf %363, %342 : vector<16x52xf32>
    %cst_134 = arith.constant -2.13374049E-4 : f32
    %365 = vector.broadcast %cst_134 : f32 to vector<16x52xf32>
    %366 = arith.addf %364, %365 : vector<16x52xf32>
    %367 = arith.mulf %366, %342 : vector<16x52xf32>
    %cst_135 = arith.constant -0.00168282702 : f32
    %368 = vector.broadcast %cst_135 : f32 to vector<16x52xf32>
    %369 = arith.addf %367, %368 : vector<16x52xf32>
    %370 = arith.mulf %369, %342 : vector<16x52xf32>
    %cst_136 = arith.constant -0.00737332925 : f32
    %371 = vector.broadcast %cst_136 : f32 to vector<16x52xf32>
    %372 = arith.addf %370, %371 : vector<16x52xf32>
    %373 = arith.mulf %372, %342 : vector<16x52xf32>
    %cst_137 = arith.constant -0.0142647391 : f32
    %374 = vector.broadcast %cst_137 : f32 to vector<16x52xf32>
    %375 = arith.addf %373, %374 : vector<16x52xf32>
    %376 = arith.divf %362, %375 : vector<16x52xf32>
    %cst_138 = arith.constant 1.000000e+00 : f32
    %377 = vector.broadcast %cst_138 : f32 to vector<16x52xf32>
    %378 = arith.addf %377, %376 : vector<16x52xf32>
    %379 = arith.mulf %335, %378 : vector<16x52xf32>
    %380 = vector.extract_strided_slice %379 {offsets = [0, 0], sizes = [16, 18], strides = [1, 1]} : vector<16x52xf32> to vector<16x18xf32>
    %381 = vector.extract_strided_slice %379 {offsets = [0, 1], sizes = [16, 18], strides = [1, 1]} : vector<16x52xf32> to vector<16x18xf32>
    %382 = vector.extract_strided_slice %379 {offsets = [0, 2], sizes = [16, 18], strides = [1, 1]} : vector<16x52xf32> to vector<16x18xf32>
    %383 = vector.extract_strided_slice %379 {offsets = [0, 16], sizes = [16, 18], strides = [1, 1]} : vector<16x52xf32> to vector<16x18xf32>
    %384 = vector.extract_strided_slice %379 {offsets = [0, 17], sizes = [16, 18], strides = [1, 1]} : vector<16x52xf32> to vector<16x18xf32>
    %385 = vector.extract_strided_slice %379 {offsets = [0, 18], sizes = [16, 18], strides = [1, 1]} : vector<16x52xf32> to vector<16x18xf32>
    %386 = vector.extract_strided_slice %379 {offsets = [0, 32], sizes = [16, 18], strides = [1, 1]} : vector<16x52xf32> to vector<16x18xf32>
    %387 = vector.extract_strided_slice %379 {offsets = [0, 33], sizes = [16, 18], strides = [1, 1]} : vector<16x52xf32> to vector<16x18xf32>
    %388 = vector.extract_strided_slice %379 {offsets = [0, 34], sizes = [16, 18], strides = [1, 1]} : vector<16x52xf32> to vector<16x18xf32>
    %389 = tpu.concatenate %380, %381, %382, %383, %384, %385, %386, %387, %388 in 0 : vector<16x18xf32>, vector<16x18xf32>, vector<16x18xf32>, vector<16x18xf32>, vector<16x18xf32>, vector<16x18xf32>, vector<16x18xf32>, vector<16x18xf32>, vector<16x18xf32> -> vector<144x18xf32>
    %c5_139 = arith.constant 5 : index
    %c0_140 = arith.constant 0 : index
    %c0_141 = arith.constant 0 : index
    %390 = vector.load %arg3[%c5_139, %c0_140, %c0_141] : memref<6x16x144xf32, #tpu.memory_space<vmem>>, vector<1x16x144xf32>
    %391 = vector.shape_cast %390 : vector<1x16x144xf32> to vector<16x144xf32>
    %cst_142 = arith.constant dense<0.000000e+00> : vector<16x18xf32>
    %392 = tpu.matmul %391, %389, %cst_142 {dimension_numbers = #tpu.dot_dimension_numbers<[1], [0], [0], [1], [0, 0, 1, 1], [], []>} : vector<16x144xf32>, vector<144x18xf32>, vector<16x18xf32> -> vector<16x18xf32>
    %c6 = arith.constant 6 : index
    %c0_143 = arith.constant 0 : index
    %c0_144 = arith.constant 0 : index
    %393 = vector.load %arg4[%c6, %c0_143, %c0_144] : memref<7x16x1xf32, #tpu.memory_space<vmem>>, vector<1x16x1xf32>
    %394 = vector.shape_cast %393 : vector<1x16x1xf32> to vector<16x1xf32>
    %395 = vector.broadcast %394 : vector<16x1xf32> to vector<16x18xf32>
    %396 = arith.addf %392, %395 : vector<16x18xf32>
    %cst_145 = arith.constant 5.000000e-01 : f32
    %397 = vector.broadcast %cst_145 : f32 to vector<16x18xf32>
    %398 = arith.mulf %397, %396 : vector<16x18xf32>
    %cst_146 = arith.constant 0.707106769 : f32
    %399 = vector.broadcast %cst_146 : f32 to vector<16x18xf32>
    %400 = arith.mulf %396, %399 : vector<16x18xf32>
    %cst_147 = arith.constant -4.000000e+00 : f32
    %cst_148 = arith.constant 4.000000e+00 : f32
    %401 = vector.broadcast %cst_147 : f32 to vector<16x18xf32>
    %402 = arith.maximumf %401, %400 : vector<16x18xf32>
    %403 = vector.broadcast %cst_148 : f32 to vector<16x18xf32>
    %404 = arith.minimumf %403, %402 : vector<16x18xf32>
    %405 = arith.mulf %404, %404 : vector<16x18xf32>
    %cst_149 = arith.constant -2.72614237E-10 : f32
    %406 = vector.broadcast %cst_149 : f32 to vector<16x18xf32>
    %407 = arith.mulf %406, %405 : vector<16x18xf32>
    %cst_150 = arith.constant 2.77068146E-8 : f32
    %408 = vector.broadcast %cst_150 : f32 to vector<16x18xf32>
    %409 = arith.addf %407, %408 : vector<16x18xf32>
    %410 = arith.mulf %409, %405 : vector<16x18xf32>
    %cst_151 = arith.constant -2.10102394E-6 : f32
    %411 = vector.broadcast %cst_151 : f32 to vector<16x18xf32>
    %412 = arith.addf %410, %411 : vector<16x18xf32>
    %413 = arith.mulf %412, %405 : vector<16x18xf32>
    %cst_152 = arith.constant -5.69250624E-5 : f32
    %414 = vector.broadcast %cst_152 : f32 to vector<16x18xf32>
    %415 = arith.addf %413, %414 : vector<16x18xf32>
    %416 = arith.mulf %415, %405 : vector<16x18xf32>
    %cst_153 = arith.constant -7.34990637E-4 : f32
    %417 = vector.broadcast %cst_153 : f32 to vector<16x18xf32>
    %418 = arith.addf %416, %417 : vector<16x18xf32>
    %419 = arith.mulf %418, %405 : vector<16x18xf32>
    %cst_154 = arith.constant -2.954600e-03 : f32
    %420 = vector.broadcast %cst_154 : f32 to vector<16x18xf32>
    %421 = arith.addf %419, %420 : vector<16x18xf32>
    %422 = arith.mulf %421, %405 : vector<16x18xf32>
    %cst_155 = arith.constant -0.0160960332 : f32
    %423 = vector.broadcast %cst_155 : f32 to vector<16x18xf32>
    %424 = arith.addf %422, %423 : vector<16x18xf32>
    %425 = arith.mulf %424, %404 : vector<16x18xf32>
    %cst_156 = arith.constant -1.45660715E-5 : f32
    %426 = vector.broadcast %cst_156 : f32 to vector<16x18xf32>
    %427 = arith.mulf %426, %405 : vector<16x18xf32>
    %cst_157 = arith.constant -2.13374049E-4 : f32
    %428 = vector.broadcast %cst_157 : f32 to vector<16x18xf32>
    %429 = arith.addf %427, %428 : vector<16x18xf32>
    %430 = arith.mulf %429, %405 : vector<16x18xf32>
    %cst_158 = arith.constant -0.00168282702 : f32
    %431 = vector.broadcast %cst_158 : f32 to vector<16x18xf32>
    %432 = arith.addf %430, %431 : vector<16x18xf32>
    %433 = arith.mulf %432, %405 : vector<16x18xf32>
    %cst_159 = arith.constant -0.00737332925 : f32
    %434 = vector.broadcast %cst_159 : f32 to vector<16x18xf32>
    %435 = arith.addf %433, %434 : vector<16x18xf32>
    %436 = arith.mulf %435, %405 : vector<16x18xf32>
    %cst_160 = arith.constant -0.0142647391 : f32
    %437 = vector.broadcast %cst_160 : f32 to vector<16x18xf32>
    %438 = arith.addf %436, %437 : vector<16x18xf32>
    %439 = arith.divf %425, %438 : vector<16x18xf32>
    %cst_161 = arith.constant 1.000000e+00 : f32
    %440 = vector.broadcast %cst_161 : f32 to vector<16x18xf32>
    %441 = arith.addf %440, %439 : vector<16x18xf32>
    %442 = arith.mulf %398, %441 : vector<16x18xf32>
    %c0_162 = arith.constant 0 : index
    %c0_163 = arith.constant 0 : index
    %443 = vector.load %arg5[%c0_162, %c0_163] : memref<1x16xf32, #tpu.memory_space<vmem>>, vector<1x16xf32>
    %cst_164 = arith.constant dense<0.000000e+00> : vector<1x18xf32>
    %444 = tpu.matmul %443, %442, %cst_164 {dimension_numbers = #tpu.dot_dimension_numbers<[1], [0], [0], [1], [0, 0, 1, 1], [], []>} : vector<1x16xf32>, vector<16x18xf32>, vector<1x18xf32> -> vector<1x18xf32>
    %c0_165 = arith.constant 0 : index
    %c0_166 = arith.constant 0 : index
    %445 = vector.load %arg6[%c0_165, %c0_166] : memref<1x1xf32, #tpu.memory_space<vmem>>, vector<1x1xf32>
    %446 = vector.broadcast %445 : vector<1x1xf32> to vector<1x18xf32>
    %447 = arith.addf %444, %446 : vector<1x18xf32>
    %cst_167 = arith.constant 5.000000e-01 : f32
    %448 = vector.broadcast %cst_167 : f32 to vector<1x18xf32>
    %449 = arith.mulf %448, %447 : vector<1x18xf32>
    %cst_168 = arith.constant 0.707106769 : f32
    %450 = vector.broadcast %cst_168 : f32 to vector<1x18xf32>
    %451 = arith.mulf %447, %450 : vector<1x18xf32>
    %cst_169 = arith.constant -4.000000e+00 : f32
    %cst_170 = arith.constant 4.000000e+00 : f32
    %452 = vector.broadcast %cst_169 : f32 to vector<1x18xf32>
    %453 = arith.maximumf %452, %451 : vector<1x18xf32>
    %454 = vector.broadcast %cst_170 : f32 to vector<1x18xf32>
    %455 = arith.minimumf %454, %453 : vector<1x18xf32>
    %456 = arith.mulf %455, %455 : vector<1x18xf32>
    %cst_171 = arith.constant -2.72614237E-10 : f32
    %457 = vector.broadcast %cst_171 : f32 to vector<1x18xf32>
    %458 = arith.mulf %457, %456 : vector<1x18xf32>
    %cst_172 = arith.constant 2.77068146E-8 : f32
    %459 = vector.broadcast %cst_172 : f32 to vector<1x18xf32>
    %460 = arith.addf %458, %459 : vector<1x18xf32>
    %461 = arith.mulf %460, %456 : vector<1x18xf32>
    %cst_173 = arith.constant -2.10102394E-6 : f32
    %462 = vector.broadcast %cst_173 : f32 to vector<1x18xf32>
    %463 = arith.addf %461, %462 : vector<1x18xf32>
    %464 = arith.mulf %463, %456 : vector<1x18xf32>
    %cst_174 = arith.constant -5.69250624E-5 : f32
    %465 = vector.broadcast %cst_174 : f32 to vector<1x18xf32>
    %466 = arith.addf %464, %465 : vector<1x18xf32>
    %467 = arith.mulf %466, %456 : vector<1x18xf32>
    %cst_175 = arith.constant -7.34990637E-4 : f32
    %468 = vector.broadcast %cst_175 : f32 to vector<1x18xf32>
    %469 = arith.addf %467, %468 : vector<1x18xf32>
    %470 = arith.mulf %469, %456 : vector<1x18xf32>
    %cst_176 = arith.constant -2.954600e-03 : f32
    %471 = vector.broadcast %cst_176 : f32 to vector<1x18xf32>
    %472 = arith.addf %470, %471 : vector<1x18xf32>
    %473 = arith.mulf %472, %456 : vector<1x18xf32>
    %cst_177 = arith.constant -0.0160960332 : f32
    %474 = vector.broadcast %cst_177 : f32 to vector<1x18xf32>
    %475 = arith.addf %473, %474 : vector<1x18xf32>
    %476 = arith.mulf %475, %455 : vector<1x18xf32>
    %cst_178 = arith.constant -1.45660715E-5 : f32
    %477 = vector.broadcast %cst_178 : f32 to vector<1x18xf32>
    %478 = arith.mulf %477, %456 : vector<1x18xf32>
    %cst_179 = arith.constant -2.13374049E-4 : f32
    %479 = vector.broadcast %cst_179 : f32 to vector<1x18xf32>
    %480 = arith.addf %478, %479 : vector<1x18xf32>
    %481 = arith.mulf %480, %456 : vector<1x18xf32>
    %cst_180 = arith.constant -0.00168282702 : f32
    %482 = vector.broadcast %cst_180 : f32 to vector<1x18xf32>
    %483 = arith.addf %481, %482 : vector<1x18xf32>
    %484 = arith.mulf %483, %456 : vector<1x18xf32>
    %cst_181 = arith.constant -0.00737332925 : f32
    %485 = vector.broadcast %cst_181 : f32 to vector<1x18xf32>
    %486 = arith.addf %484, %485 : vector<1x18xf32>
    %487 = arith.mulf %486, %456 : vector<1x18xf32>
    %cst_182 = arith.constant -0.0142647391 : f32
    %488 = vector.broadcast %cst_182 : f32 to vector<1x18xf32>
    %489 = arith.addf %487, %488 : vector<1x18xf32>
    %490 = arith.divf %476, %489 : vector<1x18xf32>
    %cst_183 = arith.constant 1.000000e+00 : f32
    %491 = vector.broadcast %cst_183 : f32 to vector<1x18xf32>
    %492 = arith.addf %491, %490 : vector<1x18xf32>
    %493 = arith.mulf %449, %492 : vector<1x18xf32>
    %c0_184 = arith.constant 0 : index
    %c0_185 = arith.constant 0 : index
    %c0_186 = arith.constant 0 : index
    %494 = vector.load %arg7[%c0_184, %c0_185, %c0_186] : memref<2x1x18xf32, #tpu.memory_space<vmem>>, vector<1x1x18xf32>
    %495 = vector.shape_cast %494 : vector<1x1x18xf32> to vector<1x18xf32>
    %496 = vector.shape_cast %493 : vector<1x18xf32> to vector<1x1x18xf32>
    tpu.vector_store %arg7[%c0_184, %c0_185, %c0_186], %496 {strides = array<i32>} : memref<2x1x18xf32, #tpu.memory_space<vmem>>, vector<1x1x18xf32>,
    %497 = vector.extract_strided_slice %0 {offsets = [1, 0], sizes = [1, 256], strides = [1, 1]} : vector<2x256xf32> to vector<1x256xf32>
    %498 = vector.extract_strided_slice %497 {offsets = [0, 0], sizes = [1, 222], strides = [1, 1]} : vector<1x256xf32> to vector<1x222xf32>
    %499 = vector.extract_strided_slice %497 {offsets = [0, 1], sizes = [1, 222], strides = [1, 1]} : vector<1x256xf32> to vector<1x222xf32>
    %500 = vector.extract_strided_slice %497 {offsets = [0, 2], sizes = [1, 222], strides = [1, 1]} : vector<1x256xf32> to vector<1x222xf32>
    %501 = vector.extract_strided_slice %497 {offsets = [0, 16], sizes = [1, 222], strides = [1, 1]} : vector<1x256xf32> to vector<1x222xf32>
    %502 = vector.extract_strided_slice %497 {offsets = [0, 17], sizes = [1, 222], strides = [1, 1]} : vector<1x256xf32> to vector<1x222xf32>
    %503 = vector.extract_strided_slice %497 {offsets = [0, 18], sizes = [1, 222], strides = [1, 1]} : vector<1x256xf32> to vector<1x222xf32>
    %504 = vector.extract_strided_slice %497 {offsets = [0, 32], sizes = [1, 222], strides = [1, 1]} : vector<1x256xf32> to vector<1x222xf32>
    %505 = vector.extract_strided_slice %497 {offsets = [0, 33], sizes = [1, 222], strides = [1, 1]} : vector<1x256xf32> to vector<1x222xf32>
    %506 = vector.extract_strided_slice %497 {offsets = [0, 34], sizes = [1, 222], strides = [1, 1]} : vector<1x256xf32> to vector<1x222xf32>
    %cst_187 = arith.constant 0.000000e+00 : f32
    %507 = vector.broadcast %cst_187 : f32 to vector<7x222xf32>
    %508 = tpu.concatenate %498, %499, %500, %501, %502, %503, %504, %505, %506, %507 in 0 : vector<1x222xf32>, vector<1x222xf32>, vector<1x222xf32>, vector<1x222xf32>, vector<1x222xf32>, vector<1x222xf32>, vector<1x222xf32>, vector<1x222xf32>, vector<1x222xf32>, vector<7x222xf32> -> vector<16x222xf32>
    %c0_188 = arith.constant 0 : index
    %c0_189 = arith.constant 0 : index
    %509 = vector.load %arg2[%c0_188, %c0_189] : memref<16x16xf32, #tpu.memory_space<vmem>>, vector<16x16xf32>
    %cst_190 = arith.constant dense<0.000000e+00> : vector<16x222xf32>
    %510 = tpu.matmul %509, %508, %cst_190 {dimension_numbers = #tpu.dot_dimension_numbers<[1], [0], [0], [1], [0, 0, 1, 1], [], []>} : vector<16x16xf32>, vector<16x222xf32>, vector<16x222xf32> -> vector<16x222xf32>
    %c0_191 = arith.constant 0 : index
    %c0_192 = arith.constant 0 : index
    %c0_193 = arith.constant 0 : index
    %511 = vector.load %arg4[%c0_191, %c0_192, %c0_193] : memref<7x16x1xf32, #tpu.memory_space<vmem>>, vector<1x16x1xf32>
    %512 = vector.shape_cast %511 : vector<1x16x1xf32> to vector<16x1xf32>
    %513 = vector.broadcast %512 : vector<16x1xf32> to vector<16x222xf32>
    %514 = arith.addf %510, %513 : vector<16x222xf32>
    %cst_194 = arith.constant 5.000000e-01 : f32
    %515 = vector.broadcast %cst_194 : f32 to vector<16x222xf32>
    %516 = arith.mulf %515, %514 : vector<16x222xf32>
    %cst_195 = arith.constant 0.707106769 : f32
    %517 = vector.broadcast %cst_195 : f32 to vector<16x222xf32>
    %518 = arith.mulf %514, %517 : vector<16x222xf32>
    %cst_196 = arith.constant -4.000000e+00 : f32
    %cst_197 = arith.constant 4.000000e+00 : f32
    %519 = vector.broadcast %cst_196 : f32 to vector<16x222xf32>
    %520 = arith.maximumf %519, %518 : vector<16x222xf32>
    %521 = vector.broadcast %cst_197 : f32 to vector<16x222xf32>
    %522 = arith.minimumf %521, %520 : vector<16x222xf32>
    %523 = arith.mulf %522, %522 : vector<16x222xf32>
    %cst_198 = arith.constant -2.72614237E-10 : f32
    %524 = vector.broadcast %cst_198 : f32 to vector<16x222xf32>
    %525 = arith.mulf %524, %523 : vector<16x222xf32>
    %cst_199 = arith.constant 2.77068146E-8 : f32
    %526 = vector.broadcast %cst_199 : f32 to vector<16x222xf32>
    %527 = arith.addf %525, %526 : vector<16x222xf32>
    %528 = arith.mulf %527, %523 : vector<16x222xf32>
    %cst_200 = arith.constant -2.10102394E-6 : f32
    %529 = vector.broadcast %cst_200 : f32 to vector<16x222xf32>
    %530 = arith.addf %528, %529 : vector<16x222xf32>
    %531 = arith.mulf %530, %523 : vector<16x222xf32>
    %cst_201 = arith.constant -5.69250624E-5 : f32
    %532 = vector.broadcast %cst_201 : f32 to vector<16x222xf32>
    %533 = arith.addf %531, %532 : vector<16x222xf32>
    %534 = arith.mulf %533, %523 : vector<16x222xf32>
    %cst_202 = arith.constant -7.34990637E-4 : f32
    %535 = vector.broadcast %cst_202 : f32 to vector<16x222xf32>
    %536 = arith.addf %534, %535 : vector<16x222xf32>
    %537 = arith.mulf %536, %523 : vector<16x222xf32>
    %cst_203 = arith.constant -2.954600e-03 : f32
    %538 = vector.broadcast %cst_203 : f32 to vector<16x222xf32>
    %539 = arith.addf %537, %538 : vector<16x222xf32>
    %540 = arith.mulf %539, %523 : vector<16x222xf32>
    %cst_204 = arith.constant -0.0160960332 : f32
    %541 = vector.broadcast %cst_204 : f32 to vector<16x222xf32>
    %542 = arith.addf %540, %541 : vector<16x222xf32>
    %543 = arith.mulf %542, %522 : vector<16x222xf32>
    %cst_205 = arith.constant -1.45660715E-5 : f32
    %544 = vector.broadcast %cst_205 : f32 to vector<16x222xf32>
    %545 = arith.mulf %544, %523 : vector<16x222xf32>
    %cst_206 = arith.constant -2.13374049E-4 : f32
    %546 = vector.broadcast %cst_206 : f32 to vector<16x222xf32>
    %547 = arith.addf %545, %546 : vector<16x222xf32>
    %548 = arith.mulf %547, %523 : vector<16x222xf32>
    %cst_207 = arith.constant -0.00168282702 : f32
    %549 = vector.broadcast %cst_207 : f32 to vector<16x222xf32>
    %550 = arith.addf %548, %549 : vector<16x222xf32>
    %551 = arith.mulf %550, %523 : vector<16x222xf32>
    %cst_208 = arith.constant -0.00737332925 : f32
    %552 = vector.broadcast %cst_208 : f32 to vector<16x222xf32>
    %553 = arith.addf %551, %552 : vector<16x222xf32>
    %554 = arith.mulf %553, %523 : vector<16x222xf32>
    %cst_209 = arith.constant -0.0142647391 : f32
    %555 = vector.broadcast %cst_209 : f32 to vector<16x222xf32>
    %556 = arith.addf %554, %555 : vector<16x222xf32>
    %557 = arith.divf %543, %556 : vector<16x222xf32>
    %cst_210 = arith.constant 1.000000e+00 : f32
    %558 = vector.broadcast %cst_210 : f32 to vector<16x222xf32>
    %559 = arith.addf %558, %557 : vector<16x222xf32>
    %560 = arith.mulf %516, %559 : vector<16x222xf32>
    %561 = vector.extract_strided_slice %560 {offsets = [0, 0], sizes = [16, 188], strides = [1, 1]} : vector<16x222xf32> to vector<16x188xf32>
    %562 = vector.extract_strided_slice %560 {offsets = [0, 1], sizes = [16, 188], strides = [1, 1]} : vector<16x222xf32> to vector<16x188xf32>
    %563 = vector.extract_strided_slice %560 {offsets = [0, 2], sizes = [16, 188], strides = [1, 1]} : vector<16x222xf32> to vector<16x188xf32>
    %564 = vector.extract_strided_slice %560 {offsets = [0, 16], sizes = [16, 188], strides = [1, 1]} : vector<16x222xf32> to vector<16x188xf32>
    %565 = vector.extract_strided_slice %560 {offsets = [0, 17], sizes = [16, 188], strides = [1, 1]} : vector<16x222xf32> to vector<16x188xf32>
    %566 = vector.extract_strided_slice %560 {offsets = [0, 18], sizes = [16, 188], strides = [1, 1]} : vector<16x222xf32> to vector<16x188xf32>
    %567 = vector.extract_strided_slice %560 {offsets = [0, 32], sizes = [16, 188], strides = [1, 1]} : vector<16x222xf32> to vector<16x188xf32>
    %568 = vector.extract_strided_slice %560 {offsets = [0, 33], sizes = [16, 188], strides = [1, 1]} : vector<16x222xf32> to vector<16x188xf32>
    %569 = vector.extract_strided_slice %560 {offsets = [0, 34], sizes = [16, 188], strides = [1, 1]} : vector<16x222xf32> to vector<16x188xf32>
    %570 = tpu.concatenate %561, %562, %563, %564, %565, %566, %567, %568, %569 in 0 : vector<16x188xf32>, vector<16x188xf32>, vector<16x188xf32>, vector<16x188xf32>, vector<16x188xf32>, vector<16x188xf32>, vector<16x188xf32>, vector<16x188xf32>, vector<16x188xf32> -> vector<144x188xf32>
    %c0_211 = arith.constant 0 : index
    %c0_212 = arith.constant 0 : index
    %c0_213 = arith.constant 0 : index
    %571 = vector.load %arg3[%c0_211, %c0_212, %c0_213] : memref<6x16x144xf32, #tpu.memory_space<vmem>>, vector<1x16x144xf32>
    %572 = vector.shape_cast %571 : vector<1x16x144xf32> to vector<16x144xf32>
    %cst_214 = arith.constant dense<0.000000e+00> : vector<16x188xf32>
    %573 = tpu.matmul %572, %570, %cst_214 {dimension_numbers = #tpu.dot_dimension_numbers<[1], [0], [0], [1], [0, 0, 1, 1], [], []>} : vector<16x144xf32>, vector<144x188xf32>, vector<16x188xf32> -> vector<16x188xf32>
    %c1_215 = arith.constant 1 : index
    %c0_216 = arith.constant 0 : index
    %c0_217 = arith.constant 0 : index
    %574 = vector.load %arg4[%c1_215, %c0_216, %c0_217] : memref<7x16x1xf32, #tpu.memory_space<vmem>>, vector<1x16x1xf32>
    %575 = vector.shape_cast %574 : vector<1x16x1xf32> to vector<16x1xf32>
    %576 = vector.broadcast %575 : vector<16x1xf32> to vector<16x188xf32>
    %577 = arith.addf %573, %576 : vector<16x188xf32>
    %cst_218 = arith.constant 5.000000e-01 : f32
    %578 = vector.broadcast %cst_218 : f32 to vector<16x188xf32>
    %579 = arith.mulf %578, %577 : vector<16x188xf32>
    %cst_219 = arith.constant 0.707106769 : f32
    %580 = vector.broadcast %cst_219 : f32 to vector<16x188xf32>
    %581 = arith.mulf %577, %580 : vector<16x188xf32>
    %cst_220 = arith.constant -4.000000e+00 : f32
    %cst_221 = arith.constant 4.000000e+00 : f32
    %582 = vector.broadcast %cst_220 : f32 to vector<16x188xf32>
    %583 = arith.maximumf %582, %581 : vector<16x188xf32>
    %584 = vector.broadcast %cst_221 : f32 to vector<16x188xf32>
    %585 = arith.minimumf %584, %583 : vector<16x188xf32>
    %586 = arith.mulf %585, %585 : vector<16x188xf32>
    %cst_222 = arith.constant -2.72614237E-10 : f32
    %587 = vector.broadcast %cst_222 : f32 to vector<16x188xf32>
    %588 = arith.mulf %587, %586 : vector<16x188xf32>
    %cst_223 = arith.constant 2.77068146E-8 : f32
    %589 = vector.broadcast %cst_223 : f32 to vector<16x188xf32>
    %590 = arith.addf %588, %589 : vector<16x188xf32>
    %591 = arith.mulf %590, %586 : vector<16x188xf32>
    %cst_224 = arith.constant -2.10102394E-6 : f32
    %592 = vector.broadcast %cst_224 : f32 to vector<16x188xf32>
    %593 = arith.addf %591, %592 : vector<16x188xf32>
    %594 = arith.mulf %593, %586 : vector<16x188xf32>
    %cst_225 = arith.constant -5.69250624E-5 : f32
    %595 = vector.broadcast %cst_225 : f32 to vector<16x188xf32>
    %596 = arith.addf %594, %595 : vector<16x188xf32>
    %597 = arith.mulf %596, %586 : vector<16x188xf32>
    %cst_226 = arith.constant -7.34990637E-4 : f32
    %598 = vector.broadcast %cst_226 : f32 to vector<16x188xf32>
    %599 = arith.addf %597, %598 : vector<16x188xf32>
    %600 = arith.mulf %599, %586 : vector<16x188xf32>
    %cst_227 = arith.constant -2.954600e-03 : f32
    %601 = vector.broadcast %cst_227 : f32 to vector<16x188xf32>
    %602 = arith.addf %600, %601 : vector<16x188xf32>
    %603 = arith.mulf %602, %586 : vector<16x188xf32>
    %cst_228 = arith.constant -0.0160960332 : f32
    %604 = vector.broadcast %cst_228 : f32 to vector<16x188xf32>
    %605 = arith.addf %603, %604 : vector<16x188xf32>
    %606 = arith.mulf %605, %585 : vector<16x188xf32>
    %cst_229 = arith.constant -1.45660715E-5 : f32
    %607 = vector.broadcast %cst_229 : f32 to vector<16x188xf32>
    %608 = arith.mulf %607, %586 : vector<16x188xf32>
    %cst_230 = arith.constant -2.13374049E-4 : f32
    %609 = vector.broadcast %cst_230 : f32 to vector<16x188xf32>
    %610 = arith.addf %608, %609 : vector<16x188xf32>
    %611 = arith.mulf %610, %586 : vector<16x188xf32>
    %cst_231 = arith.constant -0.00168282702 : f32
    %612 = vector.broadcast %cst_231 : f32 to vector<16x188xf32>
    %613 = arith.addf %611, %612 : vector<16x188xf32>
    %614 = arith.mulf %613, %586 : vector<16x188xf32>
    %cst_232 = arith.constant -0.00737332925 : f32
    %615 = vector.broadcast %cst_232 : f32 to vector<16x188xf32>
    %616 = arith.addf %614, %615 : vector<16x188xf32>
    %617 = arith.mulf %616, %586 : vector<16x188xf32>
    %cst_233 = arith.constant -0.0142647391 : f32
    %618 = vector.broadcast %cst_233 : f32 to vector<16x188xf32>
    %619 = arith.addf %617, %618 : vector<16x188xf32>
    %620 = arith.divf %606, %619 : vector<16x188xf32>
    %cst_234 = arith.constant 1.000000e+00 : f32
    %621 = vector.broadcast %cst_234 : f32 to vector<16x188xf32>
    %622 = arith.addf %621, %620 : vector<16x188xf32>
    %623 = arith.mulf %579, %622 : vector<16x188xf32>
    %624 = vector.extract_strided_slice %623 {offsets = [0, 0], sizes = [16, 154], strides = [1, 1]} : vector<16x188xf32> to vector<16x154xf32>
    %625 = vector.extract_strided_slice %623 {offsets = [0, 1], sizes = [16, 154], strides = [1, 1]} : vector<16x188xf32> to vector<16x154xf32>
    %626 = vector.extract_strided_slice %623 {offsets = [0, 2], sizes = [16, 154], strides = [1, 1]} : vector<16x188xf32> to vector<16x154xf32>
    %627 = vector.extract_strided_slice %623 {offsets = [0, 16], sizes = [16, 154], strides = [1, 1]} : vector<16x188xf32> to vector<16x154xf32>
    %628 = vector.extract_strided_slice %623 {offsets = [0, 17], sizes = [16, 154], strides = [1, 1]} : vector<16x188xf32> to vector<16x154xf32>
    %629 = vector.extract_strided_slice %623 {offsets = [0, 18], sizes = [16, 154], strides = [1, 1]} : vector<16x188xf32> to vector<16x154xf32>
    %630 = vector.extract_strided_slice %623 {offsets = [0, 32], sizes = [16, 154], strides = [1, 1]} : vector<16x188xf32> to vector<16x154xf32>
    %631 = vector.extract_strided_slice %623 {offsets = [0, 33], sizes = [16, 154], strides = [1, 1]} : vector<16x188xf32> to vector<16x154xf32>
    %632 = vector.extract_strided_slice %623 {offsets = [0, 34], sizes = [16, 154], strides = [1, 1]} : vector<16x188xf32> to vector<16x154xf32>
    %633 = tpu.concatenate %624, %625, %626, %627, %628, %629, %630, %631, %632 in 0 : vector<16x154xf32>, vector<16x154xf32>, vector<16x154xf32>, vector<16x154xf32>, vector<16x154xf32>, vector<16x154xf32>, vector<16x154xf32>, vector<16x154xf32>, vector<16x154xf32> -> vector<144x154xf32>
    %c1_235 = arith.constant 1 : index
    %c0_236 = arith.constant 0 : index
    %c0_237 = arith.constant 0 : index
    %634 = vector.load %arg3[%c1_235, %c0_236, %c0_237] : memref<6x16x144xf32, #tpu.memory_space<vmem>>, vector<1x16x144xf32>
    %635 = vector.shape_cast %634 : vector<1x16x144xf32> to vector<16x144xf32>
    %cst_238 = arith.constant dense<0.000000e+00> : vector<16x154xf32>
    %636 = tpu.matmul %635, %633, %cst_238 {dimension_numbers = #tpu.dot_dimension_numbers<[1], [0], [0], [1], [0, 0, 1, 1], [], []>} : vector<16x144xf32>, vector<144x154xf32>, vector<16x154xf32> -> vector<16x154xf32>
    %c2_239 = arith.constant 2 : index
    %c0_240 = arith.constant 0 : index
    %c0_241 = arith.constant 0 : index
    %637 = vector.load %arg4[%c2_239, %c0_240, %c0_241] : memref<7x16x1xf32, #tpu.memory_space<vmem>>, vector<1x16x1xf32>
    %638 = vector.shape_cast %637 : vector<1x16x1xf32> to vector<16x1xf32>
    %639 = vector.broadcast %638 : vector<16x1xf32> to vector<16x154xf32>
    %640 = arith.addf %636, %639 : vector<16x154xf32>
    %cst_242 = arith.constant 5.000000e-01 : f32
    %641 = vector.broadcast %cst_242 : f32 to vector<16x154xf32>
    %642 = arith.mulf %641, %640 : vector<16x154xf32>
    %cst_243 = arith.constant 0.707106769 : f32
    %643 = vector.broadcast %cst_243 : f32 to vector<16x154xf32>
    %644 = arith.mulf %640, %643 : vector<16x154xf32>
    %cst_244 = arith.constant -4.000000e+00 : f32
    %cst_245 = arith.constant 4.000000e+00 : f32
    %645 = vector.broadcast %cst_244 : f32 to vector<16x154xf32>
    %646 = arith.maximumf %645, %644 : vector<16x154xf32>
    %647 = vector.broadcast %cst_245 : f32 to vector<16x154xf32>
    %648 = arith.minimumf %647, %646 : vector<16x154xf32>
    %649 = arith.mulf %648, %648 : vector<16x154xf32>
    %cst_246 = arith.constant -2.72614237E-10 : f32
    %650 = vector.broadcast %cst_246 : f32 to vector<16x154xf32>
    %651 = arith.mulf %650, %649 : vector<16x154xf32>
    %cst_247 = arith.constant 2.77068146E-8 : f32
    %652 = vector.broadcast %cst_247 : f32 to vector<16x154xf32>
    %653 = arith.addf %651, %652 : vector<16x154xf32>
    %654 = arith.mulf %653, %649 : vector<16x154xf32>
    %cst_248 = arith.constant -2.10102394E-6 : f32
    %655 = vector.broadcast %cst_248 : f32 to vector<16x154xf32>
    %656 = arith.addf %654, %655 : vector<16x154xf32>
    %657 = arith.mulf %656, %649 : vector<16x154xf32>
    %cst_249 = arith.constant -5.69250624E-5 : f32
    %658 = vector.broadcast %cst_249 : f32 to vector<16x154xf32>
    %659 = arith.addf %657, %658 : vector<16x154xf32>
    %660 = arith.mulf %659, %649 : vector<16x154xf32>
    %cst_250 = arith.constant -7.34990637E-4 : f32
    %661 = vector.broadcast %cst_250 : f32 to vector<16x154xf32>
    %662 = arith.addf %660, %661 : vector<16x154xf32>
    %663 = arith.mulf %662, %649 : vector<16x154xf32>
    %cst_251 = arith.constant -2.954600e-03 : f32
    %664 = vector.broadcast %cst_251 : f32 to vector<16x154xf32>
    %665 = arith.addf %663, %664 : vector<16x154xf32>
    %666 = arith.mulf %665, %649 : vector<16x154xf32>
    %cst_252 = arith.constant -0.0160960332 : f32
    %667 = vector.broadcast %cst_252 : f32 to vector<16x154xf32>
    %668 = arith.addf %666, %667 : vector<16x154xf32>
    %669 = arith.mulf %668, %648 : vector<16x154xf32>
    %cst_253 = arith.constant -1.45660715E-5 : f32
    %670 = vector.broadcast %cst_253 : f32 to vector<16x154xf32>
    %671 = arith.mulf %670, %649 : vector<16x154xf32>
    %cst_254 = arith.constant -2.13374049E-4 : f32
    %672 = vector.broadcast %cst_254 : f32 to vector<16x154xf32>
    %673 = arith.addf %671, %672 : vector<16x154xf32>
    %674 = arith.mulf %673, %649 : vector<16x154xf32>
    %cst_255 = arith.constant -0.00168282702 : f32
    %675 = vector.broadcast %cst_255 : f32 to vector<16x154xf32>
    %676 = arith.addf %674, %675 : vector<16x154xf32>
    %677 = arith.mulf %676, %649 : vector<16x154xf32>
    %cst_256 = arith.constant -0.00737332925 : f32
    %678 = vector.broadcast %cst_256 : f32 to vector<16x154xf32>
    %679 = arith.addf %677, %678 : vector<16x154xf32>
    %680 = arith.mulf %679, %649 : vector<16x154xf32>
    %cst_257 = arith.constant -0.0142647391 : f32
    %681 = vector.broadcast %cst_257 : f32 to vector<16x154xf32>
    %682 = arith.addf %680, %681 : vector<16x154xf32>
    %683 = arith.divf %669, %682 : vector<16x154xf32>
    %cst_258 = arith.constant 1.000000e+00 : f32
    %684 = vector.broadcast %cst_258 : f32 to vector<16x154xf32>
    %685 = arith.addf %684, %683 : vector<16x154xf32>
    %686 = arith.mulf %642, %685 : vector<16x154xf32>
    %687 = vector.extract_strided_slice %686 {offsets = [0, 0], sizes = [16, 120], strides = [1, 1]} : vector<16x154xf32> to vector<16x120xf32>
    %688 = vector.extract_strided_slice %686 {offsets = [0, 1], sizes = [16, 120], strides = [1, 1]} : vector<16x154xf32> to vector<16x120xf32>
    %689 = vector.extract_strided_slice %686 {offsets = [0, 2], sizes = [16, 120], strides = [1, 1]} : vector<16x154xf32> to vector<16x120xf32>
    %690 = vector.extract_strided_slice %686 {offsets = [0, 16], sizes = [16, 120], strides = [1, 1]} : vector<16x154xf32> to vector<16x120xf32>
    %691 = vector.extract_strided_slice %686 {offsets = [0, 17], sizes = [16, 120], strides = [1, 1]} : vector<16x154xf32> to vector<16x120xf32>
    %692 = vector.extract_strided_slice %686 {offsets = [0, 18], sizes = [16, 120], strides = [1, 1]} : vector<16x154xf32> to vector<16x120xf32>
    %693 = vector.extract_strided_slice %686 {offsets = [0, 32], sizes = [16, 120], strides = [1, 1]} : vector<16x154xf32> to vector<16x120xf32>
    %694 = vector.extract_strided_slice %686 {offsets = [0, 33], sizes = [16, 120], strides = [1, 1]} : vector<16x154xf32> to vector<16x120xf32>
    %695 = vector.extract_strided_slice %686 {offsets = [0, 34], sizes = [16, 120], strides = [1, 1]} : vector<16x154xf32> to vector<16x120xf32>
    %696 = tpu.concatenate %687, %688, %689, %690, %691, %692, %693, %694, %695 in 0 : vector<16x120xf32>, vector<16x120xf32>, vector<16x120xf32>, vector<16x120xf32>, vector<16x120xf32>, vector<16x120xf32>, vector<16x120xf32>, vector<16x120xf32>, vector<16x120xf32> -> vector<144x120xf32>
    %c2_259 = arith.constant 2 : index
    %c0_260 = arith.constant 0 : index
    %c0_261 = arith.constant 0 : index
    %697 = vector.load %arg3[%c2_259, %c0_260, %c0_261] : memref<6x16x144xf32, #tpu.memory_space<vmem>>, vector<1x16x144xf32>
    %698 = vector.shape_cast %697 : vector<1x16x144xf32> to vector<16x144xf32>
    %cst_262 = arith.constant dense<0.000000e+00> : vector<16x120xf32>
    %699 = tpu.matmul %698, %696, %cst_262 {dimension_numbers = #tpu.dot_dimension_numbers<[1], [0], [0], [1], [0, 0, 1, 1], [], []>} : vector<16x144xf32>, vector<144x120xf32>, vector<16x120xf32> -> vector<16x120xf32>
    %c3_263 = arith.constant 3 : index
    %c0_264 = arith.constant 0 : index
    %c0_265 = arith.constant 0 : index
    %700 = vector.load %arg4[%c3_263, %c0_264, %c0_265] : memref<7x16x1xf32, #tpu.memory_space<vmem>>, vector<1x16x1xf32>
    %701 = vector.shape_cast %700 : vector<1x16x1xf32> to vector<16x1xf32>
    %702 = vector.broadcast %701 : vector<16x1xf32> to vector<16x120xf32>
    %703 = arith.addf %699, %702 : vector<16x120xf32>
    %cst_266 = arith.constant 5.000000e-01 : f32
    %704 = vector.broadcast %cst_266 : f32 to vector<16x120xf32>
    %705 = arith.mulf %704, %703 : vector<16x120xf32>
    %cst_267 = arith.constant 0.707106769 : f32
    %706 = vector.broadcast %cst_267 : f32 to vector<16x120xf32>
    %707 = arith.mulf %703, %706 : vector<16x120xf32>
    %cst_268 = arith.constant -4.000000e+00 : f32
    %cst_269 = arith.constant 4.000000e+00 : f32
    %708 = vector.broadcast %cst_268 : f32 to vector<16x120xf32>
    %709 = arith.maximumf %708, %707 : vector<16x120xf32>
    %710 = vector.broadcast %cst_269 : f32 to vector<16x120xf32>
    %711 = arith.minimumf %710, %709 : vector<16x120xf32>
    %712 = arith.mulf %711, %711 : vector<16x120xf32>
    %cst_270 = arith.constant -2.72614237E-10 : f32
    %713 = vector.broadcast %cst_270 : f32 to vector<16x120xf32>
    %714 = arith.mulf %713, %712 : vector<16x120xf32>
    %cst_271 = arith.constant 2.77068146E-8 : f32
    %715 = vector.broadcast %cst_271 : f32 to vector<16x120xf32>
    %716 = arith.addf %714, %715 : vector<16x120xf32>
    %717 = arith.mulf %716, %712 : vector<16x120xf32>
    %cst_272 = arith.constant -2.10102394E-6 : f32
    %718 = vector.broadcast %cst_272 : f32 to vector<16x120xf32>
    %719 = arith.addf %717, %718 : vector<16x120xf32>
    %720 = arith.mulf %719, %712 : vector<16x120xf32>
    %cst_273 = arith.constant -5.69250624E-5 : f32
    %721 = vector.broadcast %cst_273 : f32 to vector<16x120xf32>
    %722 = arith.addf %720, %721 : vector<16x120xf32>
    %723 = arith.mulf %722, %712 : vector<16x120xf32>
    %cst_274 = arith.constant -7.34990637E-4 : f32
    %724 = vector.broadcast %cst_274 : f32 to vector<16x120xf32>
    %725 = arith.addf %723, %724 : vector<16x120xf32>
    %726 = arith.mulf %725, %712 : vector<16x120xf32>
    %cst_275 = arith.constant -2.954600e-03 : f32
    %727 = vector.broadcast %cst_275 : f32 to vector<16x120xf32>
    %728 = arith.addf %726, %727 : vector<16x120xf32>
    %729 = arith.mulf %728, %712 : vector<16x120xf32>
    %cst_276 = arith.constant -0.0160960332 : f32
    %730 = vector.broadcast %cst_276 : f32 to vector<16x120xf32>
    %731 = arith.addf %729, %730 : vector<16x120xf32>
    %732 = arith.mulf %731, %711 : vector<16x120xf32>
    %cst_277 = arith.constant -1.45660715E-5 : f32
    %733 = vector.broadcast %cst_277 : f32 to vector<16x120xf32>
    %734 = arith.mulf %733, %712 : vector<16x120xf32>
    %cst_278 = arith.constant -2.13374049E-4 : f32
    %735 = vector.broadcast %cst_278 : f32 to vector<16x120xf32>
    %736 = arith.addf %734, %735 : vector<16x120xf32>
    %737 = arith.mulf %736, %712 : vector<16x120xf32>
    %cst_279 = arith.constant -0.00168282702 : f32
    %738 = vector.broadcast %cst_279 : f32 to vector<16x120xf32>
    %739 = arith.addf %737, %738 : vector<16x120xf32>
    %740 = arith.mulf %739, %712 : vector<16x120xf32>
    %cst_280 = arith.constant -0.00737332925 : f32
    %741 = vector.broadcast %cst_280 : f32 to vector<16x120xf32>
    %742 = arith.addf %740, %741 : vector<16x120xf32>
    %743 = arith.mulf %742, %712 : vector<16x120xf32>
    %cst_281 = arith.constant -0.0142647391 : f32
    %744 = vector.broadcast %cst_281 : f32 to vector<16x120xf32>
    %745 = arith.addf %743, %744 : vector<16x120xf32>
    %746 = arith.divf %732, %745 : vector<16x120xf32>
    %cst_282 = arith.constant 1.000000e+00 : f32
    %747 = vector.broadcast %cst_282 : f32 to vector<16x120xf32>
    %748 = arith.addf %747, %746 : vector<16x120xf32>
    %749 = arith.mulf %705, %748 : vector<16x120xf32>
    %750 = vector.extract_strided_slice %749 {offsets = [0, 0], sizes = [16, 86], strides = [1, 1]} : vector<16x120xf32> to vector<16x86xf32>
    %751 = vector.extract_strided_slice %749 {offsets = [0, 1], sizes = [16, 86], strides = [1, 1]} : vector<16x120xf32> to vector<16x86xf32>
    %752 = vector.extract_strided_slice %749 {offsets = [0, 2], sizes = [16, 86], strides = [1, 1]} : vector<16x120xf32> to vector<16x86xf32>
    %753 = vector.extract_strided_slice %749 {offsets = [0, 16], sizes = [16, 86], strides = [1, 1]} : vector<16x120xf32> to vector<16x86xf32>
    %754 = vector.extract_strided_slice %749 {offsets = [0, 17], sizes = [16, 86], strides = [1, 1]} : vector<16x120xf32> to vector<16x86xf32>
    %755 = vector.extract_strided_slice %749 {offsets = [0, 18], sizes = [16, 86], strides = [1, 1]} : vector<16x120xf32> to vector<16x86xf32>
    %756 = vector.extract_strided_slice %749 {offsets = [0, 32], sizes = [16, 86], strides = [1, 1]} : vector<16x120xf32> to vector<16x86xf32>
    %757 = vector.extract_strided_slice %749 {offsets = [0, 33], sizes = [16, 86], strides = [1, 1]} : vector<16x120xf32> to vector<16x86xf32>
    %758 = vector.extract_strided_slice %749 {offsets = [0, 34], sizes = [16, 86], strides = [1, 1]} : vector<16x120xf32> to vector<16x86xf32>
    %759 = tpu.concatenate %750, %751, %752, %753, %754, %755, %756, %757, %758 in 0 : vector<16x86xf32>, vector<16x86xf32>, vector<16x86xf32>, vector<16x86xf32>, vector<16x86xf32>, vector<16x86xf32>, vector<16x86xf32>, vector<16x86xf32>, vector<16x86xf32> -> vector<144x86xf32>
    %c3_283 = arith.constant 3 : index
    %c0_284 = arith.constant 0 : index
    %c0_285 = arith.constant 0 : index
    %760 = vector.load %arg3[%c3_283, %c0_284, %c0_285] : memref<6x16x144xf32, #tpu.memory_space<vmem>>, vector<1x16x144xf32>
    %761 = vector.shape_cast %760 : vector<1x16x144xf32> to vector<16x144xf32>
    %cst_286 = arith.constant dense<0.000000e+00> : vector<16x86xf32>
    %762 = tpu.matmul %761, %759, %cst_286 {dimension_numbers = #tpu.dot_dimension_numbers<[1], [0], [0], [1], [0, 0, 1, 1], [], []>} : vector<16x144xf32>, vector<144x86xf32>, vector<16x86xf32> -> vector<16x86xf32>
    %c4_287 = arith.constant 4 : index
    %c0_288 = arith.constant 0 : index
    %c0_289 = arith.constant 0 : index
    %763 = vector.load %arg4[%c4_287, %c0_288, %c0_289] : memref<7x16x1xf32, #tpu.memory_space<vmem>>, vector<1x16x1xf32>
    %764 = vector.shape_cast %763 : vector<1x16x1xf32> to vector<16x1xf32>
    %765 = vector.broadcast %764 : vector<16x1xf32> to vector<16x86xf32>
    %766 = arith.addf %762, %765 : vector<16x86xf32>
    %cst_290 = arith.constant 5.000000e-01 : f32
    %767 = vector.broadcast %cst_290 : f32 to vector<16x86xf32>
    %768 = arith.mulf %767, %766 : vector<16x86xf32>
    %cst_291 = arith.constant 0.707106769 : f32
    %769 = vector.broadcast %cst_291 : f32 to vector<16x86xf32>
    %770 = arith.mulf %766, %769 : vector<16x86xf32>
    %cst_292 = arith.constant -4.000000e+00 : f32
    %cst_293 = arith.constant 4.000000e+00 : f32
    %771 = vector.broadcast %cst_292 : f32 to vector<16x86xf32>
    %772 = arith.maximumf %771, %770 : vector<16x86xf32>
    %773 = vector.broadcast %cst_293 : f32 to vector<16x86xf32>
    %774 = arith.minimumf %773, %772 : vector<16x86xf32>
    %775 = arith.mulf %774, %774 : vector<16x86xf32>
    %cst_294 = arith.constant -2.72614237E-10 : f32
    %776 = vector.broadcast %cst_294 : f32 to vector<16x86xf32>
    %777 = arith.mulf %776, %775 : vector<16x86xf32>
    %cst_295 = arith.constant 2.77068146E-8 : f32
    %778 = vector.broadcast %cst_295 : f32 to vector<16x86xf32>
    %779 = arith.addf %777, %778 : vector<16x86xf32>
    %780 = arith.mulf %779, %775 : vector<16x86xf32>
    %cst_296 = arith.constant -2.10102394E-6 : f32
    %781 = vector.broadcast %cst_296 : f32 to vector<16x86xf32>
    %782 = arith.addf %780, %781 : vector<16x86xf32>
    %783 = arith.mulf %782, %775 : vector<16x86xf32>
    %cst_297 = arith.constant -5.69250624E-5 : f32
    %784 = vector.broadcast %cst_297 : f32 to vector<16x86xf32>
    %785 = arith.addf %783, %784 : vector<16x86xf32>
    %786 = arith.mulf %785, %775 : vector<16x86xf32>
    %cst_298 = arith.constant -7.34990637E-4 : f32
    %787 = vector.broadcast %cst_298 : f32 to vector<16x86xf32>
    %788 = arith.addf %786, %787 : vector<16x86xf32>
    %789 = arith.mulf %788, %775 : vector<16x86xf32>
    %cst_299 = arith.constant -2.954600e-03 : f32
    %790 = vector.broadcast %cst_299 : f32 to vector<16x86xf32>
    %791 = arith.addf %789, %790 : vector<16x86xf32>
    %792 = arith.mulf %791, %775 : vector<16x86xf32>
    %cst_300 = arith.constant -0.0160960332 : f32
    %793 = vector.broadcast %cst_300 : f32 to vector<16x86xf32>
    %794 = arith.addf %792, %793 : vector<16x86xf32>
    %795 = arith.mulf %794, %774 : vector<16x86xf32>
    %cst_301 = arith.constant -1.45660715E-5 : f32
    %796 = vector.broadcast %cst_301 : f32 to vector<16x86xf32>
    %797 = arith.mulf %796, %775 : vector<16x86xf32>
    %cst_302 = arith.constant -2.13374049E-4 : f32
    %798 = vector.broadcast %cst_302 : f32 to vector<16x86xf32>
    %799 = arith.addf %797, %798 : vector<16x86xf32>
    %800 = arith.mulf %799, %775 : vector<16x86xf32>
    %cst_303 = arith.constant -0.00168282702 : f32
    %801 = vector.broadcast %cst_303 : f32 to vector<16x86xf32>
    %802 = arith.addf %800, %801 : vector<16x86xf32>
    %803 = arith.mulf %802, %775 : vector<16x86xf32>
    %cst_304 = arith.constant -0.00737332925 : f32
    %804 = vector.broadcast %cst_304 : f32 to vector<16x86xf32>
    %805 = arith.addf %803, %804 : vector<16x86xf32>
    %806 = arith.mulf %805, %775 : vector<16x86xf32>
    %cst_305 = arith.constant -0.0142647391 : f32
    %807 = vector.broadcast %cst_305 : f32 to vector<16x86xf32>
    %808 = arith.addf %806, %807 : vector<16x86xf32>
    %809 = arith.divf %795, %808 : vector<16x86xf32>
    %cst_306 = arith.constant 1.000000e+00 : f32
    %810 = vector.broadcast %cst_306 : f32 to vector<16x86xf32>
    %811 = arith.addf %810, %809 : vector<16x86xf32>
    %812 = arith.mulf %768, %811 : vector<16x86xf32>
    %813 = vector.extract_strided_slice %812 {offsets = [0, 0], sizes = [16, 52], strides = [1, 1]} : vector<16x86xf32> to vector<16x52xf32>
    %814 = vector.extract_strided_slice %812 {offsets = [0, 1], sizes = [16, 52], strides = [1, 1]} : vector<16x86xf32> to vector<16x52xf32>
    %815 = vector.extract_strided_slice %812 {offsets = [0, 2], sizes = [16, 52], strides = [1, 1]} : vector<16x86xf32> to vector<16x52xf32>
    %816 = vector.extract_strided_slice %812 {offsets = [0, 16], sizes = [16, 52], strides = [1, 1]} : vector<16x86xf32> to vector<16x52xf32>
    %817 = vector.extract_strided_slice %812 {offsets = [0, 17], sizes = [16, 52], strides = [1, 1]} : vector<16x86xf32> to vector<16x52xf32>
    %818 = vector.extract_strided_slice %812 {offsets = [0, 18], sizes = [16, 52], strides = [1, 1]} : vector<16x86xf32> to vector<16x52xf32>
    %819 = vector.extract_strided_slice %812 {offsets = [0, 32], sizes = [16, 52], strides = [1, 1]} : vector<16x86xf32> to vector<16x52xf32>
    %820 = vector.extract_strided_slice %812 {offsets = [0, 33], sizes = [16, 52], strides = [1, 1]} : vector<16x86xf32> to vector<16x52xf32>
    %821 = vector.extract_strided_slice %812 {offsets = [0, 34], sizes = [16, 52], strides = [1, 1]} : vector<16x86xf32> to vector<16x52xf32>
    %822 = tpu.concatenate %813, %814, %815, %816, %817, %818, %819, %820, %821 in 0 : vector<16x52xf32>, vector<16x52xf32>, vector<16x52xf32>, vector<16x52xf32>, vector<16x52xf32>, vector<16x52xf32>, vector<16x52xf32>, vector<16x52xf32>, vector<16x52xf32> -> vector<144x52xf32>
    %c4_307 = arith.constant 4 : index
    %c0_308 = arith.constant 0 : index
    %c0_309 = arith.constant 0 : index
    %823 = vector.load %arg3[%c4_307, %c0_308, %c0_309] : memref<6x16x144xf32, #tpu.memory_space<vmem>>, vector<1x16x144xf32>
    %824 = vector.shape_cast %823 : vector<1x16x144xf32> to vector<16x144xf32>
    %cst_310 = arith.constant dense<0.000000e+00> : vector<16x52xf32>
    %825 = tpu.matmul %824, %822, %cst_310 {dimension_numbers = #tpu.dot_dimension_numbers<[1], [0], [0], [1], [0, 0, 1, 1], [], []>} : vector<16x144xf32>, vector<144x52xf32>, vector<16x52xf32> -> vector<16x52xf32>
    %c5_311 = arith.constant 5 : index
    %c0_312 = arith.constant 0 : index
    %c0_313 = arith.constant 0 : index
    %826 = vector.load %arg4[%c5_311, %c0_312, %c0_313] : memref<7x16x1xf32, #tpu.memory_space<vmem>>, vector<1x16x1xf32>
    %827 = vector.shape_cast %826 : vector<1x16x1xf32> to vector<16x1xf32>
    %828 = vector.broadcast %827 : vector<16x1xf32> to vector<16x52xf32>
    %829 = arith.addf %825, %828 : vector<16x52xf32>
    %cst_314 = arith.constant 5.000000e-01 : f32
    %830 = vector.broadcast %cst_314 : f32 to vector<16x52xf32>
    %831 = arith.mulf %830, %829 : vector<16x52xf32>
    %cst_315 = arith.constant 0.707106769 : f32
    %832 = vector.broadcast %cst_315 : f32 to vector<16x52xf32>
    %833 = arith.mulf %829, %832 : vector<16x52xf32>
    %cst_316 = arith.constant -4.000000e+00 : f32
    %cst_317 = arith.constant 4.000000e+00 : f32
    %834 = vector.broadcast %cst_316 : f32 to vector<16x52xf32>
    %835 = arith.maximumf %834, %833 : vector<16x52xf32>
    %836 = vector.broadcast %cst_317 : f32 to vector<16x52xf32>
    %837 = arith.minimumf %836, %835 : vector<16x52xf32>
    %838 = arith.mulf %837, %837 : vector<16x52xf32>
    %cst_318 = arith.constant -2.72614237E-10 : f32
    %839 = vector.broadcast %cst_318 : f32 to vector<16x52xf32>
    %840 = arith.mulf %839, %838 : vector<16x52xf32>
    %cst_319 = arith.constant 2.77068146E-8 : f32
    %841 = vector.broadcast %cst_319 : f32 to vector<16x52xf32>
    %842 = arith.addf %840, %841 : vector<16x52xf32>
    %843 = arith.mulf %842, %838 : vector<16x52xf32>
    %cst_320 = arith.constant -2.10102394E-6 : f32
    %844 = vector.broadcast %cst_320 : f32 to vector<16x52xf32>
    %845 = arith.addf %843, %844 : vector<16x52xf32>
    %846 = arith.mulf %845, %838 : vector<16x52xf32>
    %cst_321 = arith.constant -5.69250624E-5 : f32
    %847 = vector.broadcast %cst_321 : f32 to vector<16x52xf32>
    %848 = arith.addf %846, %847 : vector<16x52xf32>
    %849 = arith.mulf %848, %838 : vector<16x52xf32>
    %cst_322 = arith.constant -7.34990637E-4 : f32
    %850 = vector.broadcast %cst_322 : f32 to vector<16x52xf32>
    %851 = arith.addf %849, %850 : vector<16x52xf32>
    %852 = arith.mulf %851, %838 : vector<16x52xf32>
    %cst_323 = arith.constant -2.954600e-03 : f32
    %853 = vector.broadcast %cst_323 : f32 to vector<16x52xf32>
    %854 = arith.addf %852, %853 : vector<16x52xf32>
    %855 = arith.mulf %854, %838 : vector<16x52xf32>
    %cst_324 = arith.constant -0.0160960332 : f32
    %856 = vector.broadcast %cst_324 : f32 to vector<16x52xf32>
    %857 = arith.addf %855, %856 : vector<16x52xf32>
    %858 = arith.mulf %857, %837 : vector<16x52xf32>
    %cst_325 = arith.constant -1.45660715E-5 : f32
    %859 = vector.broadcast %cst_325 : f32 to vector<16x52xf32>
    %860 = arith.mulf %859, %838 : vector<16x52xf32>
    %cst_326 = arith.constant -2.13374049E-4 : f32
    %861 = vector.broadcast %cst_326 : f32 to vector<16x52xf32>
    %862 = arith.addf %860, %861 : vector<16x52xf32>
    %863 = arith.mulf %862, %838 : vector<16x52xf32>
    %cst_327 = arith.constant -0.00168282702 : f32
    %864 = vector.broadcast %cst_327 : f32 to vector<16x52xf32>
    %865 = arith.addf %863, %864 : vector<16x52xf32>
    %866 = arith.mulf %865, %838 : vector<16x52xf32>
    %cst_328 = arith.constant -0.00737332925 : f32
    %867 = vector.broadcast %cst_328 : f32 to vector<16x52xf32>
    %868 = arith.addf %866, %867 : vector<16x52xf32>
    %869 = arith.mulf %868, %838 : vector<16x52xf32>
    %cst_329 = arith.constant -0.0142647391 : f32
    %870 = vector.broadcast %cst_329 : f32 to vector<16x52xf32>
    %871 = arith.addf %869, %870 : vector<16x52xf32>
    %872 = arith.divf %858, %871 : vector<16x52xf32>
    %cst_330 = arith.constant 1.000000e+00 : f32
    %873 = vector.broadcast %cst_330 : f32 to vector<16x52xf32>
    %874 = arith.addf %873, %872 : vector<16x52xf32>
    %875 = arith.mulf %831, %874 : vector<16x52xf32>
    %876 = vector.extract_strided_slice %875 {offsets = [0, 0], sizes = [16, 18], strides = [1, 1]} : vector<16x52xf32> to vector<16x18xf32>
    %877 = vector.extract_strided_slice %875 {offsets = [0, 1], sizes = [16, 18], strides = [1, 1]} : vector<16x52xf32> to vector<16x18xf32>
    %878 = vector.extract_strided_slice %875 {offsets = [0, 2], sizes = [16, 18], strides = [1, 1]} : vector<16x52xf32> to vector<16x18xf32>
    %879 = vector.extract_strided_slice %875 {offsets = [0, 16], sizes = [16, 18], strides = [1, 1]} : vector<16x52xf32> to vector<16x18xf32>
    %880 = vector.extract_strided_slice %875 {offsets = [0, 17], sizes = [16, 18], strides = [1, 1]} : vector<16x52xf32> to vector<16x18xf32>
    %881 = vector.extract_strided_slice %875 {offsets = [0, 18], sizes = [16, 18], strides = [1, 1]} : vector<16x52xf32> to vector<16x18xf32>
    %882 = vector.extract_strided_slice %875 {offsets = [0, 32], sizes = [16, 18], strides = [1, 1]} : vector<16x52xf32> to vector<16x18xf32>
    %883 = vector.extract_strided_slice %875 {offsets = [0, 33], sizes = [16, 18], strides = [1, 1]} : vector<16x52xf32> to vector<16x18xf32>
    %884 = vector.extract_strided_slice %875 {offsets = [0, 34], sizes = [16, 18], strides = [1, 1]} : vector<16x52xf32> to vector<16x18xf32>
    %885 = tpu.concatenate %876, %877, %878, %879, %880, %881, %882, %883, %884 in 0 : vector<16x18xf32>, vector<16x18xf32>, vector<16x18xf32>, vector<16x18xf32>, vector<16x18xf32>, vector<16x18xf32>, vector<16x18xf32>, vector<16x18xf32>, vector<16x18xf32> -> vector<144x18xf32>
    %c5_331 = arith.constant 5 : index
    %c0_332 = arith.constant 0 : index
    %c0_333 = arith.constant 0 : index
    %886 = vector.load %arg3[%c5_331, %c0_332, %c0_333] : memref<6x16x144xf32, #tpu.memory_space<vmem>>, vector<1x16x144xf32>
    %887 = vector.shape_cast %886 : vector<1x16x144xf32> to vector<16x144xf32>
    %cst_334 = arith.constant dense<0.000000e+00> : vector<16x18xf32>
    %888 = tpu.matmul %887, %885, %cst_334 {dimension_numbers = #tpu.dot_dimension_numbers<[1], [0], [0], [1], [0, 0, 1, 1], [], []>} : vector<16x144xf32>, vector<144x18xf32>, vector<16x18xf32> -> vector<16x18xf32>
    %c6_335 = arith.constant 6 : index
    %c0_336 = arith.constant 0 : index
    %c0_337 = arith.constant 0 : index
    %889 = vector.load %arg4[%c6_335, %c0_336, %c0_337] : memref<7x16x1xf32, #tpu.memory_space<vmem>>, vector<1x16x1xf32>
    %890 = vector.shape_cast %889 : vector<1x16x1xf32> to vector<16x1xf32>
    %891 = vector.broadcast %890 : vector<16x1xf32> to vector<16x18xf32>
    %892 = arith.addf %888, %891 : vector<16x18xf32>
    %cst_338 = arith.constant 5.000000e-01 : f32
    %893 = vector.broadcast %cst_338 : f32 to vector<16x18xf32>
    %894 = arith.mulf %893, %892 : vector<16x18xf32>
    %cst_339 = arith.constant 0.707106769 : f32
    %895 = vector.broadcast %cst_339 : f32 to vector<16x18xf32>
    %896 = arith.mulf %892, %895 : vector<16x18xf32>
    %cst_340 = arith.constant -4.000000e+00 : f32
    %cst_341 = arith.constant 4.000000e+00 : f32
    %897 = vector.broadcast %cst_340 : f32 to vector<16x18xf32>
    %898 = arith.maximumf %897, %896 : vector<16x18xf32>
    %899 = vector.broadcast %cst_341 : f32 to vector<16x18xf32>
    %900 = arith.minimumf %899, %898 : vector<16x18xf32>
    %901 = arith.mulf %900, %900 : vector<16x18xf32>
    %cst_342 = arith.constant -2.72614237E-10 : f32
    %902 = vector.broadcast %cst_342 : f32 to vector<16x18xf32>
    %903 = arith.mulf %902, %901 : vector<16x18xf32>
    %cst_343 = arith.constant 2.77068146E-8 : f32
    %904 = vector.broadcast %cst_343 : f32 to vector<16x18xf32>
    %905 = arith.addf %903, %904 : vector<16x18xf32>
    %906 = arith.mulf %905, %901 : vector<16x18xf32>
    %cst_344 = arith.constant -2.10102394E-6 : f32
    %907 = vector.broadcast %cst_344 : f32 to vector<16x18xf32>
    %908 = arith.addf %906, %907 : vector<16x18xf32>
    %909 = arith.mulf %908, %901 : vector<16x18xf32>
    %cst_345 = arith.constant -5.69250624E-5 : f32
    %910 = vector.broadcast %cst_345 : f32 to vector<16x18xf32>
    %911 = arith.addf %909, %910 : vector<16x18xf32>
    %912 = arith.mulf %911, %901 : vector<16x18xf32>
    %cst_346 = arith.constant -7.34990637E-4 : f32
    %913 = vector.broadcast %cst_346 : f32 to vector<16x18xf32>
    %914 = arith.addf %912, %913 : vector<16x18xf32>
    %915 = arith.mulf %914, %901 : vector<16x18xf32>
    %cst_347 = arith.constant -2.954600e-03 : f32
    %916 = vector.broadcast %cst_347 : f32 to vector<16x18xf32>
    %917 = arith.addf %915, %916 : vector<16x18xf32>
    %918 = arith.mulf %917, %901 : vector<16x18xf32>
    %cst_348 = arith.constant -0.0160960332 : f32
    %919 = vector.broadcast %cst_348 : f32 to vector<16x18xf32>
    %920 = arith.addf %918, %919 : vector<16x18xf32>
    %921 = arith.mulf %920, %900 : vector<16x18xf32>
    %cst_349 = arith.constant -1.45660715E-5 : f32
    %922 = vector.broadcast %cst_349 : f32 to vector<16x18xf32>
    %923 = arith.mulf %922, %901 : vector<16x18xf32>
    %cst_350 = arith.constant -2.13374049E-4 : f32
    %924 = vector.broadcast %cst_350 : f32 to vector<16x18xf32>
    %925 = arith.addf %923, %924 : vector<16x18xf32>
    %926 = arith.mulf %925, %901 : vector<16x18xf32>
    %cst_351 = arith.constant -0.00168282702 : f32
    %927 = vector.broadcast %cst_351 : f32 to vector<16x18xf32>
    %928 = arith.addf %926, %927 : vector<16x18xf32>
    %929 = arith.mulf %928, %901 : vector<16x18xf32>
    %cst_352 = arith.constant -0.00737332925 : f32
    %930 = vector.broadcast %cst_352 : f32 to vector<16x18xf32>
    %931 = arith.addf %929, %930 : vector<16x18xf32>
    %932 = arith.mulf %931, %901 : vector<16x18xf32>
    %cst_353 = arith.constant -0.0142647391 : f32
    %933 = vector.broadcast %cst_353 : f32 to vector<16x18xf32>
    %934 = arith.addf %932, %933 : vector<16x18xf32>
    %935 = arith.divf %921, %934 : vector<16x18xf32>
    %cst_354 = arith.constant 1.000000e+00 : f32
    %936 = vector.broadcast %cst_354 : f32 to vector<16x18xf32>
    %937 = arith.addf %936, %935 : vector<16x18xf32>
    %938 = arith.mulf %894, %937 : vector<16x18xf32>
    %c0_355 = arith.constant 0 : index
    %c0_356 = arith.constant 0 : index
    %939 = vector.load %arg5[%c0_355, %c0_356] : memref<1x16xf32, #tpu.memory_space<vmem>>, vector<1x16xf32>
    %cst_357 = arith.constant dense<0.000000e+00> : vector<1x18xf32>
    %940 = tpu.matmul %939, %938, %cst_357 {dimension_numbers = #tpu.dot_dimension_numbers<[1], [0], [0], [1], [0, 0, 1, 1], [], []>} : vector<1x16xf32>, vector<16x18xf32>, vector<1x18xf32> -> vector<1x18xf32>
    %c0_358 = arith.constant 0 : index
    %c0_359 = arith.constant 0 : index
    %941 = vector.load %arg6[%c0_358, %c0_359] : memref<1x1xf32, #tpu.memory_space<vmem>>, vector<1x1xf32>
    %942 = vector.broadcast %941 : vector<1x1xf32> to vector<1x18xf32>
    %943 = arith.addf %940, %942 : vector<1x18xf32>
    %cst_360 = arith.constant 5.000000e-01 : f32
    %944 = vector.broadcast %cst_360 : f32 to vector<1x18xf32>
    %945 = arith.mulf %944, %943 : vector<1x18xf32>
    %cst_361 = arith.constant 0.707106769 : f32
    %946 = vector.broadcast %cst_361 : f32 to vector<1x18xf32>
    %947 = arith.mulf %943, %946 : vector<1x18xf32>
    %cst_362 = arith.constant -4.000000e+00 : f32
    %cst_363 = arith.constant 4.000000e+00 : f32
    %948 = vector.broadcast %cst_362 : f32 to vector<1x18xf32>
    %949 = arith.maximumf %948, %947 : vector<1x18xf32>
    %950 = vector.broadcast %cst_363 : f32 to vector<1x18xf32>
    %951 = arith.minimumf %950, %949 : vector<1x18xf32>
    %952 = arith.mulf %951, %951 : vector<1x18xf32>
    %cst_364 = arith.constant -2.72614237E-10 : f32
    %953 = vector.broadcast %cst_364 : f32 to vector<1x18xf32>
    %954 = arith.mulf %953, %952 : vector<1x18xf32>
    %cst_365 = arith.constant 2.77068146E-8 : f32
    %955 = vector.broadcast %cst_365 : f32 to vector<1x18xf32>
    %956 = arith.addf %954, %955 : vector<1x18xf32>
    %957 = arith.mulf %956, %952 : vector<1x18xf32>
    %cst_366 = arith.constant -2.10102394E-6 : f32
    %958 = vector.broadcast %cst_366 : f32 to vector<1x18xf32>
    %959 = arith.addf %957, %958 : vector<1x18xf32>
    %960 = arith.mulf %959, %952 : vector<1x18xf32>
    %cst_367 = arith.constant -5.69250624E-5 : f32
    %961 = vector.broadcast %cst_367 : f32 to vector<1x18xf32>
    %962 = arith.addf %960, %961 : vector<1x18xf32>
    %963 = arith.mulf %962, %952 : vector<1x18xf32>
    %cst_368 = arith.constant -7.34990637E-4 : f32
    %964 = vector.broadcast %cst_368 : f32 to vector<1x18xf32>
    %965 = arith.addf %963, %964 : vector<1x18xf32>
    %966 = arith.mulf %965, %952 : vector<1x18xf32>
    %cst_369 = arith.constant -2.954600e-03 : f32
    %967 = vector.broadcast %cst_369 : f32 to vector<1x18xf32>
    %968 = arith.addf %966, %967 : vector<1x18xf32>
    %969 = arith.mulf %968, %952 : vector<1x18xf32>
    %cst_370 = arith.constant -0.0160960332 : f32
    %970 = vector.broadcast %cst_370 : f32 to vector<1x18xf32>
    %971 = arith.addf %969, %970 : vector<1x18xf32>
    %972 = arith.mulf %971, %951 : vector<1x18xf32>
    %cst_371 = arith.constant -1.45660715E-5 : f32
    %973 = vector.broadcast %cst_371 : f32 to vector<1x18xf32>
    %974 = arith.mulf %973, %952 : vector<1x18xf32>
    %cst_372 = arith.constant -2.13374049E-4 : f32
    %975 = vector.broadcast %cst_372 : f32 to vector<1x18xf32>
    %976 = arith.addf %974, %975 : vector<1x18xf32>
    %977 = arith.mulf %976, %952 : vector<1x18xf32>
    %cst_373 = arith.constant -0.00168282702 : f32
    %978 = vector.broadcast %cst_373 : f32 to vector<1x18xf32>
    %979 = arith.addf %977, %978 : vector<1x18xf32>
    %980 = arith.mulf %979, %952 : vector<1x18xf32>
    %cst_374 = arith.constant -0.00737332925 : f32
    %981 = vector.broadcast %cst_374 : f32 to vector<1x18xf32>
    %982 = arith.addf %980, %981 : vector<1x18xf32>
    %983 = arith.mulf %982, %952 : vector<1x18xf32>
    %cst_375 = arith.constant -0.0142647391 : f32
    %984 = vector.broadcast %cst_375 : f32 to vector<1x18xf32>
    %985 = arith.addf %983, %984 : vector<1x18xf32>
    %986 = arith.divf %972, %985 : vector<1x18xf32>
    %cst_376 = arith.constant 1.000000e+00 : f32
    %987 = vector.broadcast %cst_376 : f32 to vector<1x18xf32>
    %988 = arith.addf %987, %986 : vector<1x18xf32>
    %989 = arith.mulf %945, %988 : vector<1x18xf32>
    %c1_377 = arith.constant 1 : index
    %c0_378 = arith.constant 0 : index
    %c0_379 = arith.constant 0 : index
    %990 = vector.load %arg7[%c1_377, %c0_378, %c0_379] : memref<2x1x18xf32, #tpu.memory_space<vmem>>, vector<1x1x18xf32>
    %991 = vector.shape_cast %990 : vector<1x1x18xf32> to vector<1x18xf32>
    %992 = vector.shape_cast %989 : vector<1x18xf32> to vector<1x1x18xf32>
    tpu.vector_store %arg7[%c1_377, %c0_378, %c0_379], %992 {strides = array<i32>} : memref<2x1x18xf32, #tpu.memory_space<vmem>>, vector<1x1x18xf32>,
    return
  }
  func.func @transform_0(%arg0: i32) -> (i32, i32) {
    %c0_i32 = arith.constant 0 : i32
    %c0_i32_0 = arith.constant 0 : i32
    %c0_i32_1 = arith.constant 0 : i32
    return %c0_i32, %c0_i32_0 : i32, i32
  }
  func.func @transform_1(%arg0: i32) -> (i32, i32) {
    %c0_i32 = arith.constant 0 : i32
    %c0_i32_0 = arith.constant 0 : i32
    %c0_i32_1 = arith.constant 0 : i32
    return %c0_i32, %c0_i32_0 : i32, i32
  }
  func.func @transform_2(%arg0: i32) -> (i32, i32, i32) {
    %c0_i32 = arith.constant 0 : i32
    %c0_i32_0 = arith.constant 0 : i32
    %c0_i32_1 = arith.constant 0 : i32
    %c0_i32_2 = arith.constant 0 : i32
    return %c0_i32, %c0_i32_0, %c0_i32_1 : i32, i32, i32
  }
  func.func @transform_3(%arg0: i32) -> (i32, i32, i32) {
    %c0_i32 = arith.constant 0 : i32
    %c0_i32_0 = arith.constant 0 : i32
    %c0_i32_1 = arith.constant 0 : i32
    %c0_i32_2 = arith.constant 0 : i32
    return %c0_i32, %c0_i32_0, %c0_i32_1 : i32, i32, i32
  }
  func.func @transform_4(%arg0: i32) -> (i32, i32) {
    %c0_i32 = arith.constant 0 : i32
    %c0_i32_0 = arith.constant 0 : i32
    %c0_i32_1 = arith.constant 0 : i32
    return %c0_i32, %c0_i32_0 : i32, i32
  }
  func.func @transform_5(%arg0: i32) -> (i32, i32) {
    %c0_i32 = arith.constant 0 : i32
    %c0_i32_0 = arith.constant 0 : i32
    %c0_i32_1 = arith.constant 0 : i32
    return %c0_i32, %c0_i32_0 : i32, i32
  }
  func.func @transform_6(%arg0: i32) -> (i32, i32, i32) {
    %c0_i32 = arith.constant 0 : i32
    %c0_i32_0 = arith.constant 0 : i32
    %c0_i32_1 = arith.constant 0 : i32
    %c0_i32_2 = arith.constant 0 : i32
    return %c0_i32, %c0_i32_0, %c0_i32_1 : i32, i32, i32
  }
}

</mosaic_0001>

<bundles_post_ra>
// kernel: _cnn_encoder_impl.1
= control target key start
LH: loop header
LB: loop body
LE: loop exit
PB: predicated region body
PF: predicated region fallthrough
CT: control target
= control target key end

     0   :  { %s5976_s0 = inlined_call_operand.vmem [shape: f32[2,256], index: 0, kind: input, shape index: {}]   ;;  %s5977_s1 = inlined_call_operand.vmem [shape: f32[16,16], index: 1, kind: input, shape index: {}]   ;;  %s5978_s2 = inlined_call_operand.hbm [shape: f32[6,16,144], index: 2, kind: input, shape index: {}]   ;;  %s5979_s3 = inlined_call_operand.vmem [shape: f32[7,16,1], index: 3, kind: input, shape index: {}]   ;;  %s5980_s4 = inlined_call_operand.vmem [shape: f32[1,16], index: 4, kind: input, shape index: {}]   ;;  %s5981_s5 = inlined_call_operand.<no memory space> [shape: f32[1,1], index: 5, kind: input, shape index: {}]   ;;  %s5982_s6 = inlined_call_operand.vmem [shape: f32[2,1,18], index: 6, kind: output, shape index: {}]  }
   0x1   :  { %v11_v0 = vstv %s5981_s5 }
   0x2   :  { %12 = vst [vmem:[#allocation2] sm:$0x1] %v11_v0 }
   0x3   :  { %13 = vsyncpa [#allocation4], 0  ;;  %s4219_s23 = smov [#allocation3]  }
   0x4   :  { %s23_s24 = sshll.u32 %s4219_s23, 4  ;;  %s24_s24 = int_to_ptr.vmem [resolvable:$true] %s23_s24 }
   0x5   :  { %s4205_s25 = scalar_lea.vmem %s24_s24, 3072  ;;  %p4210_p1 = scmp.lt.s32.totalorder %s24_s24, %s24_s24 }
   0x6   :  { %p4206_p0 = scmp.ne.s32.totalorder %s24_s24, %s4205_s25  ;;  %p4211_p2 = scmp.lt.s32.totalorder %s4205_s25, %s4205_s25 }
   0x8   :  { %p4212_p3 = por %p4211_p2, %p4210_p1 }
   0xa   :  { %p4213_p4 = pnand %p4212_p3, %p4206_p0 }
   0xc   :  { %4216 = shalt.err (!%p4213_p4)
}
   0xd   :  { %s4220_s26 = smov 256   ;;  %s4221_s27 = smov 16  }
   0xe   :  { %29 = dma.hbm_to_vmem [thread:$0]  %s5978_s2, 3072, %s24_s24, [#allocation4], %s4220_s26, %s4220_s26, %s4221_s27  }
   0xf   :  { %4217 = dma.done.wait [#allocation4], 3072  }
  0x10   :  { %4218 = vsyncadd [#allocation4], 4294964224  ;;  %v41_v1 = vlaneseq  ;;  %v39_v5 = vld [vmem:[%s5976_s0] sm:$0xf]  ;;  %s4222_s7 = smov 126   ;;  %s4223_s2 = smov 127  }
  0x11   :  { %s4224_s8 = smov 112   ;;  %s4225_s9 = smov 111   ;;  %v4227_v8 = vmov 0.0   ;;  %v4229_v9 = vmov 0   ;;  %v140_v10 = vld [vmem:[%s5979_s3] sm:$0xff]  ;;  %v141_v11 = vld [vmem:[%s5979_s3 + $0x8] sm:$0xff] }
  0x12   :  { %v4274_v2 = vshrl.u32 %v41_v1, 7  ;;  %s4226_s10 = smov 110   ;;  %223 = vmatprep.mubr.f32.mxu0 %v4227_v8  ;;  %s4228_s11 = smov 96   ;;  %4111 = vset.pattern.permute.xlu1 %v4229_v9  ;;  %vm55_vm0 = vcmask 1039360   ;;  %vm115_vm1 = vcmask 1040384   ;;  %vm63_vm2 = vcmask 1031168  }
  0x13   :  { %4110 = vset.pattern.permute.xlu0 %v4229_v9  ;;  %s4230_s12 = smov 94   ;;  %s4231_s13 = smov 95   ;;  %vm71_vm3 = vcmask 916480   ;;  %vm118_vm4 = vcmask 1041408   ;;  %vm121_vm5 = vcmask 1042432   ;;  %vm79_vm6 = vcmask 908288  }
  0x14   :  { %v4277_v3 = vsub.s32 0, %v4274_v2  ;;  %v47_v4 = vsub.s32 2, %v4274_v2  ;;  %vm87_vm7 = vcmask 900096   ;;  %vm111_vm8 = vcmask 769024   ;;  %v138_v49 = vld [vmem:[%s5977_s1] sm:$0xff]  ;;  %v139_v51 = vld [vmem:[%s5977_s1 + $0x8] sm:$0xff] }
  0x15   :  { %vm124_vm9 = vcmask 1043456   ;;  %vm127_vm10 = vcmask 1044480   ;;  %vm95_vm11 = vcmask 785408   ;;  %vm130_vm12 = vcmask 1045504  }
  0x16   :  { %v44_v6 = vrot.slane %v39_v5, %v4277_v3  ;;  %v48_v7 = vrot.slane %v39_v5, %v47_v4  ;;  %vm103_vm13 = vcmask 777216   ;;  %vm133_vm14 = vcmask 1046528  }
  0x17   :  { %vm152_vm15 = vcmask 130048  }
  0x18   :  { %59 = vrot.lane.b32.xlu1 %v44_v6, %s4222_s7  ;;  %51 = vrot.lane.b32.xlu0 %v44_v6, %s4223_s2 }
  0x1c   :  { %61 = vrot.lane.b32.xlu1 %v48_v7, %s4222_s7  ;;  %53 = vrot.lane.b32.xlu0 %v48_v7, %s4223_s2 }
  0x20   :  { %69 = vrot.lane.b32.xlu1 %v48_v7, %s4224_s8  ;;  %67 = vrot.lane.b32.xlu0 %v44_v6, %s4224_s8 }
  0x24   :  { %77 = vrot.lane.b32.xlu1 %v48_v7, %s4225_s9  ;;  %75 = vrot.lane.b32.xlu0 %v44_v6, %s4225_s9 }
  0x28   :  { %85 = vrot.lane.b32.xlu1 %v48_v7, %s4226_s10  ;;  %83 = vrot.lane.b32.xlu0 %v44_v6, %s4226_s10 }
  0x2c   :  { %93 = vrot.lane.b32.xlu1 %v48_v7, %s4228_s11  ;;  %91 = vrot.lane.b32.xlu0 %v44_v6, %s4228_s11 }
  0x30   :  { %109 = vrot.lane.b32.xlu1 %v48_v7, %s4230_s12  ;;  %107 = vrot.lane.b32.xlu0 %v44_v6, %s4230_s12 }
  0x34   :  { %101 = vrot.lane.b32.xlu1 %v48_v7, %s4231_s13  ;;  %99 = vrot.lane.b32.xlu0 %v44_v6, %s4231_s13 }
  0x38   :  { %144 = vperm.xlu1 %4111, %v140_v10   ;;  %149 = vperm.xlu0 %4110, %v141_v11  }
  0x8a   :  { %v60_v12 = vpop.permute.xlu1 %59  ;;  %v52_v13 = vpop.permute.xlu0 %51 }
  0x8e   :  { %v62_v14 = vpop.permute.xlu1 %61  ;;  %v54_v15 = vpop.permute.xlu0 %53 }
  0x8f   :  { %v56_v22 = vsel %vm55_vm0, %v52_v13, %v54_v15  ;;  %v117_v25 = vsel %vm115_vm1, %v48_v7, %v54_v15  ;;  %v64_v26 = vsel %vm63_vm2, %v60_v12, %v62_v14 }
  0x90   :  { %v116_v27 = vsel %vm115_vm1, %v44_v6, %v56_v22  ;;  %v120_v29 = vsel %vm118_vm4, %v117_v25, %v62_v14 }
  0x91   :  { %v119_v34 = vsel %vm118_vm4, %v116_v27, %v64_v26 }
  0x92   :  { %v70_v16 = vpop.permute.xlu1 %69  ;;  %v68_v17 = vpop.permute.xlu0 %67 }
  0x93   :  { %v72_v28 = vsel %vm71_vm3, %v68_v17, %v70_v16  ;;  %v123_v33 = vsel %vm121_vm5, %v120_v29, %v70_v16 }
  0x94   :  { %v122_v37 = vsel %vm121_vm5, %v119_v34, %v72_v28 }
  0x96   :  { %v78_v18 = vpop.permute.xlu1 %77  ;;  %v76_v19 = vpop.permute.xlu0 %75 }
  0x97   :  { %v80_v30 = vsel %vm79_vm6, %v76_v19, %v78_v18  ;;  %v126_v38 = vsel %vm124_vm9, %v123_v33, %v78_v18 }
  0x98   :  { %v125_v40 = vsel %vm124_vm9, %v122_v37, %v80_v30 }
  0x9a   :  { %v86_v20 = vpop.permute.xlu1 %85  ;;  %v84_v21 = vpop.permute.xlu0 %83 }
  0x9b   :  { %v88_v35 = vsel %vm87_vm7, %v84_v21, %v86_v20  ;;  %v129_v41 = vsel %vm127_vm10, %v126_v38, %v86_v20 }
  0x9c   :  { %v128_v42 = vsel %vm127_vm10, %v125_v40, %v88_v35 }
  0x9e   :  { %v94_v23 = vpop.permute.xlu1 %93  ;;  %v92_v24 = vpop.permute.xlu0 %91 }
  0x9f   :  { %v96_v39 = vsel %vm95_vm11, %v92_v24, %v94_v23  ;;  %v132_v43 = vsel %vm130_vm12, %v129_v41, %v94_v23 }
  0xa0   :  { %v131_v48 = vsel %vm130_vm12, %v128_v42, %v96_v39 }
  0xa2   :  { %v110_v31 = vpop.permute.xlu1 %109  ;;  %v108_v32 = vpop.permute.xlu0 %107 }
  0xa3   :  { %3975 = vmatprep.subr.msk.mxu0 %vm115_vm1, %v110_v31  ;;  %v112_v36 = vsel %vm111_vm8, %v108_v32, %v110_v31 }
  0xa4   :  { %3976 = vmatpush1.msk.msra.mxu0 %vm115_vm1, %v112_v36 }
  0xa6   :  { %v102_v44 = vpop.permute.xlu1 %101  ;;  %v100_v45 = vpop.permute.xlu0 %99 }
  0xa7   :  { %v104_v46 = vsel %vm103_vm13, %v100_v45, %v102_v44  ;;  %v135_v47 = vsel %vm133_vm14, %v132_v43, %v102_v44 }
  0xa8   :  { %189 = vmatprep.subr.mxu0 %v135_v47  ;;  %v134_v50 = vsel %vm133_vm14, %v131_v48, %v104_v46 }
  0xa9   :  { %190 = vmatpush1.msra.mxu0 %v134_v50 }
  0xaa   :  { %3977 = vmatmul.mubr.msk.f32.vlgmr.msra.gmra.mxu0 %vm152_vm15, %v138_v49 }
  0xab   :  { %229 = vmatprep.mubr.f32.mxu0 %v4227_v8 }
  0xae   :  { %3978 = vmatmul.mubr.msk.f32.gmra.mxu0 %vm152_vm15, %v139_v51 }
  0xb3   :  { %v145_v52 = vpop.permute.xlu1 %144  ;;  %v150_v56 = vpop.permute.xlu0 %149 }
 0x16a   :  { %v225_v53 = vpop.f32.mrf.mxu0 }
 0x16b   :  { %v4340_v54 = vadd.f32 %v225_v53, %v145_v52 }
 0x16c   :  { %v227_v55 = vpop.f32.mrf.mxu0 }
 0x16d   :  { %v240_v57 = vmul.f32 0.70710677, %v4340_v54  ;;  %v4343_v58 = vadd.f32 %v227_v55, %v145_v52 }
 0x16e   :  { %v231_v59 = vpop.f32.mrf.mxu0 }
 0x16f   :  { %v4345_v60 = vclamps-f32 %v240_v57, 4.0  ;;  %v241_v61 = vmul.f32 0.70710677, %v4343_v58  ;;  %v4348_v62 = vadd.f32 %v231_v59, %v150_v56 }
 0x170   :  { %v233_v63 = vpop.f32.mrf.mxu0 }
 0x171   :  { %v4352_v0 = vmul.f32 %v4345_v60, %v4345_v60  ;;  %v4354_v1 = vclamps-f32 %v241_v61, 4.0  ;;  %v242_v4 = vmul.f32 0.70710677, %v4348_v62  ;;  %v4357_v5 = vadd.f32 %v233_v63, %v150_v56 }
 0x173   :  { %v256_v6 = vmul.f32 -2.7261424e-10, %v4352_v0  ;;  %v308_v7 = vmul.f32 -1.45660715e-05, %v4352_v0  ;;  %v4363_v9 = vmul.f32 %v4354_v1, %v4354_v1  ;;  %v4365_v10 = vclamps-f32 %v242_v4, 4.0 }
 0x174   :  { %v243_v11 = vmul.f32 0.70710677, %v4357_v5 }
 0x175   :  { %v260_v12 = vadd.f32 2.7706815e-08, %v256_v6  ;;  %v312_v13 = vadd.f32 -0.00021337405, %v308_v7  ;;  %v257_v14 = vmul.f32 -2.7261424e-10, %v4363_v9  ;;  %v4371_v15 = vmul.f32 %v4365_v10, %v4365_v10 }
 0x176   :  { %v309_v16 = vmul.f32 -1.45660715e-05, %v4363_v9  ;;  %v4374_v17 = vclamps-f32 %v243_v11, 4.0 }
 0x177   :  { %v264_v18 = vmul.f32 %v260_v12, %v4352_v0  ;;  %v316_v19 = vmul.f32 %v312_v13, %v4352_v0  ;;  %v261_v20 = vadd.f32 2.7706815e-08, %v257_v14  ;;  %v258_v21 = vmul.f32 -2.7261424e-10, %v4371_v15 }
 0x178   :  { %v313_v22 = vadd.f32 -0.00021337405, %v309_v16  ;;  %v310_v23 = vmul.f32 -1.45660715e-05, %v4371_v15  ;;  %v4382_v24 = vmul.f32 %v4374_v17, %v4374_v17 }
 0x179   :  { %v268_v25 = vadd.f32 -2.101024e-06, %v264_v18  ;;  %v320_v26 = vadd.f32 -0.001682827, %v316_v19  ;;  %v265_v27 = vmul.f32 %v261_v20, %v4363_v9  ;;  %v262_v28 = vadd.f32 2.7706815e-08, %v258_v21 }
 0x17a   :  { %v317_v29 = vmul.f32 %v313_v22, %v4363_v9  ;;  %v314_v30 = vadd.f32 -0.00021337405, %v310_v23  ;;  %v259_v31 = vmul.f32 -2.7261424e-10, %v4382_v24  ;;  %v311_v32 = vmul.f32 -1.45660715e-05, %v4382_v24 }
 0x17b   :  { %v272_v33 = vmul.f32 %v268_v25, %v4352_v0  ;;  %v324_v34 = vmul.f32 %v320_v26, %v4352_v0  ;;  %v269_v35 = vadd.f32 -2.101024e-06, %v265_v27  ;;  %v266_v36 = vmul.f32 %v262_v28, %v4371_v15 }
 0x17c   :  { %v321_v37 = vadd.f32 -0.001682827, %v317_v29  ;;  %v263_v38 = vadd.f32 2.7706815e-08, %v259_v31  ;;  %v315_v39 = vadd.f32 -0.00021337405, %v311_v32  ;;  %v318_v43 = vmul.f32 %v314_v30, %v4371_v15 }
 0x17d   :  { %v276_v40 = vadd.f32 -5.6925062e-05, %v272_v33  ;;  %v328_v41 = vadd.f32 -0.0073733293, %v324_v34  ;;  %v273_v42 = vmul.f32 %v269_v35, %v4363_v9  ;;  %v270_v49 = vadd.f32 -2.101024e-06, %v266_v36 }
 0x17e   :  { %v325_v44 = vmul.f32 %v321_v37, %v4363_v9  ;;  %v267_v45 = vmul.f32 %v263_v38, %v4382_v24  ;;  %v319_v51 = vmul.f32 %v315_v39, %v4382_v24  ;;  %v322_v56 = vadd.f32 -0.001682827, %v318_v43 }
 0x17f   :  { %v280_v46 = vmul.f32 %v276_v40, %v4352_v0  ;;  %v332_v47 = vmul.f32 %v328_v41, %v4352_v0  ;;  %v277_v48 = vadd.f32 -5.6925062e-05, %v273_v42  ;;  %v274_v4 = vmul.f32 %v270_v49, %v4371_v15 }
 0x180   :  { %v329_v50 = vadd.f32 -0.0073733293, %v325_v44  ;;  %v271_v59 = vadd.f32 -2.101024e-06, %v267_v45  ;;  %v323_v7 = vadd.f32 -0.001682827, %v319_v51  ;;  %v326_v13 = vmul.f32 %v322_v56, %v4371_v15 }
 0x181   :  { %v284_v52 = vadd.f32 -0.00073499064, %v280_v46  ;;  %v336_v53 = vadd.f32 -0.014264739, %v332_v47  ;;  %v281_v55 = vmul.f32 %v277_v48, %v4363_v9  ;;  %v278_v19 = vadd.f32 -5.6925062e-05, %v274_v4 }
 0x182   :  { %v333_v57 = vmul.f32 %v329_v50, %v4363_v9  ;;  %v275_v14 = vmul.f32 %v271_v59, %v4382_v24  ;;  %v327_v20 = vmul.f32 %v323_v7, %v4382_v24  ;;  %v330_v21 = vadd.f32 -0.0073733293, %v326_v13 }
 0x183   :  { %v288_v61 = vmul.f32 %v284_v52, %v4352_v0  ;;  %4112 = vrcp.f32 %v336_v53  ;;  %v285_v63 = vadd.f32 -0.00073499064, %v281_v55  ;;  %v282_v26 = vmul.f32 %v278_v19, %v4371_v15 }
 0x184   :  { %v337_v6 = vadd.f32 -0.014264739, %v333_v57  ;;  %v279_v23 = vadd.f32 -5.6925062e-05, %v275_v14  ;;  %v331_v27 = vadd.f32 -0.0073733293, %v327_v20  ;;  %v334_v28 = vmul.f32 %v330_v21, %v4371_v15 }
 0x185   :  { %v292_v11 = vadd.f32 -0.0029546, %v288_v61  ;;  %v289_v12 = vmul.f32 %v285_v63, %v4363_v9  ;;  %v236_v38 = vmul.f32 0.5, %v4340_v54  ;;  %v3983_v61 = vld [vmem:[%s5979_s3 + $0x10] sm:$0xff] }
 0x186   :  { %4114 = vrcp.f32 %v337_v6  ;;  %v283_v30 = vmul.f32 %v279_v23, %v4382_v24  ;;  %v335_v33 = vmul.f32 %v331_v27, %v4382_v24  ;;  %v338_v35 = vadd.f32 -0.014264739, %v334_v28 }
 0x187   :  { %v296_v16 = vmul.f32 %v292_v11, %v4352_v0  ;;  %v293_v18 = vadd.f32 -0.0029546, %v289_v12  ;;  %v286_v0 = vadd.f32 -0.00073499064, %v282_v26 }
 0x188   :  { %v287_v36 = vadd.f32 -0.00073499064, %v283_v30  ;;  %v339_v42 = vadd.f32 -0.014264739, %v335_v33  ;;  %4116 = vrcp.f32 %v338_v35 }
 0x189   :  { %v297_v22 = vmul.f32 %v293_v18, %v4363_v9  ;;  %v300_v25 = vadd.f32 -0.016096033, %v296_v16  ;;  %v290_v40 = vmul.f32 %v286_v0, %v4371_v15 }
 0x18a   :  { %v291_v45 = vmul.f32 %v287_v36, %v4382_v24  ;;  %4118 = vrcp.f32 %v339_v42 }
 0x18b   :  { %v301_v29 = vadd.f32 -0.016096033, %v297_v22  ;;  %v304_v31 = vmul.f32 %v4345_v60, %v300_v25  ;;  %v237_v60 = vmul.f32 0.5, %v4343_v58  ;;  %v294_v46 = vadd.f32 -0.0029546, %v290_v40 }
 0x18c   :  { %v295_v54 = vadd.f32 -0.0029546, %v291_v45 }
 0x18d   :  { %v305_v9 = vmul.f32 %v4354_v1, %v301_v29  ;;  %v298_v47 = vmul.f32 %v294_v46, %v4371_v15 }
 0x18e   :  { %v299_v58 = vmul.f32 %v295_v54, %v4382_v24 }
 0x18f   :  { %v302_v48 = vadd.f32 -0.016096033, %v298_v47 }
 0x190   :  { %v4113_v32 = vpop.eup %4112  ;;  %v303_v50 = vadd.f32 -0.016096033, %v299_v58 }
 0x191   :  { %v341_v34 = vmul.f32 %v4113_v32, %v304_v31  ;;  %v306_v51 = vmul.f32 %v4365_v10, %v302_v48  ;;  %v238_v10 = vmul.f32 0.5, %v4348_v62  ;;  %v473_v62 = vld [vmem:[#allocation3 + $0x8] sm:$0xff] }
 0x192   :  { %v307_v24 = vmul.f32 %v4374_v17, %v303_v50  ;;  %v239_v17 = vmul.f32 0.5, %v4357_v5  ;;  %3985 = vmatprep.mubr.msk.f32.mxu1 %vm152_vm15, %v473_v62  ;;  %v3984_v5 = vld [vmem:[%s5979_s3 + $0x18] sm:$0xff] }
 0x193   :  { %v4115_v37 = vpop.eup %4114  ;;  %v348_v39 = vadd.f32 1.0, %v341_v34 }
 0x194   :  { %v343_v41 = vmul.f32 %v4115_v37, %v305_v9 }
 0x195   :  { %v4416_v43 = vmul.f32 %v348_v39, %v236_v38  ;;  %v4117_v49 = vpop.eup %4116 }
 0x196   :  { %v349_v44 = vadd.f32 1.0, %v343_v41  ;;  %v345_v52 = vmul.f32 %v4117_v49, %v306_v51 }
 0x197   :  { %444 = vrot.lane.b32.xlu1 %v4416_v43, %s4231_s13  ;;  %v4119_v15 = vpop.eup %4118 }
 0x198   :  { %v4422_v1 = vmul.f32 %v349_v44, %v237_v60  ;;  %v347_v53 = vmul.f32 %v4119_v15, %v307_v24  ;;  %v350_v55 = vadd.f32 1.0, %v345_v52  ;;  %v472_v52 = vld [vmem:[#allocation3] sm:$0xff] }
 0x19a   :  { %446 = vrot.lane.b32.xlu0 %v4422_v1, %s4231_s13  ;;  %v351_v56 = vadd.f32 1.0, %v347_v53  ;;  %v4449_v57 = vmul.f32 %v350_v55, %v238_v10  ;;  %v475_v53 = vld [vmem:[#allocation3 + $0x18] sm:$0xff] }
 0x19b   :  { %430 = vrot.lane.b32.xlu1 %v4416_v43, %s4228_s11 }
 0x19c   :  { %v4456_v59 = vmul.f32 %v351_v56, %v239_v17 }
 0x19e   :  { %432 = vrot.lane.b32.xlu0 %v4422_v1, %s4228_s11 }
 0x19f   :  { %416 = vrot.lane.b32.xlu1 %v4416_v43, %s4226_s10 }
 0x1a2   :  { %418 = vrot.lane.b32.xlu0 %v4422_v1, %s4226_s10 }
 0x1a3   :  { %402 = vrot.lane.b32.xlu1 %v4416_v43, %s4225_s9 }
 0x1a6   :  { %404 = vrot.lane.b32.xlu0 %v4422_v1, %s4225_s9 }
 0x1a7   :  { %388 = vrot.lane.b32.xlu1 %v4416_v43, %s4224_s8 }
 0x1aa   :  { %390 = vrot.lane.b32.xlu0 %v4422_v1, %s4224_s8 }
 0x1ab   :  { %374 = vrot.lane.b32.xlu1 %v4416_v43, %s4222_s7 }
 0x1ae   :  { %376 = vrot.lane.b32.xlu0 %v4422_v1, %s4222_s7 }
 0x1af   :  { %448 = vrot.lane.b32.xlu1 %v4449_v57, %s4231_s13 }
 0x1b2   :  { %450 = vrot.lane.b32.xlu0 %v4456_v59, %s4231_s13 }
 0x1b3   :  { %434 = vrot.lane.b32.xlu1 %v4449_v57, %s4228_s11 }
 0x1b6   :  { %436 = vrot.lane.b32.xlu0 %v4456_v59, %s4228_s11 }
 0x1b7   :  { %420 = vrot.lane.b32.xlu1 %v4449_v57, %s4226_s10 }
 0x1ba   :  { %422 = vrot.lane.b32.xlu0 %v4456_v59, %s4226_s10 }
 0x1bb   :  { %406 = vrot.lane.b32.xlu1 %v4449_v57, %s4225_s9 }
 0x1be   :  { %408 = vrot.lane.b32.xlu0 %v4456_v59, %s4225_s9 }
 0x1bf   :  { %392 = vrot.lane.b32.xlu1 %v4449_v57, %s4224_s8 }
 0x1c2   :  { %394 = vrot.lane.b32.xlu0 %v4456_v59, %s4224_s8 }
 0x1c3   :  { %378 = vrot.lane.b32.xlu1 %v4449_v57, %s4222_s7 }
 0x1c6   :  { %380 = vrot.lane.b32.xlu0 %v4456_v59, %s4222_s7 }
 0x1c7   :  { %364 = vrot.lane.b32.xlu1 %v4449_v57, %s4223_s2 }
 0x1ca   :  { %366 = vrot.lane.b32.xlu0 %v4456_v59, %s4223_s2 }
 0x1cb   :  { %360 = vrot.lane.b32.xlu1 %v4416_v43, %s4223_s2 }
 0x1ce   :  { %362 = vrot.lane.b32.xlu0 %v4422_v1, %s4223_s2 }
 0x1cf   :  { %462 = vrot.lane.b32.xlu1 %v4449_v57, %s4230_s12 }
 0x1d2   :  { %464 = vrot.lane.b32.xlu0 %v4456_v59, %s4230_s12 }
 0x1d3   :  { %458 = vrot.lane.b32.xlu1 %v4416_v43, %s4230_s12 }
 0x1d6   :  { %460 = vrot.lane.b32.xlu0 %v4422_v1, %s4230_s12 }
 0x1d7   :  { %486 = vperm.xlu1 %4111, %v3984_v5  }
 0x1da   :  { %481 = vperm.xlu0 %4110, %v3983_v61  }
 0x209   :  { %v445_v63 = vpop.permute.xlu1 %444 }
 0x20c   :  { %v447_v4 = vpop.permute.xlu0 %446 }
 0x20d   :  { %v431_v6 = vpop.permute.xlu1 %430  ;;  %v452_v26 = vsel %vm103_vm13, %v445_v63, %v447_v4 }
 0x210   :  { %v433_v7 = vpop.permute.xlu0 %432 }
 0x211   :  { %v417_v11 = vpop.permute.xlu1 %416  ;;  %v438_v30 = vsel %vm95_vm11, %v431_v6, %v433_v7 }
 0x214   :  { %v419_v12 = vpop.permute.xlu0 %418 }
 0x215   :  { %v403_v13 = vpop.permute.xlu1 %402  ;;  %v424_v33 = vsel %vm87_vm7, %v417_v11, %v419_v12 }
 0x218   :  { %v405_v14 = vpop.permute.xlu0 %404 }
 0x219   :  { %v389_v16 = vpop.permute.xlu1 %388  ;;  %v410_v36 = vsel %vm79_vm6, %v403_v13, %v405_v14 }
 0x21c   :  { %v391_v18 = vpop.permute.xlu0 %390 }
 0x21d   :  { %v375_v19 = vpop.permute.xlu1 %374  ;;  %v396_v40 = vsel %vm71_vm3, %v389_v16, %v391_v18 }
 0x220   :  { %v377_v20 = vpop.permute.xlu0 %376 }
 0x221   :  { %v449_v21 = vpop.permute.xlu1 %448  ;;  %v382_v44 = vsel %vm63_vm2, %v375_v19, %v377_v20 }
 0x224   :  { %v451_v22 = vpop.permute.xlu0 %450 }
 0x225   :  { %495 = vmatprep.subr.mxu1 %v451_v22  ;;  %v435_v23 = vpop.permute.xlu1 %434  ;;  %v453_v25 = vsel %vm103_vm13, %v449_v21, %v451_v22 }
 0x226   :  { %496 = vmatpush1.msra.mxu1 %v453_v25 }
 0x227   :  { %497 = vmatprep.subr.mxu1 %v447_v4 }
 0x228   :  { %498 = vmatpush1.msra.mxu1 %v452_v26  ;;  %v437_v27 = vpop.permute.xlu0 %436 }
 0x229   :  { %499 = vmatprep.subr.mxu1 %v437_v27  ;;  %v421_v28 = vpop.permute.xlu1 %420  ;;  %v439_v29 = vsel %vm95_vm11, %v435_v23, %v437_v27 }
 0x22a   :  { %500 = vmatpush1.msra.mxu1 %v439_v29 }
 0x22b   :  { %501 = vmatprep.subr.mxu1 %v433_v7 }
 0x22c   :  { %502 = vmatpush1.msra.mxu1 %v438_v30  ;;  %v423_v31 = vpop.permute.xlu0 %422 }
 0x22d   :  { %503 = vmatprep.subr.mxu1 %v423_v31  ;;  %v407_v0 = vpop.permute.xlu1 %406  ;;  %v425_v32 = vsel %vm87_vm7, %v421_v28, %v423_v31 }
 0x22e   :  { %504 = vmatpush1.msra.mxu1 %v425_v32 }
 0x22f   :  { %505 = vmatprep.subr.mxu1 %v419_v12 }
 0x230   :  { %506 = vmatpush1.msra.mxu1 %v424_v33  ;;  %v409_v34 = vpop.permute.xlu0 %408 }
 0x231   :  { %507 = vmatprep.subr.mxu1 %v409_v34  ;;  %v393_v35 = vpop.permute.xlu1 %392  ;;  %v411_v9 = vsel %vm79_vm6, %v407_v0, %v409_v34 }
 0x232   :  { %508 = vmatpush1.msra.mxu1 %v411_v9 }
 0x233   :  { %509 = vmatprep.subr.mxu1 %v405_v14 }
 0x234   :  { %510 = vmatpush1.msra.mxu1 %v410_v36  ;;  %v395_v37 = vpop.permute.xlu0 %394 }
 0x235   :  { %511 = vmatprep.subr.mxu1 %v395_v37  ;;  %v379_v38 = vpop.permute.xlu1 %378  ;;  %v397_v39 = vsel %vm71_vm3, %v393_v35, %v395_v37 }
 0x236   :  { %512 = vmatpush1.msra.mxu1 %v397_v39 }
 0x237   :  { %513 = vmatprep.subr.mxu1 %v391_v18 }
 0x238   :  { %514 = vmatpush1.msra.mxu1 %v396_v40  ;;  %v381_v41 = vpop.permute.xlu0 %380 }
 0x239   :  { %515 = vmatprep.subr.mxu1 %v381_v41  ;;  %v365_v42 = vpop.permute.xlu1 %364  ;;  %v383_v60 = vsel %vm63_vm2, %v379_v38, %v381_v41 }
 0x23a   :  { %516 = vmatpush1.msra.mxu1 %v383_v60 }
 0x23b   :  { %517 = vmatprep.subr.mxu1 %v377_v20 }
 0x23c   :  { %518 = vmatpush1.msra.mxu1 %v382_v44  ;;  %v367_v45 = vpop.permute.xlu0 %366 }
 0x23d   :  { %519 = vmatprep.subr.mxu1 %v367_v45  ;;  %v361_v46 = vpop.permute.xlu1 %360  ;;  %v369_v54 = vsel %vm55_vm0, %v365_v42, %v367_v45 }
 0x23e   :  { %520 = vmatpush1.msra.mxu1 %v369_v54 }
 0x240   :  { %v363_v47 = vpop.permute.xlu0 %362 }
 0x241   :  { %521 = vmatprep.subr.mxu1 %v363_v47  ;;  %v368_v58 = vsel %vm55_vm0, %v361_v46, %v363_v47  ;;  %v463_v48 = vpop.permute.xlu1 %462 }
 0x242   :  { %522 = vmatpush1.msra.mxu1 %v368_v58 }
 0x243   :  { %523 = vmatprep.subr.mxu1 %v4456_v59 }
 0x244   :  { %524 = vmatpush1.msra.mxu1 %v4449_v57  ;;  %v465_v49 = vpop.permute.xlu0 %464 }
 0x245   :  { %525 = vmatprep.subr.mxu1 %v4422_v1  ;;  %v467_v50 = vsel %vm111_vm8, %v463_v48, %v465_v49  ;;  %v459_v51 = vpop.permute.xlu1 %458  ;;  %v474_v1 = vld [vmem:[#allocation3 + $0x10] sm:$0xff] }
 0x246   :  { %526 = vmatpush1.msra.mxu1 %v4416_v43 }
 0x247   :  { %555 = vmatprep.subr.mxu1 %v465_v49 }
 0x248   :  { %556 = vmatpush2.msra.mxu1 %v467_v50  ;;  %v461_v15 = vpop.permute.xlu0 %460 }
 0x249   :  { %557 = vmatprep.subr.mxu1 %v461_v15  ;;  %v466_v24 = vsel %vm111_vm8, %v459_v51, %v461_v15 }
 0x24a   :  { %558 = vmatpush2.msra.mxu1 %v466_v24 }
 0x24b   :  { %560 = vmatmul.mubr.f32.vlgmr.msra.gmra.mxu1 %v472_v52  ;;  %1141 = vmatprep.subr.mxu1 %v4227_v8 }
 0x24c   :  { %3986 = vmatprep.mubr.msk.f32.mxu1 %vm152_vm15, %v475_v53 }
 0x24f   :  { %566 = vmatmul.mubr.f32.gmra.mxu1 %v474_v1 }
 0x252   :  { %v487_v59 = vpop.permute.xlu1 %486 }
 0x255   :  { %v482_v43 = vpop.permute.xlu0 %481 }
 0x30b   :  { %v561_v55 = vpop.f32.mrf.mxu1 }
 0x30c   :  { %v4525_v10 = vadd.f32 %v561_v55, %v482_v43 }
 0x30d   :  { %v563_v56 = vpop.f32.mrf.mxu1 }
 0x30e   :  { %v576_v57 = vmul.f32 0.70710677, %v4525_v10  ;;  %v4528_v17 = vadd.f32 %v563_v56, %v482_v43 }
 0x30f   :  { %v567_v62 = vpop.f32.mrf.mxu1 }
 0x310   :  { %v4530_v5 = vclamps-f32 %v576_v57, 4.0  ;;  %v577_v61 = vmul.f32 0.70710677, %v4528_v17  ;;  %v4533_v63 = vadd.f32 %v567_v62, %v487_v59 }
 0x311   :  { %v569_v4 = vpop.f32.mrf.mxu1 }
 0x312   :  { %v4537_v6 = vmul.f32 %v4530_v5, %v4530_v5  ;;  %v4539_v7 = vclamps-f32 %v577_v61, 4.0  ;;  %v578_v11 = vmul.f32 0.70710677, %v4533_v63  ;;  %v4542_v12 = vadd.f32 %v569_v4, %v487_v59 }
 0x314   :  { %v592_v13 = vmul.f32 -2.7261424e-10, %v4537_v6  ;;  %v644_v14 = vmul.f32 -1.45660715e-05, %v4537_v6  ;;  %v4548_v16 = vmul.f32 %v4539_v7, %v4539_v7  ;;  %v4550_v18 = vclamps-f32 %v578_v11, 4.0 }
 0x315   :  { %v579_v19 = vmul.f32 0.70710677, %v4542_v12 }
 0x316   :  { %v596_v20 = vadd.f32 2.7706815e-08, %v592_v13  ;;  %v648_v21 = vadd.f32 -0.00021337405, %v644_v14  ;;  %v593_v22 = vmul.f32 -2.7261424e-10, %v4548_v16  ;;  %v4556_v23 = vmul.f32 %v4550_v18, %v4550_v18 }
 0x317   :  { %v645_v25 = vmul.f32 -1.45660715e-05, %v4548_v16  ;;  %v4559_v26 = vclamps-f32 %v579_v19, 4.0 }
 0x318   :  { %v600_v27 = vmul.f32 %v596_v20, %v4537_v6  ;;  %v652_v28 = vmul.f32 %v648_v21, %v4537_v6  ;;  %v597_v29 = vadd.f32 2.7706815e-08, %v593_v22  ;;  %v594_v30 = vmul.f32 -2.7261424e-10, %v4556_v23 }
 0x319   :  { %v649_v31 = vadd.f32 -0.00021337405, %v645_v25  ;;  %v646_v0 = vmul.f32 -1.45660715e-05, %v4556_v23  ;;  %v4567_v32 = vmul.f32 %v4559_v26, %v4559_v26 }
 0x31a   :  { %v604_v33 = vadd.f32 -2.101024e-06, %v600_v27  ;;  %v656_v34 = vadd.f32 -0.001682827, %v652_v28  ;;  %v601_v35 = vmul.f32 %v597_v29, %v4548_v16  ;;  %v598_v9 = vadd.f32 2.7706815e-08, %v594_v30 }
 0x31b   :  { %v653_v36 = vmul.f32 %v649_v31, %v4548_v16  ;;  %v650_v37 = vadd.f32 -0.00021337405, %v646_v0  ;;  %v595_v38 = vmul.f32 -2.7261424e-10, %v4567_v32  ;;  %v647_v39 = vmul.f32 -1.45660715e-05, %v4567_v32 }
 0x31c   :  { %v608_v40 = vmul.f32 %v604_v33, %v4537_v6  ;;  %v660_v41 = vmul.f32 %v656_v34, %v4537_v6  ;;  %v605_v42 = vadd.f32 -2.101024e-06, %v601_v35  ;;  %v602_v60 = vmul.f32 %v598_v9, %v4556_v23 }
 0x31d   :  { %v657_v44 = vadd.f32 -0.001682827, %v653_v36  ;;  %v599_v45 = vadd.f32 2.7706815e-08, %v595_v38  ;;  %v651_v46 = vadd.f32 -0.00021337405, %v647_v39  ;;  %v654_v48 = vmul.f32 %v650_v37, %v4556_v23 }
 0x31e   :  { %v612_v54 = vadd.f32 -5.6925062e-05, %v608_v40  ;;  %v664_v47 = vadd.f32 -0.0073733293, %v660_v41  ;;  %v609_v58 = vmul.f32 %v605_v42, %v4548_v16  ;;  %v606_v24 = vadd.f32 -2.101024e-06, %v602_v60 }
 0x31f   :  { %v661_v49 = vmul.f32 %v657_v44, %v4548_v16  ;;  %v603_v50 = vmul.f32 %v599_v45, %v4567_v32  ;;  %v655_v1 = vmul.f32 %v651_v46, %v4567_v32  ;;  %v658_v57 = vadd.f32 -0.001682827, %v654_v48 }
 0x320   :  { %v616_v51 = vmul.f32 %v612_v54, %v4537_v6  ;;  %v668_v15 = vmul.f32 %v664_v47, %v4537_v6  ;;  %v613_v52 = vadd.f32 -5.6925062e-05, %v609_v58  ;;  %v610_v11 = vmul.f32 %v606_v24, %v4556_v23 }
 0x321   :  { %v665_v53 = vadd.f32 -0.0073733293, %v661_v49  ;;  %v607_v62 = vadd.f32 -2.101024e-06, %v603_v50  ;;  %v659_v14 = vadd.f32 -0.001682827, %v655_v1  ;;  %v662_v21 = vmul.f32 %v658_v57, %v4556_v23 }
 0x322   :  { %v620_v43 = vadd.f32 -0.00073499064, %v616_v51  ;;  %v672_v55 = vadd.f32 -0.014264739, %v668_v15  ;;  %v617_v56 = vmul.f32 %v613_v52, %v4548_v16  ;;  %v614_v28 = vadd.f32 -5.6925062e-05, %v610_v11 }
 0x323   :  { %v669_v59 = vmul.f32 %v665_v53, %v4548_v16  ;;  %v611_v22 = vmul.f32 %v607_v62, %v4567_v32  ;;  %v663_v29 = vmul.f32 %v659_v14, %v4567_v32  ;;  %v666_v30 = vadd.f32 -0.0073733293, %v662_v21 }
 0x324   :  { %v624_v61 = vmul.f32 %v620_v43, %v4537_v6  ;;  %4120 = vrcp.f32 %v672_v55  ;;  %v621_v4 = vadd.f32 -0.00073499064, %v617_v56  ;;  %v618_v34 = vmul.f32 %v614_v28, %v4556_v23 }
 0x325   :  { %v673_v13 = vadd.f32 -0.014264739, %v669_v59  ;;  %v615_v0 = vadd.f32 -5.6925062e-05, %v611_v22  ;;  %v667_v35 = vadd.f32 -0.0073733293, %v663_v29  ;;  %v670_v9 = vmul.f32 %v666_v30, %v4556_v23 }
 0x326   :  { %v628_v19 = vadd.f32 -0.0029546, %v624_v61  ;;  %v625_v20 = vmul.f32 %v621_v4, %v4548_v16  ;;  %v572_v45 = vmul.f32 0.5, %v4525_v10  ;;  %v3991_v61 = vld [vmem:[%s5979_s3 + $0x20] sm:$0xff] }
 0x327   :  { %4122 = vrcp.f32 %v673_v13  ;;  %v619_v37 = vmul.f32 %v615_v0, %v4567_v32  ;;  %v671_v40 = vmul.f32 %v667_v35, %v4567_v32  ;;  %v674_v42 = vadd.f32 -0.014264739, %v670_v9 }
 0x328   :  { %v632_v25 = vmul.f32 %v628_v19, %v4537_v6  ;;  %v629_v27 = vadd.f32 -0.0029546, %v625_v20  ;;  %v622_v6 = vadd.f32 -0.00073499064, %v618_v34 }
 0x329   :  { %v623_v60 = vadd.f32 -0.00073499064, %v619_v37  ;;  %v675_v58 = vadd.f32 -0.014264739, %v671_v40  ;;  %4124 = vrcp.f32 %v674_v42 }
 0x32a   :  { %v633_v31 = vmul.f32 %v629_v27, %v4548_v16  ;;  %v636_v33 = vadd.f32 -0.016096033, %v632_v25  ;;  %v626_v54 = vmul.f32 %v622_v6, %v4556_v23 }
 0x32b   :  { %v627_v50 = vmul.f32 %v623_v60, %v4567_v32  ;;  %4126 = vrcp.f32 %v675_v58 }
 0x32c   :  { %v637_v36 = vadd.f32 -0.016096033, %v633_v31  ;;  %v640_v38 = vmul.f32 %v4530_v5, %v636_v33  ;;  %v573_v5 = vmul.f32 0.5, %v4528_v17  ;;  %v630_v51 = vadd.f32 -0.0029546, %v626_v54 }
 0x32d   :  { %v631_v10 = vadd.f32 -0.0029546, %v627_v50 }
 0x32e   :  { %v641_v16 = vmul.f32 %v4539_v7, %v637_v36  ;;  %v634_v15 = vmul.f32 %v630_v51, %v4556_v23 }
 0x32f   :  { %v635_v17 = vmul.f32 %v631_v10, %v4567_v32 }
 0x330   :  { %v638_v52 = vadd.f32 -0.016096033, %v634_v15 }
 0x331   :  { %v4121_v39 = vpop.eup %4120  ;;  %v639_v53 = vadd.f32 -0.016096033, %v635_v17 }
 0x332   :  { %v677_v41 = vmul.f32 %v4121_v39, %v640_v38  ;;  %v642_v1 = vmul.f32 %v4550_v18, %v638_v52  ;;  %v574_v18 = vmul.f32 0.5, %v4533_v63  ;;  %v810_v63 = vld [vmem:[#allocation3 + $0x28] sm:$0xff] }
 0x333   :  { %v643_v32 = vmul.f32 %v4559_v26, %v639_v53  ;;  %v575_v26 = vmul.f32 0.5, %v4542_v12  ;;  %3993 = vmatprep.mubr.msk.f32.mxu0 %vm152_vm15, %v810_v63  ;;  %v3992_v12 = vld [vmem:[%s5979_s3 + $0x28] sm:$0xff] }
 0x334   :  { %v4123_v44 = vpop.eup %4122  ;;  %v684_v46 = vadd.f32 1.0, %v677_v41 }
 0x335   :  { %v679_v47 = vmul.f32 %v4123_v44, %v641_v16 }
 0x336   :  { %v4601_v48 = vmul.f32 %v684_v46, %v572_v45  ;;  %v4125_v24 = vpop.eup %4124 }
 0x337   :  { %v685_v49 = vadd.f32 1.0, %v679_v47  ;;  %v681_v43 = vmul.f32 %v4125_v24, %v642_v1 }
 0x338   :  { %780 = vrot.lane.b32.xlu1 %v4601_v48, %s4231_s13  ;;  %v4127_v23 = vpop.eup %4126 }
 0x339   :  { %v4607_v7 = vmul.f32 %v685_v49, %v573_v5  ;;  %v683_v55 = vmul.f32 %v4127_v23, %v643_v32  ;;  %v686_v56 = vadd.f32 1.0, %v681_v43  ;;  %v809_v43 = vld [vmem:[#allocation3 + $0x20] sm:$0xff] }
 0x33b   :  { %782 = vrot.lane.b32.xlu0 %v4607_v7, %s4231_s13  ;;  %v687_v57 = vadd.f32 1.0, %v683_v55  ;;  %v4634_v59 = vmul.f32 %v686_v56, %v574_v18  ;;  %v812_v55 = vld [vmem:[#allocation3 + $0x38] sm:$0xff] }
 0x33c   :  { %766 = vrot.lane.b32.xlu1 %v4601_v48, %s4228_s11 }
 0x33d   :  { %v4641_v62 = vmul.f32 %v687_v57, %v575_v26 }
 0x33f   :  { %768 = vrot.lane.b32.xlu0 %v4607_v7, %s4228_s11 }
 0x340   :  { %752 = vrot.lane.b32.xlu1 %v4601_v48, %s4226_s10 }
 0x343   :  { %754 = vrot.lane.b32.xlu0 %v4607_v7, %s4226_s10 }
 0x344   :  { %738 = vrot.lane.b32.xlu1 %v4601_v48, %s4225_s9 }
 0x347   :  { %740 = vrot.lane.b32.xlu0 %v4607_v7, %s4225_s9 }
 0x348   :  { %724 = vrot.lane.b32.xlu1 %v4601_v48, %s4224_s8 }
 0x34b   :  { %726 = vrot.lane.b32.xlu0 %v4607_v7, %s4224_s8 }
 0x34c   :  { %710 = vrot.lane.b32.xlu1 %v4601_v48, %s4222_s7 }
 0x34f   :  { %712 = vrot.lane.b32.xlu0 %v4607_v7, %s4222_s7 }
 0x350   :  { %784 = vrot.lane.b32.xlu1 %v4634_v59, %s4231_s13 }
 0x353   :  { %786 = vrot.lane.b32.xlu0 %v4641_v62, %s4231_s13 }
 0x354   :  { %770 = vrot.lane.b32.xlu1 %v4634_v59, %s4228_s11 }
 0x357   :  { %772 = vrot.lane.b32.xlu0 %v4641_v62, %s4228_s11 }
 0x358   :  { %756 = vrot.lane.b32.xlu1 %v4634_v59, %s4226_s10 }
 0x35b   :  { %758 = vrot.lane.b32.xlu0 %v4641_v62, %s4226_s10 }
 0x35c   :  { %742 = vrot.lane.b32.xlu1 %v4634_v59, %s4225_s9 }
 0x35f   :  { %744 = vrot.lane.b32.xlu0 %v4641_v62, %s4225_s9 }
 0x360   :  { %728 = vrot.lane.b32.xlu1 %v4634_v59, %s4224_s8 }
 0x363   :  { %730 = vrot.lane.b32.xlu0 %v4641_v62, %s4224_s8 }
 0x364   :  { %714 = vrot.lane.b32.xlu1 %v4634_v59, %s4222_s7 }
 0x367   :  { %716 = vrot.lane.b32.xlu0 %v4641_v62, %s4222_s7 }
 0x368   :  { %700 = vrot.lane.b32.xlu1 %v4634_v59, %s4223_s2 }
 0x36b   :  { %702 = vrot.lane.b32.xlu0 %v4641_v62, %s4223_s2 }
 0x36c   :  { %696 = vrot.lane.b32.xlu1 %v4601_v48, %s4223_s2 }
 0x36f   :  { %698 = vrot.lane.b32.xlu0 %v4607_v7, %s4223_s2 }
 0x370   :  { %798 = vrot.lane.b32.xlu1 %v4634_v59, %s4230_s12 }
 0x373   :  { %800 = vrot.lane.b32.xlu0 %v4641_v62, %s4230_s12 }
 0x374   :  { %794 = vrot.lane.b32.xlu1 %v4601_v48, %s4230_s12 }
 0x377   :  { %796 = vrot.lane.b32.xlu0 %v4607_v7, %s4230_s12 }
 0x378   :  { %823 = vperm.xlu1 %4111, %v3992_v12  }
 0x37b   :  { %818 = vperm.xlu0 %4110, %v3991_v61  }
 0x3aa   :  { %v781_v4 = vpop.permute.xlu1 %780 }
 0x3ad   :  { %v783_v11 = vpop.permute.xlu0 %782 }
 0x3ae   :  { %v767_v13 = vpop.permute.xlu1 %766  ;;  %v788_v34 = vsel %vm103_vm13, %v781_v4, %v783_v11 }
 0x3b1   :  { %v769_v14 = vpop.permute.xlu0 %768 }
 0x3b2   :  { %v753_v19 = vpop.permute.xlu1 %752  ;;  %v774_v37 = vsel %vm95_vm11, %v767_v13, %v769_v14 }
 0x3b5   :  { %v755_v20 = vpop.permute.xlu0 %754 }
 0x3b6   :  { %v739_v21 = vpop.permute.xlu1 %738  ;;  %v760_v40 = vsel %vm87_vm7, %v753_v19, %v755_v20 }
 0x3b9   :  { %v741_v22 = vpop.permute.xlu0 %740 }
 0x3ba   :  { %v725_v25 = vpop.permute.xlu1 %724  ;;  %v746_v60 = vsel %vm79_vm6, %v739_v21, %v741_v22 }
 0x3bd   :  { %v727_v27 = vpop.permute.xlu0 %726 }
 0x3be   :  { %v711_v28 = vpop.permute.xlu1 %710  ;;  %v732_v54 = vsel %vm71_vm3, %v725_v25, %v727_v27 }
 0x3c1   :  { %v713_v29 = vpop.permute.xlu0 %712 }
 0x3c2   :  { %v785_v30 = vpop.permute.xlu1 %784  ;;  %v718_v49 = vsel %vm63_vm2, %v711_v28, %v713_v29 }
 0x3c5   :  { %v787_v31 = vpop.permute.xlu0 %786 }
 0x3c6   :  { %832 = vmatprep.subr.mxu0 %v787_v31  ;;  %v789_v0 = vsel %vm103_vm13, %v785_v30, %v787_v31  ;;  %v771_v33 = vpop.permute.xlu1 %770 }
 0x3c7   :  { %833 = vmatpush1.msra.mxu0 %v789_v0 }
 0x3c8   :  { %834 = vmatprep.subr.mxu0 %v783_v11 }
 0x3c9   :  { %v773_v35 = vpop.permute.xlu0 %772  ;;  %835 = vmatpush1.msra.mxu0 %v788_v34 }
 0x3ca   :  { %836 = vmatprep.subr.mxu0 %v773_v35  ;;  %v775_v9 = vsel %vm95_vm11, %v771_v33, %v773_v35  ;;  %v757_v36 = vpop.permute.xlu1 %756 }
 0x3cb   :  { %837 = vmatpush1.msra.mxu0 %v775_v9 }
 0x3cc   :  { %838 = vmatprep.subr.mxu0 %v769_v14 }
 0x3cd   :  { %v759_v38 = vpop.permute.xlu0 %758  ;;  %839 = vmatpush1.msra.mxu0 %v774_v37 }
 0x3ce   :  { %840 = vmatprep.subr.mxu0 %v759_v38  ;;  %v761_v6 = vsel %vm87_vm7, %v757_v36, %v759_v38  ;;  %v743_v39 = vpop.permute.xlu1 %742 }
 0x3cf   :  { %841 = vmatpush1.msra.mxu0 %v761_v6 }
 0x3d0   :  { %842 = vmatprep.subr.mxu0 %v755_v20 }
 0x3d1   :  { %v745_v41 = vpop.permute.xlu0 %744  ;;  %843 = vmatpush1.msra.mxu0 %v760_v40 }
 0x3d2   :  { %844 = vmatprep.subr.mxu0 %v745_v41  ;;  %v747_v42 = vsel %vm79_vm6, %v743_v39, %v745_v41  ;;  %v729_v16 = vpop.permute.xlu1 %728 }
 0x3d3   :  { %845 = vmatpush1.msra.mxu0 %v747_v42 }
 0x3d4   :  { %846 = vmatprep.subr.mxu0 %v741_v22 }
 0x3d5   :  { %v731_v44 = vpop.permute.xlu0 %730  ;;  %847 = vmatpush1.msra.mxu0 %v746_v60 }
 0x3d6   :  { %848 = vmatprep.subr.mxu0 %v731_v44  ;;  %v733_v45 = vsel %vm71_vm3, %v729_v16, %v731_v44  ;;  %v715_v46 = vpop.permute.xlu1 %714 }
 0x3d7   :  { %849 = vmatpush1.msra.mxu0 %v733_v45 }
 0x3d8   :  { %850 = vmatprep.subr.mxu0 %v727_v27 }
 0x3d9   :  { %v717_v47 = vpop.permute.xlu0 %716  ;;  %851 = vmatpush1.msra.mxu0 %v732_v54 }
 0x3da   :  { %852 = vmatprep.subr.mxu0 %v717_v47  ;;  %v719_v58 = vsel %vm63_vm2, %v715_v46, %v717_v47  ;;  %v701_v5 = vpop.permute.xlu1 %700 }
 0x3db   :  { %853 = vmatpush1.msra.mxu0 %v719_v58 }
 0x3dc   :  { %854 = vmatprep.subr.mxu0 %v713_v29 }
 0x3dd   :  { %v703_v50 = vpop.permute.xlu0 %702  ;;  %855 = vmatpush1.msra.mxu0 %v718_v49 }
 0x3de   :  { %856 = vmatprep.subr.mxu0 %v703_v50  ;;  %v705_v51 = vsel %vm55_vm0, %v701_v5, %v703_v50  ;;  %v697_v10 = vpop.permute.xlu1 %696 }
 0x3df   :  { %857 = vmatpush1.msra.mxu0 %v705_v51 }
 0x3e1   :  { %v699_v15 = vpop.permute.xlu0 %698 }
 0x3e2   :  { %858 = vmatprep.subr.mxu0 %v699_v15  ;;  %v704_v17 = vsel %vm55_vm0, %v697_v10, %v699_v15  ;;  %v799_v52 = vpop.permute.xlu1 %798 }
 0x3e3   :  { %859 = vmatpush1.msra.mxu0 %v704_v17 }
 0x3e4   :  { %860 = vmatprep.subr.mxu0 %v4641_v62 }
 0x3e5   :  { %v801_v24 = vpop.permute.xlu0 %800  ;;  %861 = vmatpush1.msra.mxu0 %v4634_v59 }
 0x3e6   :  { %862 = vmatprep.subr.mxu0 %v4607_v7  ;;  %v803_v53 = vsel %vm111_vm8, %v799_v52, %v801_v24  ;;  %v795_v1 = vpop.permute.xlu1 %794  ;;  %v811_v7 = vld [vmem:[#allocation3 + $0x30] sm:$0xff] }
 0x3e7   :  { %863 = vmatpush1.msra.mxu0 %v4601_v48 }
 0x3e8   :  { %892 = vmatprep.subr.mxu0 %v801_v24 }
 0x3e9   :  { %v797_v23 = vpop.permute.xlu0 %796  ;;  %893 = vmatpush2.msra.mxu0 %v803_v53 }
 0x3ea   :  { %894 = vmatprep.subr.mxu0 %v797_v23  ;;  %v802_v32 = vsel %vm111_vm8, %v795_v1, %v797_v23 }
 0x3eb   :  { %895 = vmatpush2.msra.mxu0 %v802_v32 }
 0x3ec   :  { %897 = vmatmul.mubr.f32.vlgmr.msra.gmra.mxu0 %v809_v43  ;;  %1350 = vmatprep.subr.mxu0 %v4227_v8 }
 0x3ed   :  { %3994 = vmatprep.mubr.msk.f32.mxu0 %vm152_vm15, %v812_v55 }
 0x3f0   :  { %903 = vmatmul.mubr.f32.gmra.mxu0 %v811_v7 }
 0x3f3   :  { %v824_v62 = vpop.permute.xlu1 %823 }
 0x3f6   :  { %v819_v48 = vpop.permute.xlu0 %818 }
 0x4ac   :  { %v898_v56 = vpop.f32.mrf.mxu0 }
 0x4ad   :  { %v4710_v18 = vadd.f32 %v898_v56, %v819_v48 }
 0x4ae   :  { %v900_v57 = vpop.f32.mrf.mxu0 }
 0x4af   :  { %v913_v59 = vmul.f32 0.70710677, %v4710_v18  ;;  %v4713_v26 = vadd.f32 %v900_v57, %v819_v48 }
 0x4b0   :  { %v904_v63 = vpop.f32.mrf.mxu0 }
 0x4b1   :  { %v4715_v12 = vclamps-f32 %v913_v59, 4.0  ;;  %v914_v61 = vmul.f32 0.70710677, %v4713_v26  ;;  %v4718_v4 = vadd.f32 %v904_v63, %v824_v62 }
 0x4b2   :  { %v906_v11 = vpop.f32.mrf.mxu0 }
 0x4b3   :  { %v4722_v13 = vmul.f32 %v4715_v12, %v4715_v12  ;;  %v4724_v14 = vclamps-f32 %v914_v61, 4.0  ;;  %v915_v19 = vmul.f32 0.70710677, %v4718_v4  ;;  %v4727_v20 = vadd.f32 %v906_v11, %v824_v62 }
 0x4b5   :  { %v929_v21 = vmul.f32 -2.7261424e-10, %v4722_v13  ;;  %v981_v22 = vmul.f32 -1.45660715e-05, %v4722_v13  ;;  %v4733_v25 = vmul.f32 %v4724_v14, %v4724_v14  ;;  %v4735_v27 = vclamps-f32 %v915_v19, 4.0 }
 0x4b6   :  { %v916_v28 = vmul.f32 0.70710677, %v4727_v20 }
 0x4b7   :  { %v933_v29 = vadd.f32 2.7706815e-08, %v929_v21  ;;  %v985_v30 = vadd.f32 -0.00021337405, %v981_v22  ;;  %v930_v31 = vmul.f32 -2.7261424e-10, %v4733_v25  ;;  %v4741_v0 = vmul.f32 %v4735_v27, %v4735_v27 }
 0x4b8   :  { %v982_v33 = vmul.f32 -1.45660715e-05, %v4733_v25  ;;  %v4744_v34 = vclamps-f32 %v916_v28, 4.0 }
 0x4b9   :  { %v937_v35 = vmul.f32 %v933_v29, %v4722_v13  ;;  %v989_v9 = vmul.f32 %v985_v30, %v4722_v13  ;;  %v934_v36 = vadd.f32 2.7706815e-08, %v930_v31  ;;  %v931_v37 = vmul.f32 -2.7261424e-10, %v4741_v0 }
 0x4ba   :  { %v986_v38 = vadd.f32 -0.00021337405, %v982_v33  ;;  %v983_v6 = vmul.f32 -1.45660715e-05, %v4741_v0  ;;  %v4752_v39 = vmul.f32 %v4744_v34, %v4744_v34 }
 0x4bb   :  { %v941_v40 = vadd.f32 -2.101024e-06, %v937_v35  ;;  %v993_v41 = vadd.f32 -0.001682827, %v989_v9  ;;  %v938_v42 = vmul.f32 %v934_v36, %v4733_v25  ;;  %v935_v16 = vadd.f32 2.7706815e-08, %v931_v37 }
 0x4bc   :  { %v990_v60 = vmul.f32 %v986_v38, %v4733_v25  ;;  %v987_v44 = vadd.f32 -0.00021337405, %v983_v6  ;;  %v932_v45 = vmul.f32 -2.7261424e-10, %v4752_v39  ;;  %v984_v46 = vmul.f32 -1.45660715e-05, %v4752_v39 }
 0x4bd   :  { %v945_v54 = vmul.f32 %v941_v40, %v4722_v13  ;;  %v997_v47 = vmul.f32 %v993_v41, %v4722_v13  ;;  %v942_v58 = vadd.f32 -2.101024e-06, %v938_v42  ;;  %v939_v5 = vmul.f32 %v935_v16, %v4741_v0 }
 0x4be   :  { %v994_v49 = vadd.f32 -0.001682827, %v990_v60  ;;  %v991_v50 = vmul.f32 %v987_v44, %v4741_v0  ;;  %v936_v51 = vadd.f32 2.7706815e-08, %v932_v45  ;;  %v988_v10 = vadd.f32 -0.00021337405, %v984_v46 }
 0x4bf   :  { %v949_v15 = vadd.f32 -5.6925062e-05, %v945_v54  ;;  %v1001_v17 = vadd.f32 -0.0073733293, %v997_v47  ;;  %v946_v52 = vmul.f32 %v942_v58, %v4733_v25  ;;  %v943_v24 = vadd.f32 -2.101024e-06, %v939_v5 }
 0x4c0   :  { %v998_v53 = vmul.f32 %v994_v49, %v4733_v25  ;;  %v995_v1 = vadd.f32 -0.001682827, %v991_v50  ;;  %v940_v23 = vmul.f32 %v936_v51, %v4752_v39  ;;  %v992_v43 = vmul.f32 %v988_v10, %v4752_v39 }
 0x4c1   :  { %v953_v32 = vmul.f32 %v949_v15, %v4722_v13  ;;  %v1005_v55 = vmul.f32 %v1001_v17, %v4722_v13  ;;  %v950_v7 = vadd.f32 -5.6925062e-05, %v946_v52  ;;  %v947_v48 = vmul.f32 %v943_v24, %v4741_v0 }
 0x4c2   :  { %v1002_v56 = vadd.f32 -0.0073733293, %v998_v53  ;;  %v999_v57 = vmul.f32 %v995_v1, %v4741_v0  ;;  %v944_v59 = vadd.f32 -2.101024e-06, %v940_v23  ;;  %v996_v62 = vadd.f32 -0.001682827, %v992_v43 }
 0x4c3   :  { %v957_v63 = vadd.f32 -0.00073499064, %v953_v32  ;;  %v1009_v61 = vadd.f32 -0.014264739, %v1005_v55  ;;  %v954_v11 = vmul.f32 %v950_v7, %v4733_v25  ;;  %v951_v19 = vadd.f32 -5.6925062e-05, %v947_v48 }
 0x4c4   :  { %v1006_v21 = vmul.f32 %v1002_v56, %v4733_v25  ;;  %v1003_v22 = vadd.f32 -0.0073733293, %v999_v57  ;;  %v948_v28 = vmul.f32 %v944_v59, %v4752_v39  ;;  %v1000_v29 = vmul.f32 %v996_v62, %v4752_v39 }
 0x4c5   :  { %v961_v30 = vmul.f32 %v957_v63, %v4722_v13  ;;  %4128 = vrcp.f32 %v1009_v61  ;;  %v958_v31 = vadd.f32 -0.00073499064, %v954_v11  ;;  %v955_v33 = vmul.f32 %v951_v19, %v4741_v0  ;;  %v3999_v61 = vld [vmem:[%s5979_s3 + $0x30] sm:$0xff] }
 0x4c6   :  { %v1010_v35 = vadd.f32 -0.014264739, %v1006_v21  ;;  %v952_v9 = vadd.f32 -5.6925062e-05, %v948_v28  ;;  %v1004_v36 = vadd.f32 -0.0073733293, %v1000_v29  ;;  %v1007_v6 = vmul.f32 %v1003_v22, %v4741_v0 }
 0x4c7   :  { %v965_v37 = vadd.f32 -0.0029546, %v961_v30  ;;  %v962_v38 = vmul.f32 %v958_v31, %v4733_v25  ;;  %v959_v16 = vadd.f32 -0.00073499064, %v955_v33  ;;  %v910_v43 = vmul.f32 0.5, %v4713_v26 }
 0x4c8   :  { %4130 = vrcp.f32 %v1010_v35  ;;  %v956_v40 = vmul.f32 %v952_v9, %v4752_v39  ;;  %v1008_v60 = vmul.f32 %v1004_v36, %v4752_v39  ;;  %v1011_v44 = vadd.f32 -0.014264739, %v1007_v6 }
 0x4c9   :  { %v969_v41 = vmul.f32 %v965_v37, %v4722_v13  ;;  %v966_v42 = vadd.f32 -0.0029546, %v962_v38  ;;  %v963_v47 = vmul.f32 %v959_v16, %v4741_v0  ;;  %v911_v59 = vmul.f32 0.5, %v4718_v4  ;;  %v1119_v4 = vld [vmem:[#allocation3 + $0x48] sm:$0xff] }
 0x4ca   :  { %v960_v46 = vadd.f32 -0.00073499064, %v956_v40  ;;  %v1012_v58 = vadd.f32 -0.014264739, %v1008_v60  ;;  %4132 = vrcp.f32 %v1011_v44  ;;  %v912_v63 = vmul.f32 0.5, %v4727_v20  ;;  %4001 = vmatprep.mubr.msk.f32.mxu1 %vm152_vm15, %v1119_v4  ;;  %v4000_v20 = vld [vmem:[%s5979_s3 + $0x38] sm:$0xff] }
 0x4cb   :  { %v970_v45 = vmul.f32 %v966_v42, %v4733_v25  ;;  %v973_v54 = vadd.f32 -0.016096033, %v969_v41  ;;  %v967_v51 = vadd.f32 -0.0029546, %v963_v47  ;;  %v909_v25 = vmul.f32 0.5, %v4710_v18 }
 0x4cc   :  { %v964_v49 = vmul.f32 %v960_v46, %v4752_v39  ;;  %4134 = vrcp.f32 %v1012_v58 }
 0x4cd   :  { %v974_v5 = vadd.f32 -0.016096033, %v970_v45  ;;  %v977_v50 = vmul.f32 %v4715_v12, %v973_v54  ;;  %v971_v53 = vmul.f32 %v967_v51, %v4741_v0 }
 0x4ce   :  { %v968_v17 = vadd.f32 -0.0029546, %v964_v49 }
 0x4cf   :  { %v978_v15 = vmul.f32 %v4724_v14, %v974_v5  ;;  %v975_v55 = vadd.f32 -0.016096033, %v971_v53 }
 0x4d0   :  { %v972_v12 = vmul.f32 %v968_v17, %v4752_v39 }
 0x4d1   :  { %v979_v18 = vmul.f32 %v4735_v27, %v975_v55 }
 0x4d2   :  { %v4129_v13 = vpop.eup %4128  ;;  %v976_v48 = vadd.f32 -0.016096033, %v972_v12  ;;  %v1121_v12 = vld [vmem:[#allocation3 + $0x58] sm:$0xff] }
 0x4d3   :  { %v1014_v10 = vmul.f32 %v4129_v13, %v977_v50 }
 0x4d4   :  { %v980_v26 = vmul.f32 %v4744_v34, %v976_v48 }
 0x4d5   :  { %v4131_v52 = vpop.eup %4130  ;;  %v1021_v24 = vadd.f32 1.0, %v1014_v10 }
 0x4d6   :  { %v1016_v1 = vmul.f32 %v4131_v52, %v978_v15 }
 0x4d7   :  { %v4788_v23 = vmul.f32 %v1021_v24, %v909_v25  ;;  %v4133_v7 = vpop.eup %4132 }
 0x4d8   :  { %v1022_v32 = vadd.f32 1.0, %v1016_v1  ;;  %v1018_v56 = vmul.f32 %v4133_v7, %v979_v18 }
 0x4d9   :  { %1093 = vrot.lane.b32.xlu1 %v4788_v23, %s4231_s13  ;;  %v4135_v0 = vpop.eup %4134 }
 0x4da   :  { %v1026_v14 = vmul.f32 %v1022_v32, %v910_v43  ;;  %v1020_v39 = vmul.f32 %v4135_v0, %v980_v26  ;;  %v1023_v57 = vadd.f32 1.0, %v1018_v56  ;;  %v1118_v43 = vld [vmem:[#allocation3 + $0x40] sm:$0xff] }
 0x4dc   :  { %1095 = vrot.lane.b32.xlu0 %v1026_v14, %s4231_s13  ;;  %v1024_v27 = vadd.f32 1.0, %v1020_v39  ;;  %v4806_v62 = vmul.f32 %v1023_v57, %v911_v59 }
 0x4dd   :  { %1081 = vrot.lane.b32.xlu1 %v4788_v23, %s4228_s11 }
 0x4de   :  { %v1028_v34 = vmul.f32 %v1024_v27, %v912_v63 }
 0x4e0   :  { %1083 = vrot.lane.b32.xlu0 %v1026_v14, %s4228_s11 }
 0x4e1   :  { %1069 = vrot.lane.b32.xlu1 %v4788_v23, %s4226_s10 }
 0x4e4   :  { %1071 = vrot.lane.b32.xlu0 %v1026_v14, %s4226_s10 }
 0x4e5   :  { %1057 = vrot.lane.b32.xlu1 %v4788_v23, %s4225_s9 }
 0x4e8   :  { %1059 = vrot.lane.b32.xlu0 %v1026_v14, %s4225_s9 }
 0x4e9   :  { %1097 = vrot.lane.b32.xlu1 %v4806_v62, %s4231_s13 }
 0x4ec   :  { %1099 = vrot.lane.b32.xlu0 %v1028_v34, %s4231_s13 }
 0x4ed   :  { %1085 = vrot.lane.b32.xlu1 %v4806_v62, %s4228_s11 }
 0x4f0   :  { %1087 = vrot.lane.b32.xlu0 %v1028_v34, %s4228_s11 }
 0x4f1   :  { %1073 = vrot.lane.b32.xlu1 %v4806_v62, %s4226_s10 }
 0x4f4   :  { %1075 = vrot.lane.b32.xlu0 %v1028_v34, %s4226_s10 }
 0x4f5   :  { %1061 = vrot.lane.b32.xlu1 %v4806_v62, %s4225_s9 }
 0x4f8   :  { %1063 = vrot.lane.b32.xlu0 %v1028_v34, %s4225_s9 }
 0x4f9   :  { %1049 = vrot.lane.b32.xlu1 %v4806_v62, %s4224_s8 }
 0x4fc   :  { %1051 = vrot.lane.b32.xlu0 %v1028_v34, %s4224_s8 }
 0x4fd   :  { %1045 = vrot.lane.b32.xlu1 %v4788_v23, %s4224_s8 }
 0x500   :  { %1047 = vrot.lane.b32.xlu0 %v1026_v14, %s4224_s8 }
 0x501   :  { %1039 = vrot.lane.b32.xlu1 %v4806_v62, %s4222_s7 }
 0x504   :  { %1037 = vrot.lane.b32.xlu0 %v4788_v23, %s4222_s7 }
 0x505   :  { %1033 = vrot.lane.b32.xlu1 %v4806_v62, %s4223_s2 }
 0x508   :  { %1031 = vrot.lane.b32.xlu0 %v4788_v23, %s4223_s2 }
 0x509   :  { %1109 = vrot.lane.b32.xlu1 %v4806_v62, %s4230_s12 }
 0x50c   :  { %1111 = vrot.lane.b32.xlu0 %v1028_v34, %s4230_s12 }
 0x50d   :  { %1105 = vrot.lane.b32.xlu1 %v4788_v23, %s4230_s12 }
 0x510   :  { %1107 = vrot.lane.b32.xlu0 %v1026_v14, %s4230_s12 }
 0x511   :  { %1132 = vperm.xlu1 %4111, %v4000_v20  }
 0x514   :  { %1127 = vperm.xlu0 %4110, %v3999_v61  }
 0x54b   :  { %v1094_v11 = vpop.permute.xlu1 %1093 }
 0x54e   :  { %v1096_v19 = vpop.permute.xlu0 %1095 }
 0x54f   :  { %v1082_v21 = vpop.permute.xlu1 %1081  ;;  %v1101_v37 = vsel %vm103_vm13, %v1094_v11, %v1096_v19 }
 0x552   :  { %v1084_v22 = vpop.permute.xlu0 %1083 }
 0x553   :  { %v1070_v28 = vpop.permute.xlu1 %1069  ;;  %v1089_v41 = vsel %vm95_vm11, %v1082_v21, %v1084_v22 }
 0x556   :  { %v1072_v29 = vpop.permute.xlu0 %1071 }
 0x557   :  { %v1058_v30 = vpop.permute.xlu1 %1057  ;;  %v1077_v44 = vsel %vm87_vm7, %v1070_v28, %v1072_v29 }
 0x55a   :  { %v1060_v31 = vpop.permute.xlu0 %1059 }
 0x55b   :  { %v1098_v33 = vpop.permute.xlu1 %1097  ;;  %v1065_v47 = vsel %vm79_vm6, %v1058_v30, %v1060_v31 }
 0x55e   :  { %v1100_v35 = vpop.permute.xlu0 %1099 }
 0x55f   :  { %v1102_v9 = vsel %vm103_vm13, %v1098_v33, %v1100_v35  ;;  %v1086_v36 = vpop.permute.xlu1 %1085 }
 0x560   :  { %1142 = vmatpush1.msra.mxu1 %v1102_v9 }
 0x561   :  { %1143 = vmatprep.subr.mxu1 %v4227_v8 }
 0x562   :  { %v1088_v38 = vpop.permute.xlu0 %1087  ;;  %1144 = vmatpush1.msra.mxu1 %v1101_v37 }
 0x563   :  { %v1090_v6 = vsel %vm95_vm11, %v1086_v36, %v1088_v38  ;;  %1145 = vmatprep.subr.mxu1 %v4227_v8  ;;  %v1074_v40 = vpop.permute.xlu1 %1073 }
 0x564   :  { %1146 = vmatpush1.msra.mxu1 %v1090_v6 }
 0x565   :  { %1147 = vmatprep.subr.mxu1 %v4227_v8 }
 0x566   :  { %v1076_v42 = vpop.permute.xlu0 %1075  ;;  %1148 = vmatpush1.msra.mxu1 %v1089_v41 }
 0x567   :  { %v1078_v16 = vsel %vm87_vm7, %v1074_v40, %v1076_v42  ;;  %1149 = vmatprep.subr.mxu1 %v4227_v8  ;;  %v1062_v60 = vpop.permute.xlu1 %1061 }
 0x568   :  { %1150 = vmatpush1.msra.mxu1 %v1078_v16 }
 0x569   :  { %1151 = vmatprep.subr.mxu1 %v4227_v8 }
 0x56a   :  { %v1064_v45 = vpop.permute.xlu0 %1063  ;;  %1152 = vmatpush1.msra.mxu1 %v1077_v44 }
 0x56b   :  { %v1066_v46 = vsel %vm79_vm6, %v1062_v60, %v1064_v45  ;;  %1153 = vmatprep.subr.mxu1 %v4227_v8  ;;  %v1050_v54 = vpop.permute.xlu1 %1049 }
 0x56c   :  { %1154 = vmatpush1.msra.mxu1 %v1066_v46 }
 0x56d   :  { %1155 = vmatprep.subr.mxu1 %v4227_v8 }
 0x56e   :  { %v1052_v58 = vpop.permute.xlu0 %1051  ;;  %1156 = vmatpush1.msra.mxu1 %v1065_v47 }
 0x56f   :  { %v1054_v5 = vsel %vm71_vm3, %v1050_v54, %v1052_v58  ;;  %1157 = vmatprep.subr.mxu1 %v4227_v8  ;;  %v1046_v49 = vpop.permute.xlu1 %1045 }
 0x570   :  { %1158 = vmatpush1.msra.mxu1 %v1054_v5 }
 0x571   :  { %1159 = vmatprep.subr.mxu1 %v4227_v8 }
 0x572   :  { %v1048_v50 = vpop.permute.xlu0 %1047 }
 0x573   :  { %v1053_v51 = vsel %vm71_vm3, %v1046_v49, %v1048_v50  ;;  %v1040_v13 = vpop.permute.xlu1 %1039 }
 0x574   :  { %1160 = vmatpush1.msra.mxu1 %v1053_v51 }
 0x575   :  { %1161 = vmatprep.subr.mxu1 %v4227_v8 }
 0x576   :  { %v1038_v10 = vpop.permute.xlu0 %1037  ;;  %1162 = vmatpush1.msra.mxu1 %v1040_v13 }
 0x577   :  { %1163 = vmatprep.subr.mxu1 %v4227_v8  ;;  %v1034_v15 = vpop.permute.xlu1 %1033 }
 0x578   :  { %1164 = vmatpush1.msra.mxu1 %v1038_v10 }
 0x579   :  { %1165 = vmatprep.subr.mxu1 %v4227_v8 }
 0x57a   :  { %v1032_v17 = vpop.permute.xlu0 %1031  ;;  %1166 = vmatpush1.msra.mxu1 %v1034_v15 }
 0x57b   :  { %1167 = vmatprep.subr.mxu1 %v4227_v8  ;;  %v1110_v52 = vpop.permute.xlu1 %1109 }
 0x57c   :  { %1168 = vmatpush1.msra.mxu1 %v1032_v17 }
 0x57d   :  { %1169 = vmatprep.subr.mxu1 %v4227_v8 }
 0x57e   :  { %v1112_v25 = vpop.permute.xlu0 %1111  ;;  %1170 = vmatpush1.msra.mxu1 %v4806_v62 }
 0x57f   :  { %1171 = vmatprep.subr.mxu1 %v4227_v8  ;;  %v1114_v24 = vsel %vm111_vm8, %v1110_v52, %v1112_v25  ;;  %v1106_v53 = vpop.permute.xlu1 %1105 }
 0x580   :  { %1172 = vmatpush1.msra.mxu1 %v4788_v23  ;;  %v1120_v23 = vld [vmem:[#allocation3 + $0x50] sm:$0xff] }
 0x581   :  { %1201 = vmatprep.subr.mxu1 %v4227_v8 }
 0x582   :  { %v1108_v1 = vpop.permute.xlu0 %1107  ;;  %1202 = vmatpush2.msra.mxu1 %v1114_v24 }
 0x583   :  { %v1113_v32 = vsel %vm111_vm8, %v1106_v53, %v1108_v1  ;;  %1203 = vmatprep.subr.mxu1 %v4227_v8 }
 0x584   :  { %1204 = vmatpush2.msra.mxu1 %v1113_v32 }
 0x585   :  { %1206 = vmatmul.mubr.f32.vlgmr.msra.gmra.mxu1 %v1118_v43  ;;  %1559 = vmatprep.subr.mxu1 %v4227_v8 }
 0x586   :  { %4002 = vmatprep.mubr.msk.f32.mxu1 %vm152_vm15, %v1121_v12 }
 0x589   :  { %1211 = vmatmul.mubr.f32.gmra.mxu1 %v1120_v23 }
 0x58c   :  { %v1133_v0 = vpop.permute.xlu1 %1132 }
 0x58f   :  { %v1128_v55 = vpop.permute.xlu0 %1127 }
 0x645   :  { %v1207_v14 = vpop.f32.mrf.mxu1 }
 0x646   :  { %v1208_v7 = vadd.f32 %v1207_v14, %v1128_v55 }
 0x647   :  { %v1209_v48 = vpop.f32.mrf.mxu1 }
 0x648   :  { %v1218_v18 = vmul.f32 0.70710677, %v1208_v7  ;;  %v1216_v43 = vmul.f32 0.5, %v1208_v7  ;;  %v1328_v7 = vld [vmem:[#allocation3 + $0x68] sm:$0xff] }
 0x649   :  { %v1212_v56 = vpop.f32.mrf.mxu1  ;;  %4007 = vmatprep.mubr.msk.f32.mxu0 %vm152_vm15, %v1328_v7 }
 0x64a   :  { %v4003_v26 = vclamps-f32 %v1218_v18, 4.0  ;;  %v1213_v39 = vadd.f32 %v1212_v56, %v1133_v0  ;;  %v4005_v56 = vld [vmem:[%s5979_s3 + $0x40] sm:$0xff] }
 0x64b   :  { %v1214_v57 = vpop.f32.mrf.mxu1 }
 0x64c   :  { %v1224_v59 = vmul.f32 %v4003_v26, %v4003_v26  ;;  %v1219_v27 = vmul.f32 0.70710677, %v1213_v39  ;;  %v1217_v48 = vmul.f32 0.5, %v1213_v39 }
 0x64e   :  { %v1226_v62 = vmul.f32 -2.7261424e-10, %v1224_v59  ;;  %v1252_v63 = vmul.f32 -1.45660715e-05, %v1224_v59  ;;  %v4004_v34 = vclamps-f32 %v1219_v27, 4.0 }
 0x650   :  { %v1228_v4 = vadd.f32 2.7706815e-08, %v1226_v62  ;;  %v1254_v20 = vadd.f32 -0.00021337405, %v1252_v63  ;;  %v1225_v61 = vmul.f32 %v4004_v34, %v4004_v34 }
 0x652   :  { %v1230_v11 = vmul.f32 %v1228_v4, %v1224_v59  ;;  %v1256_v19 = vmul.f32 %v1254_v20, %v1224_v59  ;;  %v1227_v21 = vmul.f32 -2.7261424e-10, %v1225_v61  ;;  %v1253_v22 = vmul.f32 -1.45660715e-05, %v1225_v61 }
 0x654   :  { %v1232_v28 = vadd.f32 -2.101024e-06, %v1230_v11  ;;  %v1258_v29 = vadd.f32 -0.001682827, %v1256_v19  ;;  %v1229_v30 = vadd.f32 2.7706815e-08, %v1227_v21 }
 0x655   :  { %v1255_v31 = vadd.f32 -0.00021337405, %v1253_v22 }
 0x656   :  { %v1234_v33 = vmul.f32 %v1232_v28, %v1224_v59  ;;  %v1260_v35 = vmul.f32 %v1258_v29, %v1224_v59  ;;  %v1231_v9 = vmul.f32 %v1229_v30, %v1225_v61  ;;  %v1327_v29 = vld [vmem:[#allocation3 + $0x60] sm:$0xff] }
 0x657   :  { %v1257_v36 = vmul.f32 %v1255_v31, %v1225_v61  ;;  %v1330_v31 = vld [vmem:[#allocation3 + $0x78] sm:$0xff] }
 0x658   :  { %v1236_v37 = vadd.f32 -5.6925062e-05, %v1234_v33  ;;  %v1262_v38 = vadd.f32 -0.0073733293, %v1260_v35  ;;  %v1233_v6 = vadd.f32 -2.101024e-06, %v1231_v9 }
 0x659   :  { %v1259_v40 = vadd.f32 -0.001682827, %v1257_v36  ;;  %v1329_v33 = vld [vmem:[#allocation3 + $0x70] sm:$0xff] }
 0x65a   :  { %v1238_v41 = vmul.f32 %v1236_v37, %v1224_v59  ;;  %v1264_v42 = vmul.f32 %v1262_v38, %v1224_v59  ;;  %v1235_v16 = vmul.f32 %v1233_v6, %v1225_v61 }
 0x65b   :  { %v1261_v60 = vmul.f32 %v1259_v40, %v1225_v61 }
 0x65c   :  { %v1240_v44 = vadd.f32 -0.00073499064, %v1238_v41  ;;  %v1266_v45 = vadd.f32 -0.014264739, %v1264_v42  ;;  %v1237_v46 = vadd.f32 -5.6925062e-05, %v1235_v16 }
 0x65d   :  { %v1263_v54 = vadd.f32 -0.0073733293, %v1261_v60 }
 0x65e   :  { %v1242_v47 = vmul.f32 %v1240_v44, %v1224_v59  ;;  %4136 = vrcp.f32 %v1266_v45  ;;  %v1239_v58 = vmul.f32 %v1237_v46, %v1225_v61 }
 0x65f   :  { %v1265_v5 = vmul.f32 %v1263_v54, %v1225_v61 }
 0x660   :  { %v1244_v49 = vadd.f32 -0.0029546, %v1242_v47  ;;  %v1241_v50 = vadd.f32 -0.00073499064, %v1239_v58 }
 0x661   :  { %v1267_v51 = vadd.f32 -0.014264739, %v1265_v5 }
 0x662   :  { %v1246_v13 = vmul.f32 %v1244_v49, %v1224_v59  ;;  %v1243_v10 = vmul.f32 %v1241_v50, %v1225_v61 }
 0x663   :  { %4138 = vrcp.f32 %v1267_v51 }
 0x664   :  { %v1245_v15 = vadd.f32 -0.0029546, %v1243_v10  ;;  %v1248_v17 = vadd.f32 -0.016096033, %v1246_v13 }
 0x666   :  { %v1247_v52 = vmul.f32 %v1245_v15, %v1225_v61  ;;  %v1250_v25 = vmul.f32 %v4003_v26, %v1248_v17  ;;  %v4006_v26 = vld [vmem:[%s5979_s3 + $0x48] sm:$0xff] }
 0x668   :  { %v1249_v53 = vadd.f32 -0.016096033, %v1247_v52 }
 0x66a   :  { %v1251_v12 = vmul.f32 %v4004_v34, %v1249_v53 }
 0x66b   :  { %v4137_v24 = vpop.eup %4136 }
 0x66c   :  { %v1269_v1 = vmul.f32 %v4137_v24, %v1250_v25 }
 0x66e   :  { %v1272_v32 = vadd.f32 1.0, %v1269_v1 }
 0x670   :  { %v4139_v23 = vpop.eup %4138  ;;  %v4882_v55 = vmul.f32 %v1272_v32, %v1216_v43 }
 0x671   :  { %v1271_v14 = vmul.f32 %v4139_v23, %v1251_v12 }
 0x672   :  { %1314 = vrot.lane.b32.xlu0 %v4882_v55, %s4231_s13 }
 0x673   :  { %v1273_v18 = vadd.f32 1.0, %v1271_v14 }
 0x675   :  { %v4886_v0 = vmul.f32 %v1273_v18, %v1217_v48 }
 0x676   :  { %1308 = vrot.lane.b32.xlu0 %v4882_v55, %s4228_s11 }
 0x677   :  { %1316 = vrot.lane.b32.xlu1 %v4886_v0, %s4231_s13 }
 0x67a   :  { %1302 = vrot.lane.b32.xlu0 %v4882_v55, %s4226_s10 }
 0x67b   :  { %1310 = vrot.lane.b32.xlu1 %v4886_v0, %s4228_s11 }
 0x67e   :  { %1296 = vrot.lane.b32.xlu0 %v4882_v55, %s4225_s9 }
 0x67f   :  { %1304 = vrot.lane.b32.xlu1 %v4886_v0, %s4226_s10 }
 0x682   :  { %1290 = vrot.lane.b32.xlu0 %v4882_v55, %s4224_s8 }
 0x683   :  { %1298 = vrot.lane.b32.xlu1 %v4886_v0, %s4225_s9 }
 0x686   :  { %1284 = vrot.lane.b32.xlu0 %v4882_v55, %s4222_s7 }
 0x687   :  { %1292 = vrot.lane.b32.xlu1 %v4886_v0, %s4224_s8 }
 0x68a   :  { %1278 = vrot.lane.b32.xlu0 %v4882_v55, %s4223_s2 }
 0x68b   :  { %1286 = vrot.lane.b32.xlu1 %v4886_v0, %s4222_s7 }
 0x68e   :  { %1320 = vrot.lane.b32.xlu0 %v4882_v55, %s4230_s12 }
 0x68f   :  { %1280 = vrot.lane.b32.xlu1 %v4886_v0, %s4223_s2 }
 0x692   :  { %1336 = vperm.xlu0 %4110, %v4005_v56  }
 0x693   :  { %1322 = vrot.lane.b32.xlu1 %v4886_v0, %s4230_s12 }
 0x697   :  { %1341 = vperm.xlu1 %4111, %v4006_v26  }
 0x6e4   :  { %v1315_v39 = vpop.permute.xlu0 %1314 }
 0x6e8   :  { %v1309_v57 = vpop.permute.xlu0 %1308 }
 0x6e9   :  { %v1317_v59 = vpop.permute.xlu1 %1316 }
 0x6ea   :  { %1351 = vmatpush1.msra.mxu0 %v1317_v59 }
 0x6eb   :  { %1352 = vmatprep.subr.mxu0 %v4227_v8 }
 0x6ec   :  { %1353 = vmatpush1.msra.mxu0 %v1315_v39  ;;  %v1303_v27 = vpop.permute.xlu0 %1302 }
 0x6ed   :  { %1354 = vmatprep.subr.mxu0 %v4227_v8  ;;  %v1311_v62 = vpop.permute.xlu1 %1310 }
 0x6ee   :  { %1355 = vmatpush1.msra.mxu0 %v1311_v62 }
 0x6ef   :  { %1356 = vmatprep.subr.mxu0 %v4227_v8 }
 0x6f0   :  { %1357 = vmatpush1.msra.mxu0 %v1309_v57  ;;  %v1297_v63 = vpop.permute.xlu0 %1296 }
 0x6f1   :  { %1358 = vmatprep.subr.mxu0 %v4227_v8  ;;  %v1305_v34 = vpop.permute.xlu1 %1304 }
 0x6f2   :  { %1359 = vmatpush1.msra.mxu0 %v1305_v34 }
 0x6f3   :  { %1360 = vmatprep.subr.mxu0 %v4227_v8 }
 0x6f4   :  { %1361 = vmatpush1.msra.mxu0 %v1303_v27  ;;  %v1291_v20 = vpop.permute.xlu0 %1290 }
 0x6f5   :  { %1362 = vmatprep.subr.mxu0 %v4227_v8  ;;  %v1299_v4 = vpop.permute.xlu1 %1298 }
 0x6f6   :  { %1363 = vmatpush1.msra.mxu0 %v1299_v4 }
 0x6f7   :  { %1364 = vmatprep.subr.mxu0 %v4227_v8 }
 0x6f8   :  { %1365 = vmatpush1.msra.mxu0 %v1297_v63  ;;  %v1285_v11 = vpop.permute.xlu0 %1284 }
 0x6f9   :  { %1366 = vmatprep.subr.mxu0 %v4227_v8  ;;  %v1293_v61 = vpop.permute.xlu1 %1292 }
 0x6fa   :  { %1367 = vmatpush1.msra.mxu0 %v1293_v61 }
 0x6fb   :  { %1368 = vmatprep.subr.mxu0 %v4227_v8 }
 0x6fc   :  { %1369 = vmatpush1.msra.mxu0 %v1291_v20  ;;  %v1279_v22 = vpop.permute.xlu0 %1278 }
 0x6fd   :  { %1370 = vmatprep.subr.mxu0 %v4227_v8  ;;  %v1287_v19 = vpop.permute.xlu1 %1286 }
 0x6fe   :  { %1371 = vmatpush1.msra.mxu0 %v1287_v19 }
 0x6ff   :  { %1372 = vmatprep.subr.mxu0 %v4227_v8 }
 0x700   :  { %1373 = vmatpush1.msra.mxu0 %v1285_v11  ;;  %v1321_v30 = vpop.permute.xlu0 %1320 }
 0x701   :  { %1374 = vmatprep.subr.mxu0 %v4227_v8  ;;  %v1281_v21 = vpop.permute.xlu1 %1280 }
 0x702   :  { %1375 = vmatpush1.msra.mxu0 %v1281_v21 }
 0x703   :  { %1376 = vmatprep.subr.mxu0 %v4227_v8 }
 0x704   :  { %1377 = vmatpush1.msra.mxu0 %v1279_v22 }
 0x705   :  { %1378 = vmatprep.subr.mxu0 %v4227_v8  ;;  %v1323_v28 = vpop.permute.xlu1 %1322 }
 0x706   :  { %1379 = vmatpush1.msra.mxu0 %v4886_v0 }
 0x707   :  { %1380 = vmatprep.subr.mxu0 %v4227_v8 }
 0x708   :  { %1381 = vmatpush1.msra.mxu0 %v4882_v55 }
 0x709   :  { %1410 = vmatprep.subr.mxu0 %v4227_v8 }
 0x70a   :  { %1411 = vmatpush2.msra.mxu0 %v1323_v28 }
 0x70b   :  { %1412 = vmatprep.subr.mxu0 %v4227_v8 }
 0x70c   :  { %1413 = vmatpush2.msra.mxu0 %v1321_v30 }
 0x70d   :  { %1415 = vmatmul.mubr.f32.vlgmr.msra.gmra.mxu0 %v1327_v29  ;;  %1768 = vmatprep.subr.mxu0 %v4227_v8  ;;  %v1337_v35 = vpop.permute.xlu0 %1336 }
 0x70e   :  { %4008 = vmatprep.mubr.msk.f32.mxu0 %vm152_vm15, %v1330_v31 }
 0x711   :  { %1420 = vmatmul.mubr.f32.gmra.mxu0 %v1329_v33 }
 0x712   :  { %v1342_v6 = vpop.permute.xlu1 %1341 }
 0x7cd   :  { %v1416_v9 = vpop.f32.mrf.mxu0 }
 0x7ce   :  { %v1417_v36 = vadd.f32 %v1416_v9, %v1337_v35 }
 0x7cf   :  { %v1418_v37 = vpop.f32.mrf.mxu0 }
 0x7d0   :  { %v1427_v38 = vmul.f32 0.70710677, %v1417_v36  ;;  %v1425_v29 = vmul.f32 0.5, %v1417_v36  ;;  %v1537_v36 = vld [vmem:[#allocation3 + $0x88] sm:$0xff] }
 0x7d1   :  { %v1421_v40 = vpop.f32.mrf.mxu0  ;;  %4013 = vmatprep.mubr.msk.f32.mxu1 %vm152_vm15, %v1537_v36 }
 0x7d2   :  { %v4009_v41 = vclamps-f32 %v1427_v38, 4.0  ;;  %v1422_v42 = vadd.f32 %v1421_v40, %v1342_v6  ;;  %v4011_v40 = vld [vmem:[%s5979_s3 + $0x50] sm:$0xff] }
 0x7d3   :  { %v1423_v16 = vpop.f32.mrf.mxu0 }
 0x7d4   :  { %v1433_v60 = vmul.f32 %v4009_v41, %v4009_v41  ;;  %v1428_v44 = vmul.f32 0.70710677, %v1422_v42  ;;  %v1426_v37 = vmul.f32 0.5, %v1422_v42 }
 0x7d6   :  { %v1435_v45 = vmul.f32 -2.7261424e-10, %v1433_v60  ;;  %v1461_v46 = vmul.f32 -1.45660715e-05, %v1433_v60  ;;  %v4010_v54 = vclamps-f32 %v1428_v44, 4.0 }
 0x7d8   :  { %v1437_v47 = vadd.f32 2.7706815e-08, %v1435_v45  ;;  %v1463_v58 = vadd.f32 -0.00021337405, %v1461_v46  ;;  %v1434_v5 = vmul.f32 %v4010_v54, %v4010_v54 }
 0x7da   :  { %v1439_v49 = vmul.f32 %v1437_v47, %v1433_v60  ;;  %v1465_v50 = vmul.f32 %v1463_v58, %v1433_v60  ;;  %v1436_v51 = vmul.f32 -2.7261424e-10, %v1434_v5  ;;  %v1462_v13 = vmul.f32 -1.45660715e-05, %v1434_v5 }
 0x7dc   :  { %v1441_v10 = vadd.f32 -2.101024e-06, %v1439_v49  ;;  %v1467_v15 = vadd.f32 -0.001682827, %v1465_v50  ;;  %v1438_v17 = vadd.f32 2.7706815e-08, %v1436_v51 }
 0x7dd   :  { %v1464_v52 = vadd.f32 -0.00021337405, %v1462_v13 }
 0x7de   :  { %v1443_v25 = vmul.f32 %v1441_v10, %v1433_v60  ;;  %v1469_v24 = vmul.f32 %v1467_v15, %v1433_v60  ;;  %v1440_v53 = vmul.f32 %v1438_v17, %v1434_v5  ;;  %v1536_v15 = vld [vmem:[#allocation3 + $0x80] sm:$0xff] }
 0x7df   :  { %v1466_v1 = vmul.f32 %v1464_v52, %v1434_v5  ;;  %v1539_v52 = vld [vmem:[#allocation3 + $0x98] sm:$0xff] }
 0x7e0   :  { %v1445_v43 = vadd.f32 -5.6925062e-05, %v1443_v25  ;;  %v1471_v32 = vadd.f32 -0.0073733293, %v1469_v24  ;;  %v1442_v12 = vadd.f32 -2.101024e-06, %v1440_v53 }
 0x7e1   :  { %v1468_v23 = vadd.f32 -0.001682827, %v1466_v1  ;;  %v1538_v25 = vld [vmem:[#allocation3 + $0x90] sm:$0xff]  ;;  %v2025_v24 = vsub.s32 3, %v4274_v2  ;;  %v2021_v53 = vsub.s32 1, %v4274_v2 }
 0x7e2   :  { %v1447_v55 = vmul.f32 %v1445_v43, %v1433_v60  ;;  %v1473_v14 = vmul.f32 %v1471_v32, %v1433_v60  ;;  %v1444_v48 = vmul.f32 %v1442_v12, %v1434_v5  ;;  %v4196_v1 = vld [vmem:[%s5976_s0] sm:$0xf] }
 0x7e3   :  { %v1470_v18 = vmul.f32 %v1468_v23, %v1434_v5  ;;  %v5015_v43 = vrot.slane %v4196_v1, %v2025_v24  ;;  %v5017_v32 = vrot.slane %v4196_v1, %v2021_v53 }
 0x7e4   :  { %v1449_v0 = vadd.f32 -0.00073499064, %v1447_v55  ;;  %v1475_v7 = vadd.f32 -0.014264739, %v1473_v14  ;;  %v1446_v56 = vadd.f32 -5.6925062e-05, %v1444_v48 }
 0x7e5   :  { %v1472_v26 = vadd.f32 -0.0073733293, %v1470_v18 }
 0x7e6   :  { %v1451_v39 = vmul.f32 %v1449_v0, %v1433_v60  ;;  %4140 = vrcp.f32 %v1475_v7  ;;  %v1448_v57 = vmul.f32 %v1446_v56, %v1434_v5 }
 0x7e7   :  { %v1474_v59 = vmul.f32 %v1472_v26, %v1434_v5 }
 0x7e8   :  { %v1453_v27 = vadd.f32 -0.0029546, %v1451_v39  ;;  %v1450_v62 = vadd.f32 -0.00073499064, %v1448_v57 }
 0x7e9   :  { %v1476_v63 = vadd.f32 -0.014264739, %v1474_v59 }
 0x7ea   :  { %v1455_v34 = vmul.f32 %v1453_v27, %v1433_v60  ;;  %v1452_v4 = vmul.f32 %v1450_v62, %v1434_v5 }
 0x7eb   :  { %4142 = vrcp.f32 %v1476_v63 }
 0x7ec   :  { %v1454_v20 = vadd.f32 -0.0029546, %v1452_v4  ;;  %v1457_v61 = vadd.f32 -0.016096033, %v1455_v34 }
 0x7ee   :  { %v1456_v11 = vmul.f32 %v1454_v20, %v1434_v5  ;;  %v1459_v19 = vmul.f32 %v4009_v41, %v1457_v61  ;;  %v4012_v41 = vld [vmem:[%s5979_s3 + $0x58] sm:$0xff] }
 0x7f0   :  { %v1458_v22 = vadd.f32 -0.016096033, %v1456_v11 }
 0x7f2   :  { %v1460_v31 = vmul.f32 %v4010_v54, %v1458_v22 }
 0x7f3   :  { %v4141_v21 = vpop.eup %4140 }
 0x7f4   :  { %v1478_v28 = vmul.f32 %v4141_v21, %v1459_v19 }
 0x7f6   :  { %v1481_v30 = vadd.f32 1.0, %v1478_v28 }
 0x7f8   :  { %v4143_v33 = vpop.eup %4142  ;;  %v4946_v35 = vmul.f32 %v1481_v30, %v1425_v29 }
 0x7f9   :  { %v1480_v9 = vmul.f32 %v4143_v33, %v1460_v31 }
 0x7fa   :  { %1523 = vrot.lane.b32.xlu0 %v4946_v35, %s4231_s13 }
 0x7fb   :  { %v1482_v38 = vadd.f32 1.0, %v1480_v9 }
 0x7fd   :  { %v4950_v6 = vmul.f32 %v1482_v38, %v1426_v37 }
 0x7fe   :  { %1517 = vrot.lane.b32.xlu0 %v4946_v35, %s4228_s11 }
 0x7ff   :  { %1525 = vrot.lane.b32.xlu1 %v4950_v6, %s4231_s13 }
 0x802   :  { %1511 = vrot.lane.b32.xlu0 %v4946_v35, %s4226_s10 }
 0x803   :  { %1519 = vrot.lane.b32.xlu1 %v4950_v6, %s4228_s11 }
 0x806   :  { %1505 = vrot.lane.b32.xlu0 %v4946_v35, %s4225_s9 }
 0x807   :  { %1513 = vrot.lane.b32.xlu1 %v4950_v6, %s4226_s10 }
 0x80a   :  { %1499 = vrot.lane.b32.xlu0 %v4946_v35, %s4224_s8 }
 0x80b   :  { %1507 = vrot.lane.b32.xlu1 %v4950_v6, %s4225_s9 }
 0x80e   :  { %1493 = vrot.lane.b32.xlu0 %v4946_v35, %s4222_s7 }
 0x80f   :  { %1501 = vrot.lane.b32.xlu1 %v4950_v6, %s4224_s8 }
 0x812   :  { %1487 = vrot.lane.b32.xlu0 %v4946_v35, %s4223_s2 }
 0x813   :  { %1495 = vrot.lane.b32.xlu1 %v4950_v6, %s4222_s7 }
 0x816   :  { %1529 = vrot.lane.b32.xlu0 %v4946_v35, %s4230_s12 }
 0x817   :  { %1489 = vrot.lane.b32.xlu1 %v4950_v6, %s4223_s2 }
 0x81a   :  { %1545 = vperm.xlu0 %4110, %v4011_v40  }
 0x81b   :  { %1531 = vrot.lane.b32.xlu1 %v4950_v6, %s4230_s12 }
 0x81e   :  { %2031 = vrot.lane.b32.xlu0 %v5015_v43, %s4223_s2 }
 0x81f   :  { %1550 = vperm.xlu1 %4111, %v4012_v41  }
 0x822   :  { %2038 = vrot.lane.b32.xlu0 %v5015_v43, %s4222_s7 }
 0x823   :  { %2029 = vrot.lane.b32.xlu1 %v5017_v32, %s4223_s2 }
 0x826   :  { %2045 = vrot.lane.b32.xlu0 %v5015_v43, %s4224_s8 }
 0x827   :  { %2036 = vrot.lane.b32.xlu1 %v5017_v32, %s4222_s7 }
 0x82a   :  { %2052 = vrot.lane.b32.xlu0 %v5015_v43, %s4225_s9 }
 0x82b   :  { %2043 = vrot.lane.b32.xlu1 %v5017_v32, %s4224_s8 }
 0x82e   :  { %2059 = vrot.lane.b32.xlu0 %v5015_v43, %s4226_s10 }
 0x82f   :  { %2050 = vrot.lane.b32.xlu1 %v5017_v32, %s4225_s9 }
 0x833   :  { %2057 = vrot.lane.b32.xlu1 %v5017_v32, %s4226_s10 }
 0x86c   :  { %v1524_v42 = vpop.permute.xlu0 %1523 }
 0x870   :  { %v1518_v16 = vpop.permute.xlu0 %1517 }
 0x871   :  { %v1526_v60 = vpop.permute.xlu1 %1525 }
 0x872   :  { %1560 = vmatpush1.msra.mxu1 %v1526_v60 }
 0x873   :  { %1561 = vmatprep.subr.mxu1 %v4227_v8 }
 0x874   :  { %1562 = vmatpush1.msra.mxu1 %v1524_v42  ;;  %v1512_v44 = vpop.permute.xlu0 %1511 }
 0x875   :  { %1563 = vmatprep.subr.mxu1 %v4227_v8  ;;  %v1520_v45 = vpop.permute.xlu1 %1519 }
 0x876   :  { %1564 = vmatpush1.msra.mxu1 %v1520_v45 }
 0x877   :  { %1565 = vmatprep.subr.mxu1 %v4227_v8 }
 0x878   :  { %1566 = vmatpush1.msra.mxu1 %v1518_v16  ;;  %v1506_v46 = vpop.permute.xlu0 %1505 }
 0x879   :  { %1567 = vmatprep.subr.mxu1 %v4227_v8  ;;  %v1514_v54 = vpop.permute.xlu1 %1513 }
 0x87a   :  { %1568 = vmatpush1.msra.mxu1 %v1514_v54 }
 0x87b   :  { %1569 = vmatprep.subr.mxu1 %v4227_v8 }
 0x87c   :  { %1570 = vmatpush1.msra.mxu1 %v1512_v44  ;;  %v1500_v58 = vpop.permute.xlu0 %1499 }
 0x87d   :  { %1571 = vmatprep.subr.mxu1 %v4227_v8  ;;  %v1508_v47 = vpop.permute.xlu1 %1507 }
 0x87e   :  { %1572 = vmatpush1.msra.mxu1 %v1508_v47 }
 0x87f   :  { %1573 = vmatprep.subr.mxu1 %v4227_v8 }
 0x880   :  { %1574 = vmatpush1.msra.mxu1 %v1506_v46  ;;  %v1494_v49 = vpop.permute.xlu0 %1493 }
 0x881   :  { %1575 = vmatprep.subr.mxu1 %v4227_v8  ;;  %v1502_v5 = vpop.permute.xlu1 %1501 }
 0x882   :  { %1576 = vmatpush1.msra.mxu1 %v1502_v5 }
 0x883   :  { %1577 = vmatprep.subr.mxu1 %v4227_v8 }
 0x884   :  { %1578 = vmatpush1.msra.mxu1 %v1500_v58  ;;  %v1488_v13 = vpop.permute.xlu0 %1487 }
 0x885   :  { %1579 = vmatprep.subr.mxu1 %v4227_v8  ;;  %v1496_v50 = vpop.permute.xlu1 %1495 }
 0x886   :  { %1580 = vmatpush1.msra.mxu1 %v1496_v50 }
 0x887   :  { %1581 = vmatprep.subr.mxu1 %v4227_v8 }
 0x888   :  { %1582 = vmatpush1.msra.mxu1 %v1494_v49  ;;  %v1530_v17 = vpop.permute.xlu0 %1529 }
 0x889   :  { %1583 = vmatprep.subr.mxu1 %v4227_v8  ;;  %v1490_v51 = vpop.permute.xlu1 %1489 }
 0x88a   :  { %1584 = vmatpush1.msra.mxu1 %v1490_v51 }
 0x88b   :  { %1585 = vmatprep.subr.mxu1 %v4227_v8 }
 0x88c   :  { %1586 = vmatpush1.msra.mxu1 %v1488_v13 }
 0x88d   :  { %1587 = vmatprep.subr.mxu1 %v4227_v8  ;;  %v1532_v10 = vpop.permute.xlu1 %1531 }
 0x88e   :  { %1588 = vmatpush1.msra.mxu1 %v4950_v6 }
 0x88f   :  { %1589 = vmatprep.subr.mxu1 %v4227_v8 }
 0x890   :  { %1590 = vmatpush1.msra.mxu1 %v4946_v35 }
 0x891   :  { %1619 = vmatprep.subr.mxu1 %v4227_v8 }
 0x892   :  { %1620 = vmatpush2.msra.mxu1 %v1532_v10 }
 0x893   :  { %1621 = vmatprep.subr.mxu1 %v4227_v8 }
 0x894   :  { %1622 = vmatpush2.msra.mxu1 %v1530_v17 }
 0x895   :  { %1624 = vmatmul.mubr.f32.vlgmr.msra.gmra.mxu1 %v1536_v15  ;;  %4082 = vmatprep.subr.mxu1 %v4227_v8  ;;  %v1546_v2 = vpop.permute.xlu0 %1545 }
 0x896   :  { %4014 = vmatprep.mubr.msk.f32.mxu1 %vm152_vm15, %v1539_v52 }
 0x899   :  { %1629 = vmatmul.mubr.f32.gmra.mxu1 %v1538_v25 }
 0x89a   :  { %v1551_v48 = vpop.permute.xlu1 %1550 }
 0x955   :  { %v1625_v12 = vpop.f32.mrf.mxu1 }
 0x956   :  { %v1626_v23 = vadd.f32 %v1625_v12, %v1546_v2 }
 0x957   :  { %v1627_v55 = vpop.f32.mrf.mxu1 }
 0x958   :  { %v1636_v14 = vmul.f32 0.70710677, %v1626_v23  ;;  %v1634_v24 = vmul.f32 0.5, %v1626_v23  ;;  %v1746_v23 = vld [vmem:[#allocation3 + $0xa8] sm:$0xff] }
 0x959   :  { %v1630_v18 = vpop.f32.mrf.mxu1  ;;  %4019 = vmatprep.mubr.msk.f32.mxu0 %vm152_vm15, %v1746_v23 }
 0x95a   :  { %v4015_v0 = vclamps-f32 %v1636_v14, 4.0  ;;  %v1631_v7 = vadd.f32 %v1630_v18, %v1551_v48 }
 0x95b   :  { %v1632_v56 = vpop.f32.mrf.mxu1 }
 0x95c   :  { %v1642_v26 = vmul.f32 %v4015_v0, %v4015_v0  ;;  %v1637_v39 = vmul.f32 0.70710677, %v1631_v7  ;;  %v1635_v14 = vmul.f32 0.5, %v1631_v7  ;;  %v4017_v7 = vld [vmem:[%s5979_s3 + $0x60] sm:$0xff]  ;;  %v2104_v56 = vld [vmem:[%s5979_s3 + $0x8] sm:$0xff] }
 0x95e   :  { %v1644_v57 = vmul.f32 -2.7261424e-10, %v1642_v26  ;;  %v1670_v59 = vmul.f32 -1.45660715e-05, %v1642_v26  ;;  %v4016_v27 = vclamps-f32 %v1637_v39, 4.0  ;;  %v2032_v39 = vpop.permute.xlu0 %2031 }
 0x960   :  { %v1646_v62 = vadd.f32 2.7706815e-08, %v1644_v57  ;;  %v1672_v63 = vadd.f32 -0.00021337405, %v1670_v59  ;;  %v1643_v34 = vmul.f32 %v4016_v27, %v4016_v27  ;;  %v2030_v57 = vpop.permute.xlu1 %2029 }
 0x962   :  { %v1648_v4 = vmul.f32 %v1646_v62, %v1642_v26  ;;  %v1674_v20 = vmul.f32 %v1672_v63, %v1642_v26  ;;  %v1645_v61 = vmul.f32 -2.7261424e-10, %v1643_v34  ;;  %v1671_v11 = vmul.f32 -1.45660715e-05, %v1643_v34  ;;  %v2039_v59 = vpop.permute.xlu0 %2038 }
 0x964   :  { %v1650_v19 = vadd.f32 -2.101024e-06, %v1648_v4  ;;  %v1676_v21 = vadd.f32 -0.001682827, %v1674_v20  ;;  %v1647_v22 = vadd.f32 2.7706815e-08, %v1645_v61 }
 0x965   :  { %v1673_v28 = vadd.f32 -0.00021337405, %v1671_v11 }
 0x966   :  { %v1652_v29 = vmul.f32 %v1650_v19, %v1642_v26  ;;  %v1678_v30 = vmul.f32 %v1676_v21, %v1642_v26  ;;  %v1649_v31 = vmul.f32 %v1647_v22, %v1643_v34  ;;  %v2046_v62 = vpop.permute.xlu0 %2045 }
 0x967   :  { %v1675_v33 = vmul.f32 %v1673_v28, %v1643_v34 }
 0x968   :  { %v1654_v35 = vadd.f32 -5.6925062e-05, %v1652_v29  ;;  %v1680_v9 = vadd.f32 -0.0073733293, %v1678_v30  ;;  %v1651_v37 = vadd.f32 -2.101024e-06, %v1649_v31 }
 0x969   :  { %v1677_v38 = vadd.f32 -0.001682827, %v1675_v33 }
 0x96a   :  { %v1656_v6 = vmul.f32 %v1654_v35, %v1642_v26  ;;  %v1682_v36 = vmul.f32 %v1680_v9, %v1642_v26  ;;  %v1653_v40 = vmul.f32 %v1651_v37, %v1643_v34 }
 0x96b   :  { %v1679_v41 = vmul.f32 %v1677_v38, %v1643_v34 }
 0x96c   :  { %v1658_v42 = vadd.f32 -0.00073499064, %v1656_v6  ;;  %v1684_v16 = vadd.f32 -0.014264739, %v1682_v36  ;;  %v1655_v60 = vadd.f32 -5.6925062e-05, %v1653_v40  ;;  %v2086_v6 = vsel %vm115_vm1, %v5015_v43, %v2032_v39 }
 0x96d   :  { %v1681_v44 = vadd.f32 -0.0073733293, %v1679_v41  ;;  %v2033_v41 = vsel %vm55_vm0, %v2030_v57, %v2032_v39 }
 0x96e   :  { %v1660_v45 = vmul.f32 %v1658_v42, %v1642_v26  ;;  %4144 = vrcp.f32 %v1684_v16  ;;  %v1657_v46 = vmul.f32 %v1655_v60, %v1643_v34  ;;  %v2088_v42 = vsel %vm118_vm4, %v2086_v6, %v2039_v59 }
 0x96f   :  { %v1683_v54 = vmul.f32 %v1681_v44, %v1643_v34  ;;  %v2085_v60 = vsel %vm115_vm1, %v5017_v32, %v2033_v41  ;;  %v2090_v44 = vsel %vm121_vm5, %v2088_v42, %v2046_v62 }
 0x970   :  { %v1662_v47 = vadd.f32 -0.0029546, %v1660_v45  ;;  %v1659_v58 = vadd.f32 -0.00073499064, %v1657_v46 }
 0x971   :  { %v1685_v5 = vadd.f32 -0.014264739, %v1683_v54 }
 0x972   :  { %v1664_v49 = vmul.f32 %v1662_v47, %v1642_v26  ;;  %v1661_v50 = vmul.f32 %v1659_v58, %v1643_v34  ;;  %v4018_v26 = vld [vmem:[%s5979_s3 + $0x68] sm:$0xff] }
 0x973   :  { %4146 = vrcp.f32 %v1685_v5  ;;  %v1745_v5 = vld [vmem:[#allocation3 + $0xa0] sm:$0xff] }
 0x974   :  { %v1663_v51 = vadd.f32 -0.0029546, %v1661_v50  ;;  %v1666_v13 = vadd.f32 -0.016096033, %v1664_v49 }
 0x976   :  { %v1665_v10 = vmul.f32 %v1663_v51, %v1643_v34  ;;  %v1668_v15 = vmul.f32 %v4015_v0, %v1666_v13  ;;  %v2103_v0 = vld [vmem:[%s5979_s3] sm:$0xff]  ;;  %v5100_v34 = vpop.permute.xlu0 %2052 }
 0x977   :  { %v2092_v47 = vsel %vm124_vm9, %v2090_v44, %v5100_v34  ;;  %v1748_v13 = vld [vmem:[#allocation3 + $0xb8] sm:$0xff] }
 0x978   :  { %v1667_v52 = vadd.f32 -0.016096033, %v1665_v10 }
 0x97a   :  { %v1669_v1 = vmul.f32 %v4016_v27, %v1667_v52  ;;  %v2037_v27 = vpop.permute.xlu1 %2036  ;;  %v5104_v20 = vpop.permute.xlu0 %2059 }
 0x97b   :  { %v4145_v17 = vpop.eup %4144  ;;  %v2094_v51 = vsel %vm127_vm10, %v2092_v47, %v5104_v20 }
 0x97c   :  { %v1687_v25 = vmul.f32 %v4145_v17, %v1668_v15 }
 0x97e   :  { %v1690_v53 = vadd.f32 1.0, %v1687_v25  ;;  %v2044_v63 = vpop.permute.xlu1 %2043 }
 0x97f   :  { %v2047_v54 = vsel %vm71_vm3, %v2044_v63, %v2046_v62 }
 0x980   :  { %v4147_v2 = vpop.eup %4146  ;;  %v5039_v12 = vmul.f32 %v1690_v53, %v1634_v24 }
 0x981   :  { %v1689_v55 = vmul.f32 %v4147_v2, %v1669_v1  ;;  %v1747_v1 = vld [vmem:[#allocation3 + $0xb0] sm:$0xff] }
 0x982   :  { %1732 = vrot.lane.b32.xlu0 %v5039_v12, %s4231_s13  ;;  %v5102_v4 = vpop.permute.xlu1 %2050 }
 0x983   :  { %v1691_v48 = vadd.f32 1.0, %v1689_v55  ;;  %v2054_v50 = vsel %vm79_vm6, %v5102_v4, %v5100_v34 }
 0x985   :  { %v5043_v18 = vmul.f32 %v1691_v48, %v1635_v14 }
 0x986   :  { %1726 = vrot.lane.b32.xlu0 %v5039_v12, %s4228_s11  ;;  %v5106_v11 = vpop.permute.xlu1 %2057 }
 0x987   :  { %1734 = vrot.lane.b32.xlu1 %v5043_v18, %s4231_s13  ;;  %v2061_v24 = vsel %vm87_vm7, %v5106_v11, %v5104_v20 }
 0x98a   :  { %1720 = vrot.lane.b32.xlu0 %v5039_v12, %s4226_s10 }
 0x98b   :  { %1728 = vrot.lane.b32.xlu1 %v5043_v18, %s4228_s11 }
 0x98e   :  { %1714 = vrot.lane.b32.xlu0 %v5039_v12, %s4225_s9 }
 0x98f   :  { %1722 = vrot.lane.b32.xlu1 %v5043_v18, %s4226_s10 }
 0x992   :  { %1708 = vrot.lane.b32.xlu0 %v5039_v12, %s4224_s8 }
 0x993   :  { %1716 = vrot.lane.b32.xlu1 %v5043_v18, %s4225_s9 }
 0x996   :  { %1702 = vrot.lane.b32.xlu0 %v5039_v12, %s4222_s7 }
 0x997   :  { %1710 = vrot.lane.b32.xlu1 %v5043_v18, %s4224_s8 }
 0x99a   :  { %1696 = vrot.lane.b32.xlu0 %v5039_v12, %s4223_s2 }
 0x99b   :  { %1704 = vrot.lane.b32.xlu1 %v5043_v18, %s4222_s7 }
 0x99e   :  { %1738 = vrot.lane.b32.xlu0 %v5039_v12, %s4230_s12 }
 0x99f   :  { %1698 = vrot.lane.b32.xlu1 %v5043_v18, %s4223_s2 }
 0x9a2   :  { %2066 = vrot.lane.b32.xlu0 %v5015_v43, %s4228_s11 }
 0x9a3   :  { %2064 = vrot.lane.b32.xlu1 %v5017_v32, %s4228_s11 }
 0x9a6   :  { %2080 = vrot.lane.b32.xlu0 %v5015_v43, %s4230_s12 }
 0x9a7   :  { %1740 = vrot.lane.b32.xlu1 %v5043_v18, %s4230_s12 }
 0x9aa   :  { %2073 = vrot.lane.b32.xlu0 %v5015_v43, %s4231_s13  ;;  %v2040_v43 = vsel %vm63_vm2, %v2037_v27, %v2039_v59 }
 0x9ab   :  { %2078 = vrot.lane.b32.xlu1 %v5017_v32, %s4230_s12  ;;  %v2087_v46 = vsel %vm118_vm4, %v2085_v60, %v2040_v43 }
 0x9ac   :  { %v2089_v49 = vsel %vm121_vm5, %v2087_v46, %v2047_v54 }
 0x9ad   :  { %v2091_v25 = vsel %vm124_vm9, %v2089_v49, %v2054_v50 }
 0x9ae   :  { %2107 = vperm.xlu0 %4110, %v2103_v0   ;;  %v2102_v0 = vld [vmem:[%s5977_s1 + $0x8] sm:$0xff] }
 0x9af   :  { %2071 = vrot.lane.b32.xlu1 %v5017_v32, %s4231_s13 }
 0x9b2   :  { %1754 = vperm.xlu0 %4110, %v4017_v7  }
 0x9b3   :  { %2112 = vperm.xlu1 %4111, %v2104_v56  }
 0x9b7   :  { %1759 = vperm.xlu1 %4111, %v4018_v26  }
 0x9f4   :  { %v1733_v61 = vpop.permute.xlu0 %1732 }
 0x9f8   :  { %v1727_v19 = vpop.permute.xlu0 %1726 }
 0x9f9   :  { %v1735_v21 = vpop.permute.xlu1 %1734 }
 0x9fa   :  { %1769 = vmatpush1.msra.mxu0 %v1735_v21 }
 0x9fb   :  { %1770 = vmatprep.subr.mxu0 %v4227_v8 }
 0x9fc   :  { %1771 = vmatpush1.msra.mxu0 %v1733_v61  ;;  %v1721_v22 = vpop.permute.xlu0 %1720 }
 0x9fd   :  { %1772 = vmatprep.subr.mxu0 %v4227_v8  ;;  %v1729_v28 = vpop.permute.xlu1 %1728 }
 0x9fe   :  { %1773 = vmatpush1.msra.mxu0 %v1729_v28 }
 0x9ff   :  { %1774 = vmatprep.subr.mxu0 %v4227_v8 }
 0xa00   :  { %1775 = vmatpush1.msra.mxu0 %v1727_v19  ;;  %v1715_v29 = vpop.permute.xlu0 %1714 }
 0xa01   :  { %1776 = vmatprep.subr.mxu0 %v4227_v8  ;;  %v1723_v30 = vpop.permute.xlu1 %1722 }
 0xa02   :  { %1777 = vmatpush1.msra.mxu0 %v1723_v30 }
 0xa03   :  { %1778 = vmatprep.subr.mxu0 %v4227_v8 }
 0xa04   :  { %1779 = vmatpush1.msra.mxu0 %v1721_v22  ;;  %v1709_v31 = vpop.permute.xlu0 %1708 }
 0xa05   :  { %1780 = vmatprep.subr.mxu0 %v4227_v8  ;;  %v1717_v33 = vpop.permute.xlu1 %1716 }
 0xa06   :  { %1781 = vmatpush1.msra.mxu0 %v1717_v33 }
 0xa07   :  { %1782 = vmatprep.subr.mxu0 %v4227_v8 }
 0xa08   :  { %1783 = vmatpush1.msra.mxu0 %v1715_v29  ;;  %v1703_v35 = vpop.permute.xlu0 %1702 }
 0xa09   :  { %1784 = vmatprep.subr.mxu0 %v4227_v8  ;;  %v1711_v9 = vpop.permute.xlu1 %1710 }
 0xa0a   :  { %1785 = vmatpush1.msra.mxu0 %v1711_v9 }
 0xa0b   :  { %1786 = vmatprep.subr.mxu0 %v4227_v8 }
 0xa0c   :  { %1787 = vmatpush1.msra.mxu0 %v1709_v31  ;;  %v1697_v37 = vpop.permute.xlu0 %1696 }
 0xa0d   :  { %1788 = vmatprep.subr.mxu0 %v4227_v8  ;;  %v1705_v38 = vpop.permute.xlu1 %1704 }
 0xa0e   :  { %1789 = vmatpush1.msra.mxu0 %v1705_v38 }
 0xa0f   :  { %1790 = vmatprep.subr.mxu0 %v4227_v8 }
 0xa10   :  { %1791 = vmatpush1.msra.mxu0 %v1703_v35  ;;  %v1739_v36 = vpop.permute.xlu0 %1738 }
 0xa11   :  { %1792 = vmatprep.subr.mxu0 %v4227_v8  ;;  %v1699_v40 = vpop.permute.xlu1 %1698 }
 0xa12   :  { %1793 = vmatpush1.msra.mxu0 %v1699_v40 }
 0xa13   :  { %1794 = vmatprep.subr.mxu0 %v4227_v8 }
 0xa14   :  { %1795 = vmatpush1.msra.mxu0 %v1697_v37  ;;  %v2067_v16 = vpop.permute.xlu0 %2066 }
 0xa15   :  { %1796 = vmatprep.subr.mxu0 %v4227_v8  ;;  %v2065_v45 = vpop.permute.xlu1 %2064  ;;  %v2096_v10 = vsel %vm130_vm12, %v2094_v51, %v2067_v16 }
 0xa16   :  { %1797 = vmatpush1.msra.mxu0 %v5043_v18  ;;  %v2068_v2 = vsel %vm95_vm11, %v2065_v45, %v2067_v16  ;;  %v2101_v18 = vld [vmem:[%s5977_s1] sm:$0xff] }
 0xa17   :  { %1798 = vmatprep.subr.mxu0 %v4227_v8 }
 0xa18   :  { %1799 = vmatpush1.msra.mxu0 %v5039_v12  ;;  %v2081_v32 = vpop.permute.xlu0 %2080  ;;  %v2093_v12 = vsel %vm127_vm10, %v2091_v25, %v2061_v24 }
 0xa19   :  { %1828 = vmatprep.subr.mxu0 %v4227_v8  ;;  %v1741_v58 = vpop.permute.xlu1 %1740  ;;  %v2095_v14 = vsel %vm130_vm12, %v2093_v12, %v2068_v2 }
 0xa1a   :  { %1829 = vmatpush2.msra.mxu0 %v1741_v58 }
 0xa1b   :  { %1830 = vmatprep.subr.mxu0 %v4227_v8 }
 0xa1c   :  { %1831 = vmatpush2.msra.mxu0 %v1739_v36  ;;  %v2074_v15 = vpop.permute.xlu0 %2073 }
 0xa1d   :  { %1833 = vmatmul.mubr.f32.vlgmr.msra.gmra.mxu0 %v1745_v5  ;;  %v2079_v17 = vpop.permute.xlu1 %2078  ;;  %4025 = vmatprep.subr.msk.mxu0 %vm115_vm1, %v2081_v32  ;;  %v2098_v52 = vsel %vm133_vm14, %v2096_v10, %v2074_v15 }
 0xa1e   :  { %v2082_v53 = vsel %vm111_vm8, %v2079_v17, %v2081_v32  ;;  %4020 = vmatprep.mubr.msk.f32.mxu0 %vm152_vm15, %v1748_v13 }
 0xa1f   :  { %4026 = vmatpush1.msk.msra.mxu0 %vm115_vm1, %v2082_v53  ;;  %vm4232_vm1 = vmmov 0  }
 0xa20   :  { %2151 = vmatprep.subr.mxu0 %v2098_v52  ;;  %4086 = vmatprep.mubr.msk.f32.mxu1 %vm4232_vm1, %v4227_v8 }
 0xa21   :  { %1838 = vmatmul.mubr.f32.gmra.mxu0 %v1747_v1  ;;  %v2072_v55 = vpop.permute.xlu1 %2071 }
 0xa22   :  { %v2075_v48 = vsel %vm103_vm13, %v2072_v55, %v2074_v15  ;;  %2185 = vmatprep.mubr.f32.mxu0 %v4227_v8 }
 0xa23   :  { %v2097_v23 = vsel %vm133_vm14, %v2095_v14, %v2075_v48 }
 0xa24   :  { %2152 = vmatpush1.msra.mxu0 %v2097_v23 }
 0xa25   :  { %4027 = vmatmul.mubr.msk.f32.vlgmr.msra.gmra.mxu0 %vm152_vm15, %v2101_v18 }
 0xa26   :  { %2191 = vmatprep.mubr.f32.mxu0 %v4227_v8 }
 0xa29   :  { %4028 = vmatmul.mubr.msk.f32.gmra.mxu0 %vm152_vm15, %v2102_v0  ;;  %v2108_v7 = vpop.permute.xlu0 %2107 }
 0xa2d   :  { %v1755_v26 = vpop.permute.xlu0 %1754 }
 0xa2e   :  { %v5170_v56 = vpop.permute.xlu1 %2112 }
 0xa32   :  { %v1760_v62 = vpop.permute.xlu1 %1759 }
 0xadd   :  { %v1834_v39 = vpop.f32.mrf.mxu0 }
 0xade   :  { %v5172_v57 = vadd.f32 %v1834_v39, %v1755_v26 }
 0xadf   :  { %v1836_v59 = vpop.f32.mrf.mxu0 }
 0xae0   :  { %v1845_v27 = vmul.f32 0.70710677, %v5172_v57 }
 0xae1   :  { %v1839_v63 = vpop.f32.mrf.mxu0 }
 0xae2   :  { %v5175_v34 = vclamps-f32 %v1845_v27, 4.0  ;;  %v5177_v4 = vadd.f32 %v1839_v63, %v1760_v62 }
 0xae3   :  { %v1841_v20 = vpop.f32.mrf.mxu0 }
 0xae4   :  { %v5181_v61 = vmul.f32 %v5175_v34, %v5175_v34  ;;  %v1846_v11 = vmul.f32 0.70710677, %v5177_v4 }
 0xae5   :  { %v2187_v19 = vpop.f32.mrf.mxu0 }
 0xae6   :  { %v1853_v21 = vmul.f32 -2.7261424e-10, %v5181_v61  ;;  %v1879_v22 = vmul.f32 -1.45660715e-05, %v5181_v61  ;;  %v5186_v28 = vclamps-f32 %v1846_v11, 4.0  ;;  %v5188_v29 = vadd.f32 %v2187_v19, %v2108_v7 }
 0xae7   :  { %v2189_v30 = vpop.f32.mrf.mxu0 }
 0xae8   :  { %v1855_v31 = vadd.f32 2.7706815e-08, %v1853_v21  ;;  %v1881_v33 = vadd.f32 -0.00021337405, %v1879_v22  ;;  %v5192_v35 = vmul.f32 %v5186_v28, %v5186_v28  ;;  %v2202_v9 = vmul.f32 0.70710677, %v5188_v29 }
 0xae9   :  { %v5195_v37 = vadd.f32 %v2189_v30, %v2108_v7  ;;  %v2193_v38 = vpop.f32.mrf.mxu0 }
 0xaea   :  { %v1857_v6 = vmul.f32 %v1855_v31, %v5181_v61  ;;  %v1883_v36 = vmul.f32 %v1881_v33, %v5181_v61  ;;  %v1854_v40 = vmul.f32 -2.7261424e-10, %v5192_v35  ;;  %v1880_v41 = vmul.f32 -1.45660715e-05, %v5192_v35 }
 0xaeb   :  { %v5201_v42 = vclamps-f32 %v2202_v9, 4.0  ;;  %v2203_v16 = vmul.f32 0.70710677, %v5195_v37  ;;  %v5205_v60 = vadd.f32 %v2193_v38, %v5170_v56  ;;  %v2195_v30 = vpop.f32.mrf.mxu0 }
 0xaec   :  { %v1859_v43 = vadd.f32 -2.101024e-06, %v1857_v6  ;;  %v1885_v44 = vadd.f32 -0.001682827, %v1883_v36  ;;  %v1856_v45 = vadd.f32 2.7706815e-08, %v1854_v40 }
 0xaed   :  { %v1882_v46 = vadd.f32 -0.00021337405, %v1880_v41  ;;  %v5209_v54 = vmul.f32 %v5201_v42, %v5201_v42  ;;  %v5211_v47 = vclamps-f32 %v2203_v16, 4.0  ;;  %v2204_v49 = vmul.f32 0.70710677, %v5205_v60 }
 0xaee   :  { %v1861_v32 = vmul.f32 %v1859_v43, %v5181_v61  ;;  %v1887_v58 = vmul.f32 %v1885_v44, %v5181_v61  ;;  %v1858_v5 = vmul.f32 %v1856_v45, %v5192_v35  ;;  %v5247_v45 = vadd.f32 %v2195_v30, %v5170_v56 }
 0xaef   :  { %v1884_v50 = vmul.f32 %v1882_v46, %v5192_v35  ;;  %v2218_v51 = vmul.f32 -2.7261424e-10, %v5209_v54  ;;  %v2270_v13 = vmul.f32 -1.45660715e-05, %v5209_v54  ;;  %v5222_v10 = vmul.f32 %v5211_v47, %v5211_v47 }
 0xaf0   :  { %v1863_v15 = vadd.f32 -5.6925062e-05, %v1861_v32  ;;  %v1889_v17 = vadd.f32 -0.0073733293, %v1887_v58  ;;  %v1860_v52 = vadd.f32 -2.101024e-06, %v1858_v5 }
 0xaf1   :  { %v1886_v25 = vadd.f32 -0.001682827, %v1884_v50  ;;  %v2222_v24 = vadd.f32 2.7706815e-08, %v2218_v51  ;;  %v2274_v53 = vadd.f32 -0.00021337405, %v2270_v13 }
 0xaf2   :  { %v1865_v1 = vmul.f32 %v1863_v15, %v5181_v61  ;;  %v1891_v2 = vmul.f32 %v1889_v17, %v5181_v61  ;;  %v1862_v12 = vmul.f32 %v1860_v52, %v5192_v35  ;;  %v2219_v55 = vmul.f32 -2.7261424e-10, %v5222_v10 }
 0xaf3   :  { %v1888_v14 = vmul.f32 %v1886_v25, %v5192_v35  ;;  %v2226_v48 = vmul.f32 %v2222_v24, %v5209_v54  ;;  %v2278_v18 = vmul.f32 %v2274_v53, %v5209_v54  ;;  %v2271_v23 = vmul.f32 -1.45660715e-05, %v5222_v10 }
 0xaf4   :  { %v1867_v0 = vadd.f32 -0.00073499064, %v1865_v1  ;;  %v1893_v7 = vadd.f32 -0.014264739, %v1891_v2  ;;  %v1864_v26 = vadd.f32 -5.6925062e-05, %v1862_v12 }
 0xaf5   :  { %v1890_v39 = vadd.f32 -0.0073733293, %v1888_v14  ;;  %v2230_v59 = vadd.f32 -2.101024e-06, %v2226_v48  ;;  %v2282_v27 = vadd.f32 -0.001682827, %v2278_v18 }
 0xaf6   :  { %v1869_v62 = vmul.f32 %v1867_v0, %v5181_v61  ;;  %4148 = vrcp.f32 %v1893_v7  ;;  %v1866_v63 = vmul.f32 %v1864_v26, %v5192_v35  ;;  %v2223_v20 = vadd.f32 2.7706815e-08, %v2219_v55 }
 0xaf7   :  { %v1892_v11 = vmul.f32 %v1890_v39, %v5192_v35  ;;  %v2234_v19 = vmul.f32 %v2230_v59, %v5209_v54  ;;  %v2286_v21 = vmul.f32 %v2282_v27, %v5209_v54  ;;  %v2275_v22 = vadd.f32 -0.00021337405, %v2271_v23 }
 0xaf8   :  { %v1871_v31 = vadd.f32 -0.0029546, %v1869_v62  ;;  %v1868_v33 = vadd.f32 -0.00073499064, %v1866_v63  ;;  %v2227_v9 = vmul.f32 %v2223_v20, %v5222_v10  ;;  %v5238_v38 = vclamps-f32 %v2204_v49, 4.0 }
 0xaf9   :  { %v1894_v6 = vadd.f32 -0.014264739, %v1892_v11  ;;  %v2238_v36 = vadd.f32 -5.6925062e-05, %v2234_v19  ;;  %v2290_v40 = vadd.f32 -0.0073733293, %v2286_v21  ;;  %v2279_v41 = vmul.f32 %v2275_v22, %v5222_v10 }
 0xafa   :  { %v1870_v16 = vmul.f32 %v1868_v33, %v5192_v35  ;;  %v2231_v43 = vadd.f32 -2.101024e-06, %v2227_v9  ;;  %v5244_v44 = vmul.f32 %v5238_v38, %v5238_v38  ;;  %v1873_v5 = vmul.f32 %v1871_v31, %v5181_v61 }
 0xafb   :  { %4150 = vrcp.f32 %v1894_v6  ;;  %v2242_v46 = vmul.f32 %v2238_v36, %v5209_v54  ;;  %v2294_v32 = vmul.f32 %v2290_v40, %v5209_v54  ;;  %v2283_v58 = vadd.f32 -0.001682827, %v2279_v41 }
 0xafc   :  { %v1872_v49 = vadd.f32 -0.0029546, %v1870_v16  ;;  %v2235_v50 = vmul.f32 %v2231_v43, %v5222_v10  ;;  %v2220_v51 = vmul.f32 -2.7261424e-10, %v5244_v44  ;;  %v2272_v56 = vmul.f32 -1.45660715e-05, %v5244_v44 }
 0xafd   :  { %v2246_v13 = vadd.f32 -0.00073499064, %v2242_v46  ;;  %v2298_v15 = vadd.f32 -0.014264739, %v2294_v32  ;;  %v2287_v17 = vmul.f32 %v2283_v58, %v5222_v10  ;;  %v1875_v2 = vadd.f32 -0.016096033, %v1873_v5 }
 0xafe   :  { %v1874_v52 = vmul.f32 %v1872_v49, %v5192_v35  ;;  %v2239_v25 = vadd.f32 -5.6925062e-05, %v2235_v50  ;;  %v2224_v24 = vadd.f32 2.7706815e-08, %v2220_v51  ;;  %v2276_v61 = vadd.f32 -0.00021337405, %v2272_v56 }
 0xaff   :  { %v2250_v53 = vmul.f32 %v2246_v13, %v5209_v54  ;;  %4152 = vrcp.f32 %v2298_v15  ;;  %v2291_v1 = vadd.f32 -0.0073733293, %v2287_v17  ;;  %v2205_v23 = vmul.f32 0.70710677, %v5247_v45 }
 0xb00   :  { %v2243_v12 = vmul.f32 %v2239_v25, %v5222_v10  ;;  %v2228_v55 = vmul.f32 %v2224_v24, %v5244_v44  ;;  %v2280_v18 = vmul.f32 %v2276_v61, %v5244_v44  ;;  %v1876_v35 = vadd.f32 -0.016096033, %v1874_v52 }
 0xb01   :  { %v2254_v14 = vadd.f32 -0.0029546, %v2250_v53  ;;  %v2295_v48 = vmul.f32 %v2291_v1, %v5222_v10  ;;  %v5264_v62 = vclamps-f32 %v2205_v23, 4.0  ;;  %v1877_v63 = vmul.f32 %v5175_v34, %v1875_v2 }
 0xb02   :  { %v2247_v0 = vadd.f32 -0.00073499064, %v2243_v12  ;;  %v2232_v7 = vadd.f32 -2.101024e-06, %v2228_v55  ;;  %v2284_v27 = vadd.f32 -0.001682827, %v2280_v18  ;;  %v1878_v33 = vmul.f32 %v5186_v28, %v1876_v35 }
 0xb03   :  { %v4149_v26 = vpop.eup %4148  ;;  %v2258_v39 = vmul.f32 %v2254_v14, %v5209_v54  ;;  %v2299_v59 = vadd.f32 -0.014264739, %v2295_v48  ;;  %v5272_v21 = vmul.f32 %v5264_v62, %v5264_v62  ;;  %v1844_v5 = vmul.f32 0.5, %v5177_v4 }
 0xb04   :  { %v2251_v20 = vmul.f32 %v2247_v0, %v5222_v10  ;;  %v2236_v11 = vmul.f32 %v2232_v7, %v5244_v44  ;;  %v2288_v19 = vmul.f32 %v2284_v27, %v5244_v44  ;;  %v1896_v22 = vmul.f32 %v4149_v26, %v1877_v63 }
 0xb05   :  { %4154 = vrcp.f32 %v2299_v59  ;;  %v2262_v30 = vadd.f32 -0.016096033, %v2258_v39  ;;  %v2221_v34 = vmul.f32 -2.7261424e-10, %v5272_v21  ;;  %v2273_v6 = vmul.f32 -1.45660715e-05, %v5272_v21 }
 0xb06   :  { %v2255_v54 = vadd.f32 -0.0029546, %v2251_v20  ;;  %v2240_v31 = vadd.f32 -5.6925062e-05, %v2236_v11  ;;  %v2292_v9 = vadd.f32 -0.0073733293, %v2288_v19 }
 0xb07   :  { %v2225_v46 = vadd.f32 2.7706815e-08, %v2221_v34  ;;  %v2277_v32 = vadd.f32 -0.00021337405, %v2273_v6  ;;  %v1899_v58 = vadd.f32 1.0, %v1896_v22  ;;  %v2266_v28 = vmul.f32 %v5201_v42, %v2262_v30 }
 0xb08   :  { %v4151_v36 = vpop.eup %4150  ;;  %v2259_v40 = vmul.f32 %v2255_v54, %v5222_v10  ;;  %v2244_v41 = vmul.f32 %v2240_v31, %v5244_v44  ;;  %v2296_v43 = vmul.f32 %v2292_v9, %v5244_v44  ;;  %v1843_v10 = vmul.f32 0.5, %v5172_v57 }
 0xb09   :  { %v1898_v16 = vmul.f32 %v4151_v36, %v1878_v33  ;;  %v2229_v51 = vmul.f32 %v2225_v46, %v5272_v21  ;;  %v2281_v13 = vmul.f32 %v2277_v32, %v5272_v21  ;;  %v2198_v53 = vmul.f32 0.5, %v5188_v29 }
 0xb0a   :  { %v2248_v50 = vadd.f32 -0.00073499064, %v2244_v41  ;;  %v2263_v17 = vadd.f32 -0.016096033, %v2259_v40  ;;  %v2300_v25 = vadd.f32 -0.014264739, %v2296_v43  ;;  %v1901_v4 = vmul.f32 %v1899_v58, %v1843_v10 }
 0xb0b   :  { %v1900_v49 = vadd.f32 1.0, %v1898_v16  ;;  %v2233_v24 = vadd.f32 -2.101024e-06, %v2229_v51  ;;  %v2285_v1 = vadd.f32 -0.001682827, %v2281_v13  ;;  %v2199_v7 = vmul.f32 0.5, %v5195_v37 }
 0xb0c   :  { %v4153_v15 = vpop.eup %4152  ;;  %v2252_v42 = vmul.f32 %v2248_v50, %v5244_v44  ;;  %v2267_v55 = vmul.f32 %v5211_v47, %v2263_v17  ;;  %4156 = vrcp.f32 %v2300_v25  ;;  %v2200_v33 = vmul.f32 0.5, %v5205_v60  ;;  %v2435_v60 = vld [vmem:[#allocation3 + $0x8] sm:$0xff] }
 0xb0d   :  { %v1902_v56 = vmul.f32 %v1900_v49, %v1844_v5  ;;  %v2303_v52 = vmul.f32 %v4153_v15, %v2266_v28  ;;  %v2237_v2 = vmul.f32 %v2233_v24, %v5272_v21  ;;  %v2289_v12 = vmul.f32 %v2285_v1, %v5272_v21  ;;  %v4033_v40 = vld [vmem:[%s5979_s3 + $0x10] sm:$0xff] }
 0xb0e   :  { %v2256_v23 = vadd.f32 -0.0029546, %v2252_v42 }
 0xb0f   :  { %v2310_v61 = vadd.f32 1.0, %v2303_v52  ;;  %4083 = vmatpush3.msra.mxu1 %v1902_v56  ;;  %v2241_v14 = vadd.f32 -5.6925062e-05, %v2237_v2  ;;  %v2293_v48 = vadd.f32 -0.0073733293, %v2289_v12 }
 0xb10   :  { %4084 = vmatprep.subr.mxu1 %v4227_v8  ;;  %v2260_v27 = vmul.f32 %v2256_v23, %v5244_v44 }
 0xb11   :  { %v5290_v57 = vmul.f32 %v2310_v61, %v2198_v53  ;;  %4085 = vmatpush3.msra.mxu1 %v1901_v4  ;;  %v2245_v35 = vmul.f32 %v2241_v14, %v5272_v21  ;;  %v2297_v0 = vmul.f32 %v2293_v48, %v5272_v21 }
 0xb12   :  { %v4155_v29 = vpop.eup %4154  ;;  %v2264_v11 = vadd.f32 -0.016096033, %v2260_v27 }
 0xb13   :  { %v2305_v18 = vmul.f32 %v4155_v29, %v2267_v55  ;;  %2406 = vrot.lane.b32.xlu1 %v5290_v57, %s4231_s13  ;;  %v2249_v39 = vadd.f32 -0.00073499064, %v2245_v35  ;;  %v2301_v59 = vadd.f32 -0.014264739, %v2297_v0 }
 0xb14   :  { %v2268_v19 = vmul.f32 %v5238_v38, %v2264_v11 }
 0xb15   :  { %v2311_v26 = vadd.f32 1.0, %v2305_v18  ;;  %v2253_v63 = vmul.f32 %v2249_v39, %v5272_v21  ;;  %4158 = vrcp.f32 %v2301_v59 }
 0xb17   :  { %v5298_v47 = vmul.f32 %v2311_v26, %v2199_v7  ;;  %2392 = vrot.lane.b32.xlu1 %v5290_v57, %s4228_s11  ;;  %v2257_v20 = vadd.f32 -0.0029546, %v2253_v63 }
 0xb19   :  { %2408 = vrot.lane.b32.xlu0 %v5298_v47, %s4231_s13  ;;  %v2261_v37 = vmul.f32 %v2257_v20, %v5272_v21  ;;  %v4157_v44 = vpop.eup %4156  ;;  %v1903_v21 = vld [vmem:[%s5980_s4] sm:$0x1] }
 0xb1a   :  { %v2307_v22 = vmul.f32 %v4157_v44, %v2268_v19  ;;  %4087 = vmatmul.mubr.msk.f32.vlgmr.msra.gmra.mxu1 %vm152_vm15, %v1903_v21  ;;  %v2434_v21 = vld [vmem:[#allocation3] sm:$0xff] }
 0xb1b   :  { %2378 = vrot.lane.b32.xlu1 %v5290_v57, %s4226_s10  ;;  %v2265_v30 = vadd.f32 -0.016096033, %v2261_v37  ;;  %4035 = vmatprep.mubr.msk.f32.mxu1 %vm152_vm15, %v2435_v60 }
 0xb1c   :  { %v2312_v54 = vadd.f32 1.0, %v2307_v22 }
 0xb1d   :  { %2394 = vrot.lane.b32.xlu0 %v5298_v47, %s4228_s11  ;;  %v2269_v31 = vmul.f32 %v5264_v62, %v2265_v30  ;;  %v2201_v62 = vmul.f32 0.5, %v5247_v45  ;;  %v4034_v45 = vld [vmem:[%s5979_s3 + $0x18] sm:$0xff] }
 0xb1e   :  { %v5330_v34 = vmul.f32 %v2312_v54, %v2200_v33  ;;  %v2437_v54 = vld [vmem:[#allocation3 + $0x18] sm:$0xff] }
 0xb1f   :  { %2364 = vrot.lane.b32.xlu1 %v5290_v57, %s4225_s9 }
 0xb21   :  { %2380 = vrot.lane.b32.xlu0 %v5298_v47, %s4226_s10 }
 0xb22   :  { %v4159_v38 = vpop.eup %4158 }
 0xb23   :  { %2350 = vrot.lane.b32.xlu1 %v5290_v57, %s4224_s8  ;;  %v2309_v9 = vmul.f32 %v4159_v38, %v2269_v31 }
 0xb25   :  { %2366 = vrot.lane.b32.xlu0 %v5298_v47, %s4225_s9  ;;  %v2313_v6 = vadd.f32 1.0, %v2309_v9 }
 0xb27   :  { %2336 = vrot.lane.b32.xlu1 %v5290_v57, %s4222_s7  ;;  %v5339_v36 = vmul.f32 %v2313_v6, %v2201_v62 }
 0xb29   :  { %2352 = vrot.lane.b32.xlu0 %v5298_v47, %s4224_s8 }
 0xb2b   :  { %2410 = vrot.lane.b32.xlu1 %v5330_v34, %s4231_s13 }
 0xb2d   :  { %2338 = vrot.lane.b32.xlu0 %v5298_v47, %s4222_s7 }
 0xb2f   :  { %2396 = vrot.lane.b32.xlu1 %v5330_v34, %s4228_s11 }
 0xb31   :  { %2412 = vrot.lane.b32.xlu0 %v5339_v36, %s4231_s13 }
 0xb33   :  { %2382 = vrot.lane.b32.xlu1 %v5330_v34, %s4226_s10 }
 0xb35   :  { %2398 = vrot.lane.b32.xlu0 %v5339_v36, %s4228_s11 }
 0xb37   :  { %2368 = vrot.lane.b32.xlu1 %v5330_v34, %s4225_s9 }
 0xb39   :  { %2384 = vrot.lane.b32.xlu0 %v5339_v36, %s4226_s10 }
 0xb3b   :  { %2354 = vrot.lane.b32.xlu1 %v5330_v34, %s4224_s8 }
 0xb3d   :  { %2370 = vrot.lane.b32.xlu0 %v5339_v36, %s4225_s9 }
 0xb3f   :  { %2340 = vrot.lane.b32.xlu1 %v5330_v34, %s4222_s7 }
 0xb41   :  { %2356 = vrot.lane.b32.xlu0 %v5339_v36, %s4224_s8 }
 0xb43   :  { %2326 = vrot.lane.b32.xlu1 %v5330_v34, %s4223_s2 }
 0xb45   :  { %2342 = vrot.lane.b32.xlu0 %v5339_v36, %s4222_s7 }
 0xb47   :  { %2322 = vrot.lane.b32.xlu1 %v5290_v57, %s4223_s2 }
 0xb49   :  { %2328 = vrot.lane.b32.xlu0 %v5339_v36, %s4223_s2 }
 0xb4b   :  { %2424 = vrot.lane.b32.xlu1 %v5330_v34, %s4230_s12 }
 0xb4d   :  { %2324 = vrot.lane.b32.xlu0 %v5298_v47, %s4223_s2 }
 0xb4f   :  { %2420 = vrot.lane.b32.xlu1 %v5290_v57, %s4230_s12 }
 0xb51   :  { %2426 = vrot.lane.b32.xlu0 %v5339_v36, %s4230_s12 }
 0xb53   :  { %2447 = vperm.xlu1 %4111, %v4034_v45  }
 0xb55   :  { %2422 = vrot.lane.b32.xlu0 %v5298_v47, %s4230_s12 }
 0xb59   :  { %2442 = vperm.xlu0 %4110, %v4033_v40  }
 0xb85   :  { %v2407_v41 = vpop.permute.xlu1 %2406 }
 0xb89   :  { %v2393_v16 = vpop.permute.xlu1 %2392 }
 0xb8b   :  { %v2409_v43 = vpop.permute.xlu0 %2408 }
 0xb8c   :  { %v2414_v25 = vsel %vm103_vm13, %v2407_v41, %v2409_v43 }
 0xb8d   :  { %v2379_v46 = vpop.permute.xlu1 %2378 }
 0xb8f   :  { %v2395_v32 = vpop.permute.xlu0 %2394 }
 0xb90   :  { %v2400_v4 = vsel %vm95_vm11, %v2393_v16, %v2395_v32 }
 0xb91   :  { %v2365_v58 = vpop.permute.xlu1 %2364 }
 0xb93   :  { %v2381_v5 = vpop.permute.xlu0 %2380 }
 0xb94   :  { %v2386_v12 = vsel %vm87_vm7, %v2379_v46, %v2381_v5 }
 0xb95   :  { %v2351_v28 = vpop.permute.xlu1 %2350 }
 0xb97   :  { %v2367_v49 = vpop.permute.xlu0 %2366 }
 0xb98   :  { %v2372_v48 = vsel %vm79_vm6, %v2365_v58, %v2367_v49 }
 0xb99   :  { %v2337_v50 = vpop.permute.xlu1 %2336 }
 0xb9b   :  { %v2353_v51 = vpop.permute.xlu0 %2352 }
 0xb9c   :  { %v2358_v0 = vsel %vm71_vm3, %v2351_v28, %v2353_v51 }
 0xb9d   :  { %v2411_v13 = vpop.permute.xlu1 %2410 }
 0xb9f   :  { %v2339_v15 = vpop.permute.xlu0 %2338 }
 0xba0   :  { %v2344_v39 = vsel %vm63_vm2, %v2337_v50, %v2339_v15 }
 0xba1   :  { %v2397_v10 = vpop.permute.xlu1 %2396 }
 0xba3   :  { %v2413_v17 = vpop.permute.xlu0 %2412 }
 0xba4   :  { %2456 = vmatprep.subr.mxu1 %v2413_v17  ;;  %v2415_v56 = vsel %vm103_vm13, %v2411_v13, %v2413_v17 }
 0xba5   :  { %2457 = vmatpush1.msra.mxu1 %v2415_v56  ;;  %v2383_v52 = vpop.permute.xlu1 %2382 }
 0xba6   :  { %2458 = vmatprep.subr.mxu1 %v2409_v43 }
 0xba7   :  { %v2399_v24 = vpop.permute.xlu0 %2398  ;;  %2459 = vmatpush1.msra.mxu1 %v2414_v25 }
 0xba8   :  { %2460 = vmatprep.subr.mxu1 %v2399_v24  ;;  %v2401_v53 = vsel %vm95_vm11, %v2397_v10, %v2399_v24 }
 0xba9   :  { %2461 = vmatpush1.msra.mxu1 %v2401_v53  ;;  %v2369_v1 = vpop.permute.xlu1 %2368 }
 0xbaa   :  { %2462 = vmatprep.subr.mxu1 %v2395_v32 }
 0xbab   :  { %v2385_v61 = vpop.permute.xlu0 %2384  ;;  %2463 = vmatpush1.msra.mxu1 %v2400_v4 }
 0xbac   :  { %2464 = vmatprep.subr.mxu1 %v2385_v61  ;;  %v2387_v42 = vsel %vm87_vm7, %v2383_v52, %v2385_v61 }
 0xbad   :  { %2465 = vmatpush1.msra.mxu1 %v2387_v42  ;;  %v2355_v2 = vpop.permute.xlu1 %2354 }
 0xbae   :  { %2466 = vmatprep.subr.mxu1 %v2381_v5 }
 0xbaf   :  { %v2371_v55 = vpop.permute.xlu0 %2370  ;;  %2467 = vmatpush1.msra.mxu1 %v2386_v12 }
 0xbb0   :  { %2468 = vmatprep.subr.mxu1 %v2371_v55  ;;  %v2373_v14 = vsel %vm79_vm6, %v2369_v1, %v2371_v55 }
 0xbb1   :  { %2469 = vmatpush1.msra.mxu1 %v2373_v14  ;;  %v2341_v29 = vpop.permute.xlu1 %2340 }
 0xbb2   :  { %2470 = vmatprep.subr.mxu1 %v2367_v49 }
 0xbb3   :  { %v2357_v18 = vpop.permute.xlu0 %2356  ;;  %2471 = vmatpush1.msra.mxu1 %v2372_v48 }
 0xbb4   :  { %2472 = vmatprep.subr.mxu1 %v2357_v18  ;;  %v2359_v23 = vsel %vm71_vm3, %v2355_v2, %v2357_v18 }
 0xbb5   :  { %2473 = vmatpush1.msra.mxu1 %v2359_v23  ;;  %v2327_v35 = vpop.permute.xlu1 %2326 }
 0xbb6   :  { %2474 = vmatprep.subr.mxu1 %v2353_v51 }
 0xbb7   :  { %v2343_v7 = vpop.permute.xlu0 %2342  ;;  %2475 = vmatpush1.msra.mxu1 %v2358_v0 }
 0xbb8   :  { %2476 = vmatprep.subr.mxu1 %v2343_v7  ;;  %v2345_v26 = vsel %vm63_vm2, %v2341_v29, %v2343_v7 }
 0xbb9   :  { %2477 = vmatpush1.msra.mxu1 %v2345_v26  ;;  %v2323_v27 = vpop.permute.xlu1 %2322 }
 0xbba   :  { %2478 = vmatprep.subr.mxu1 %v2339_v15 }
 0xbbb   :  { %v2329_v59 = vpop.permute.xlu0 %2328  ;;  %2479 = vmatpush1.msra.mxu1 %v2344_v39 }
 0xbbc   :  { %2480 = vmatprep.subr.mxu1 %v2329_v59  ;;  %v2331_v63 = vsel %vm55_vm0, %v2327_v35, %v2329_v59 }
 0xbbd   :  { %2481 = vmatpush1.msra.mxu1 %v2331_v63  ;;  %v2425_v37 = vpop.permute.xlu1 %2424 }
 0xbbf   :  { %v2325_v20 = vpop.permute.xlu0 %2324 }
 0xbc0   :  { %2482 = vmatprep.subr.mxu1 %v2325_v20  ;;  %v2330_v11 = vsel %vm55_vm0, %v2323_v27, %v2325_v20 }
 0xbc1   :  { %2483 = vmatpush1.msra.mxu1 %v2330_v11  ;;  %v2421_v22 = vpop.permute.xlu1 %2420 }
 0xbc2   :  { %2484 = vmatprep.subr.mxu1 %v5339_v36 }
 0xbc3   :  { %v2427_v44 = vpop.permute.xlu0 %2426  ;;  %2485 = vmatpush1.msra.mxu1 %v5330_v34 }
 0xbc4   :  { %2486 = vmatprep.subr.mxu1 %v5298_v47  ;;  %v2429_v19 = vsel %vm111_vm8, %v2425_v37, %v2427_v44  ;;  %v2436_v47 = vld [vmem:[#allocation3 + $0x10] sm:$0xff] }
 0xbc5   :  { %2487 = vmatpush1.msra.mxu1 %v5290_v57 }
 0xbc6   :  { %2516 = vmatprep.subr.mxu1 %v2427_v44 }
 0xbc7   :  { %v2423_v30 = vpop.permute.xlu0 %2422  ;;  %2517 = vmatpush2.msra.mxu1 %v2429_v19 }
 0xbc8   :  { %2518 = vmatprep.subr.mxu1 %v2423_v30  ;;  %v2428_v38 = vsel %vm111_vm8, %v2421_v22, %v2423_v30 }
 0xbc9   :  { %2519 = vmatpush2.msra.mxu1 %v2428_v38 }
 0xbca   :  { %2521 = vmatmul.mubr.f32.vlgmr.msra.gmra.mxu1 %v2434_v21  ;;  %3098 = vmatprep.subr.mxu1 %v4227_v8 }
 0xbcb   :  { %4036 = vmatprep.mubr.msk.f32.mxu1 %vm152_vm15, %v2437_v54 }
 0xbce   :  { %2527 = vmatmul.mubr.f32.gmra.mxu1 %v2436_v47  ;;  %v2448_v60 = vpop.permute.xlu1 %2447 }
 0xbd4   :  { %v2443_v33 = vpop.permute.xlu0 %2442 }
 0xbda   :  { %v5408_v57 = vpop.f32.mrf.mxu1 }
 0xbdc   :  { %v4088_v31 = vpop.f32.mrf.mxu1 }
 0xc8a   :  { %v2522_v9 = vpop.f32.mrf.mxu1 }
 0xc8b   :  { %v5410_v34 = vadd.f32 %v2522_v9, %v2443_v33 }
 0xc8c   :  { %v2524_v6 = vpop.f32.mrf.mxu1 }
 0xc8d   :  { %v2537_v62 = vmul.f32 0.70710677, %v5410_v34  ;;  %v5413_v36 = vadd.f32 %v2524_v6, %v2443_v33 }
 0xc8e   :  { %v2528_v45 = vpop.f32.mrf.mxu1 }
 0xc8f   :  { %v5415_v40 = vclamps-f32 %v2537_v62, 4.0  ;;  %v2538_v41 = vmul.f32 0.70710677, %v5413_v36  ;;  %v5418_v16 = vadd.f32 %v2528_v45, %v2448_v60 }
 0xc90   :  { %v2530_v43 = vpop.f32.mrf.mxu1 }
 0xc91   :  { %v5422_v46 = vmul.f32 %v5415_v40, %v5415_v40  ;;  %v5424_v32 = vclamps-f32 %v2538_v41, 4.0  ;;  %v2539_v58 = vmul.f32 0.70710677, %v5418_v16  ;;  %v5427_v5 = vadd.f32 %v2530_v43, %v2448_v60 }
 0xc93   :  { %v2553_v28 = vmul.f32 -2.7261424e-10, %v5422_v46  ;;  %v2605_v49 = vmul.f32 -1.45660715e-05, %v5422_v46  ;;  %v5433_v50 = vmul.f32 %v5424_v32, %v5424_v32  ;;  %v5435_v51 = vclamps-f32 %v2539_v58, 4.0 }
 0xc94   :  { %v2540_v13 = vmul.f32 0.70710677, %v5427_v5 }
 0xc95   :  { %v2557_v15 = vadd.f32 2.7706815e-08, %v2553_v28  ;;  %v2609_v10 = vadd.f32 -0.00021337405, %v2605_v49  ;;  %v2554_v17 = vmul.f32 -2.7261424e-10, %v5433_v50  ;;  %v5441_v56 = vmul.f32 %v5435_v51, %v5435_v51 }
 0xc96   :  { %v2606_v52 = vmul.f32 -1.45660715e-05, %v5433_v50  ;;  %v5444_v25 = vclamps-f32 %v2540_v13, 4.0 }
 0xc97   :  { %v2561_v24 = vmul.f32 %v2557_v15, %v5422_v46  ;;  %v2613_v53 = vmul.f32 %v2609_v10, %v5422_v46  ;;  %v2558_v1 = vadd.f32 2.7706815e-08, %v2554_v17  ;;  %v2555_v4 = vmul.f32 -2.7261424e-10, %v5441_v56 }
 0xc98   :  { %v2610_v61 = vadd.f32 -0.00021337405, %v2606_v52  ;;  %v2607_v42 = vmul.f32 -1.45660715e-05, %v5441_v56  ;;  %v5452_v2 = vmul.f32 %v5444_v25, %v5444_v25 }
 0xc99   :  { %v2565_v12 = vadd.f32 -2.101024e-06, %v2561_v24  ;;  %v2617_v55 = vadd.f32 -0.001682827, %v2613_v53  ;;  %v2562_v14 = vmul.f32 %v2558_v1, %v5433_v50  ;;  %v2559_v29 = vadd.f32 2.7706815e-08, %v2555_v4 }
 0xc9a   :  { %v2614_v48 = vmul.f32 %v2610_v61, %v5433_v50  ;;  %v2611_v18 = vadd.f32 -0.00021337405, %v2607_v42  ;;  %v2556_v23 = vmul.f32 -2.7261424e-10, %v5452_v2  ;;  %v2608_v35 = vmul.f32 -1.45660715e-05, %v5452_v2 }
 0xc9b   :  { %v2569_v0 = vmul.f32 %v2565_v12, %v5422_v46  ;;  %v2621_v7 = vmul.f32 %v2617_v55, %v5422_v46  ;;  %v2566_v26 = vadd.f32 -2.101024e-06, %v2562_v14  ;;  %v2563_v39 = vmul.f32 %v2559_v29, %v5441_v56 }
 0xc9c   :  { %v2618_v59 = vadd.f32 -0.001682827, %v2614_v48  ;;  %v2560_v27 = vadd.f32 2.7706815e-08, %v2556_v23  ;;  %v2612_v63 = vadd.f32 -0.00021337405, %v2608_v35  ;;  %v2615_v44 = vmul.f32 %v2611_v18, %v5441_v56 }
 0xc9d   :  { %v2573_v20 = vadd.f32 -5.6925062e-05, %v2569_v0  ;;  %v2625_v11 = vadd.f32 -0.0073733293, %v2621_v7  ;;  %v2570_v37 = vmul.f32 %v2566_v26, %v5433_v50  ;;  %v2567_v54 = vadd.f32 -2.101024e-06, %v2563_v39 }
 0xc9e   :  { %v2622_v19 = vmul.f32 %v2618_v59, %v5433_v50  ;;  %v2564_v22 = vmul.f32 %v2560_v27, %v5452_v2  ;;  %v2616_v31 = vmul.f32 %v2612_v63, %v5452_v2  ;;  %v2619_v62 = vadd.f32 -0.001682827, %v2615_v44 }
 0xc9f   :  { %v2577_v30 = vmul.f32 %v2573_v20, %v5422_v46  ;;  %v2629_v21 = vmul.f32 %v2625_v11, %v5422_v46  ;;  %v2574_v38 = vadd.f32 -5.6925062e-05, %v2570_v37  ;;  %v2571_v58 = vmul.f32 %v2567_v54, %v5441_v56 }
 0xca0   :  { %v2626_v47 = vadd.f32 -0.0073733293, %v2622_v19  ;;  %v2568_v45 = vadd.f32 -2.101024e-06, %v2564_v22  ;;  %v2620_v49 = vadd.f32 -0.001682827, %v2616_v31  ;;  %v2623_v10 = vmul.f32 %v2619_v62, %v5441_v56 }
 0xca1   :  { %v2581_v33 = vadd.f32 -0.00073499064, %v2577_v30  ;;  %v2633_v9 = vadd.f32 -0.014264739, %v2629_v21  ;;  %v2578_v6 = vmul.f32 %v2574_v38, %v5433_v50  ;;  %v2575_v53 = vadd.f32 -5.6925062e-05, %v2571_v58 }
 0xca2   :  { %v2630_v60 = vmul.f32 %v2626_v47, %v5433_v50  ;;  %v2572_v17 = vmul.f32 %v2568_v45, %v5452_v2  ;;  %v2624_v1 = vmul.f32 %v2620_v49, %v5452_v2  ;;  %v2627_v4 = vadd.f32 -0.0073733293, %v2623_v10 }
 0xca3   :  { %v2585_v41 = vmul.f32 %v2581_v33, %v5422_v46  ;;  %4160 = vrcp.f32 %v2633_v9  ;;  %v2582_v43 = vadd.f32 -0.00073499064, %v2578_v6  ;;  %v2579_v55 = vmul.f32 %v2575_v53, %v5441_v56 }
 0xca4   :  { %v2634_v28 = vadd.f32 -0.014264739, %v2630_v60  ;;  %v2576_v42 = vadd.f32 -5.6925062e-05, %v2572_v17  ;;  %v2628_v14 = vadd.f32 -0.0073733293, %v2624_v1  ;;  %v2631_v29 = vmul.f32 %v2627_v4, %v5441_v56 }
 0xca5   :  { %v2589_v13 = vadd.f32 -0.0029546, %v2585_v41  ;;  %v2586_v15 = vmul.f32 %v2582_v43, %v5433_v50  ;;  %v2533_v27 = vmul.f32 0.5, %v5410_v34  ;;  %v4041_v41 = vld [vmem:[%s5979_s3 + $0x20] sm:$0xff] }
 0xca6   :  { %4162 = vrcp.f32 %v2634_v28  ;;  %v2580_v18 = vmul.f32 %v2576_v42, %v5452_v2  ;;  %v2632_v0 = vmul.f32 %v2628_v14, %v5452_v2  ;;  %v2635_v26 = vadd.f32 -0.014264739, %v2631_v29 }
 0xca7   :  { %v2593_v52 = vmul.f32 %v2589_v13, %v5422_v46  ;;  %v2590_v24 = vadd.f32 -0.0029546, %v2586_v15  ;;  %v2583_v46 = vadd.f32 -0.00073499064, %v2579_v55 }
 0xca8   :  { %v2584_v39 = vadd.f32 -0.00073499064, %v2580_v18  ;;  %v2636_v37 = vadd.f32 -0.014264739, %v2632_v0  ;;  %4164 = vrcp.f32 %v2635_v26 }
 0xca9   :  { %v2594_v61 = vmul.f32 %v2590_v24, %v5433_v50  ;;  %v2597_v12 = vadd.f32 -0.016096033, %v2593_v52  ;;  %v2587_v20 = vmul.f32 %v2583_v46, %v5441_v56 }
 0xcaa   :  { %v2588_v22 = vmul.f32 %v2584_v39, %v5452_v2  ;;  %4166 = vrcp.f32 %v2636_v37 }
 0xcab   :  { %v2598_v48 = vadd.f32 -0.016096033, %v2594_v61  ;;  %v2601_v23 = vmul.f32 %v5415_v40, %v2597_v12  ;;  %v2534_v40 = vmul.f32 0.5, %v5413_v36  ;;  %v2591_v30 = vadd.f32 -0.0029546, %v2587_v20 }
 0xcac   :  { %v2592_v34 = vadd.f32 -0.0029546, %v2588_v22 }
 0xcad   :  { %v2602_v50 = vmul.f32 %v5424_v32, %v2598_v48  ;;  %v2595_v21 = vmul.f32 %v2591_v30, %v5441_v56 }
 0xcae   :  { %v2596_v36 = vmul.f32 %v2592_v34, %v5452_v2 }
 0xcaf   :  { %v2599_v38 = vadd.f32 -0.016096033, %v2595_v21 }
 0xcb0   :  { %v4161_v35 = vpop.eup %4160  ;;  %v2600_v47 = vadd.f32 -0.016096033, %v2596_v36 }
 0xcb1   :  { %v2638_v7 = vmul.f32 %v4161_v35, %v2601_v23  ;;  %v2603_v31 = vmul.f32 %v5435_v51, %v2599_v38  ;;  %v2535_v51 = vmul.f32 0.5, %v5418_v16  ;;  %v2770_v16 = vld [vmem:[#allocation3 + $0x28] sm:$0xff] }
 0xcb2   :  { %v2604_v2 = vmul.f32 %v5444_v25, %v2600_v47  ;;  %v2536_v25 = vmul.f32 0.5, %v5427_v5  ;;  %4043 = vmatprep.mubr.msk.f32.mxu0 %vm152_vm15, %v2770_v16  ;;  %v4042_v5 = vld [vmem:[%s5979_s3 + $0x28] sm:$0xff] }
 0xcb3   :  { %v4163_v59 = vpop.eup %4162  ;;  %v2645_v63 = vadd.f32 1.0, %v2638_v7 }
 0xcb4   :  { %v2640_v11 = vmul.f32 %v4163_v59, %v2602_v50 }
 0xcb5   :  { %v5486_v44 = vmul.f32 %v2645_v63, %v2533_v27  ;;  %v4165_v54 = vpop.eup %4164 }
 0xcb6   :  { %v2646_v19 = vadd.f32 1.0, %v2640_v11  ;;  %v2642_v33 = vmul.f32 %v4165_v54, %v2603_v31 }
 0xcb7   :  { %2741 = vrot.lane.b32.xlu1 %v5486_v44, %s4231_s13  ;;  %v4167_v56 = vpop.eup %4166 }
 0xcb8   :  { %v5492_v32 = vmul.f32 %v2646_v19, %v2534_v40  ;;  %v2644_v9 = vmul.f32 %v4167_v56, %v2604_v2  ;;  %v2647_v6 = vadd.f32 1.0, %v2642_v33  ;;  %v2769_v33 = vld [vmem:[#allocation3 + $0x20] sm:$0xff] }
 0xcba   :  { %2743 = vrot.lane.b32.xlu0 %v5492_v32, %s4231_s13  ;;  %v2648_v62 = vadd.f32 1.0, %v2644_v9  ;;  %v5519_v60 = vmul.f32 %v2647_v6, %v2535_v51  ;;  %v2772_v9 = vld [vmem:[#allocation3 + $0x38] sm:$0xff] }
 0xcbb   :  { %2727 = vrot.lane.b32.xlu1 %v5486_v44, %s4228_s11 }
 0xcbc   :  { %v5526_v45 = vmul.f32 %v2648_v62, %v2536_v25 }
 0xcbe   :  { %2729 = vrot.lane.b32.xlu0 %v5492_v32, %s4228_s11 }
 0xcbf   :  { %2713 = vrot.lane.b32.xlu1 %v5486_v44, %s4226_s10 }
 0xcc2   :  { %2715 = vrot.lane.b32.xlu0 %v5492_v32, %s4226_s10 }
 0xcc3   :  { %2699 = vrot.lane.b32.xlu1 %v5486_v44, %s4225_s9 }
 0xcc6   :  { %2701 = vrot.lane.b32.xlu0 %v5492_v32, %s4225_s9 }
 0xcc7   :  { %2685 = vrot.lane.b32.xlu1 %v5486_v44, %s4224_s8 }
 0xcca   :  { %2687 = vrot.lane.b32.xlu0 %v5492_v32, %s4224_s8 }
 0xccb   :  { %2671 = vrot.lane.b32.xlu1 %v5486_v44, %s4222_s7 }
 0xcce   :  { %2673 = vrot.lane.b32.xlu0 %v5492_v32, %s4222_s7 }
 0xccf   :  { %2745 = vrot.lane.b32.xlu1 %v5519_v60, %s4231_s13 }
 0xcd2   :  { %2747 = vrot.lane.b32.xlu0 %v5526_v45, %s4231_s13 }
 0xcd3   :  { %2731 = vrot.lane.b32.xlu1 %v5519_v60, %s4228_s11 }
 0xcd6   :  { %2733 = vrot.lane.b32.xlu0 %v5526_v45, %s4228_s11 }
 0xcd7   :  { %2717 = vrot.lane.b32.xlu1 %v5519_v60, %s4226_s10 }
 0xcda   :  { %2719 = vrot.lane.b32.xlu0 %v5526_v45, %s4226_s10 }
 0xcdb   :  { %2703 = vrot.lane.b32.xlu1 %v5519_v60, %s4225_s9 }
 0xcde   :  { %2705 = vrot.lane.b32.xlu0 %v5526_v45, %s4225_s9 }
 0xcdf   :  { %2689 = vrot.lane.b32.xlu1 %v5519_v60, %s4224_s8 }
 0xce2   :  { %2691 = vrot.lane.b32.xlu0 %v5526_v45, %s4224_s8 }
 0xce3   :  { %2675 = vrot.lane.b32.xlu1 %v5519_v60, %s4222_s7 }
 0xce6   :  { %2677 = vrot.lane.b32.xlu0 %v5526_v45, %s4222_s7 }
 0xce7   :  { %2661 = vrot.lane.b32.xlu1 %v5519_v60, %s4223_s2 }
 0xcea   :  { %2663 = vrot.lane.b32.xlu0 %v5526_v45, %s4223_s2 }
 0xceb   :  { %2657 = vrot.lane.b32.xlu1 %v5486_v44, %s4223_s2 }
 0xcee   :  { %2659 = vrot.lane.b32.xlu0 %v5492_v32, %s4223_s2 }
 0xcef   :  { %2759 = vrot.lane.b32.xlu1 %v5519_v60, %s4230_s12 }
 0xcf2   :  { %2761 = vrot.lane.b32.xlu0 %v5526_v45, %s4230_s12 }
 0xcf3   :  { %2755 = vrot.lane.b32.xlu1 %v5486_v44, %s4230_s12 }
 0xcf6   :  { %2757 = vrot.lane.b32.xlu0 %v5492_v32, %s4230_s12 }
 0xcf7   :  { %2782 = vperm.xlu1 %4111, %v4042_v5  }
 0xcfa   :  { %2777 = vperm.xlu0 %4110, %v4041_v41  }
 0xd29   :  { %v2742_v43 = vpop.permute.xlu1 %2741 }
 0xd2c   :  { %v2744_v58 = vpop.permute.xlu0 %2743 }
 0xd2d   :  { %v2728_v28 = vpop.permute.xlu1 %2727  ;;  %v2749_v55 = vsel %vm103_vm13, %v2742_v43, %v2744_v58 }
 0xd30   :  { %v2730_v49 = vpop.permute.xlu0 %2729 }
 0xd31   :  { %v2714_v13 = vpop.permute.xlu1 %2713  ;;  %v2735_v18 = vsel %vm95_vm11, %v2728_v28, %v2730_v49 }
 0xd34   :  { %v2716_v15 = vpop.permute.xlu0 %2715 }
 0xd35   :  { %v2700_v10 = vpop.permute.xlu1 %2699  ;;  %v2721_v0 = vsel %vm87_vm7, %v2714_v13, %v2716_v15 }
 0xd38   :  { %v2702_v17 = vpop.permute.xlu0 %2701 }
 0xd39   :  { %v2686_v52 = vpop.permute.xlu1 %2685  ;;  %v2707_v39 = vsel %vm79_vm6, %v2700_v10, %v2702_v17 }
 0xd3c   :  { %v2688_v24 = vpop.permute.xlu0 %2687 }
 0xd3d   :  { %v2672_v53 = vpop.permute.xlu1 %2671  ;;  %v2693_v20 = vsel %vm71_vm3, %v2686_v52, %v2688_v24 }
 0xd40   :  { %v2674_v1 = vpop.permute.xlu0 %2673 }
 0xd41   :  { %v2746_v4 = vpop.permute.xlu1 %2745  ;;  %v2679_v19 = vsel %vm63_vm2, %v2672_v53, %v2674_v1 }
 0xd44   :  { %v2748_v61 = vpop.permute.xlu0 %2747 }
 0xd45   :  { %2791 = vmatprep.subr.mxu0 %v2748_v61  ;;  %v2750_v42 = vsel %vm103_vm13, %v2746_v4, %v2748_v61  ;;  %v2732_v12 = vpop.permute.xlu1 %2731 }
 0xd46   :  { %2792 = vmatpush1.msra.mxu0 %v2750_v42 }
 0xd47   :  { %2793 = vmatprep.subr.mxu0 %v2744_v58 }
 0xd48   :  { %v2734_v14 = vpop.permute.xlu0 %2733  ;;  %2794 = vmatpush1.msra.mxu0 %v2749_v55 }
 0xd49   :  { %2795 = vmatprep.subr.mxu0 %v2734_v14  ;;  %v2736_v29 = vsel %vm95_vm11, %v2732_v12, %v2734_v14  ;;  %v2718_v48 = vpop.permute.xlu1 %2717 }
 0xd4a   :  { %2796 = vmatpush1.msra.mxu0 %v2736_v29 }
 0xd4b   :  { %2797 = vmatprep.subr.mxu0 %v2730_v49 }
 0xd4c   :  { %v2720_v23 = vpop.permute.xlu0 %2719  ;;  %2798 = vmatpush1.msra.mxu0 %v2735_v18 }
 0xd4d   :  { %2799 = vmatprep.subr.mxu0 %v2720_v23  ;;  %v2722_v46 = vsel %vm87_vm7, %v2718_v48, %v2720_v23  ;;  %v2704_v35 = vpop.permute.xlu1 %2703 }
 0xd4e   :  { %2800 = vmatpush1.msra.mxu0 %v2722_v46 }
 0xd4f   :  { %2801 = vmatprep.subr.mxu0 %v2716_v15 }
 0xd50   :  { %v2706_v7 = vpop.permute.xlu0 %2705  ;;  %2802 = vmatpush1.msra.mxu0 %v2721_v0 }
 0xd51   :  { %2803 = vmatprep.subr.mxu0 %v2706_v7  ;;  %v2708_v26 = vsel %vm79_vm6, %v2704_v35, %v2706_v7  ;;  %v2690_v50 = vpop.permute.xlu1 %2689 }
 0xd52   :  { %2804 = vmatpush1.msra.mxu0 %v2708_v26 }
 0xd53   :  { %2805 = vmatprep.subr.mxu0 %v2702_v17 }
 0xd54   :  { %v2692_v59 = vpop.permute.xlu0 %2691  ;;  %2806 = vmatpush1.msra.mxu0 %v2707_v39 }
 0xd55   :  { %2807 = vmatprep.subr.mxu0 %v2692_v59  ;;  %v2694_v27 = vsel %vm71_vm3, %v2690_v50, %v2692_v59  ;;  %v2676_v63 = vpop.permute.xlu1 %2675 }
 0xd56   :  { %2808 = vmatpush1.msra.mxu0 %v2694_v27 }
 0xd57   :  { %2809 = vmatprep.subr.mxu0 %v2688_v24 }
 0xd58   :  { %v2678_v11 = vpop.permute.xlu0 %2677  ;;  %2810 = vmatpush1.msra.mxu0 %v2693_v20 }
 0xd59   :  { %v2680_v37 = vsel %vm63_vm2, %v2676_v63, %v2678_v11  ;;  %2811 = vmatprep.subr.mxu0 %v2678_v11  ;;  %v2662_v40 = vpop.permute.xlu1 %2661 }
 0xd5a   :  { %2812 = vmatpush1.msra.mxu0 %v2680_v37 }
 0xd5b   :  { %2813 = vmatprep.subr.mxu0 %v2674_v1 }
 0xd5c   :  { %v2664_v22 = vpop.permute.xlu0 %2663  ;;  %2814 = vmatpush1.msra.mxu0 %v2679_v19 }
 0xd5d   :  { %v2666_v30 = vsel %vm55_vm0, %v2662_v40, %v2664_v22  ;;  %2815 = vmatprep.subr.mxu0 %v2664_v22  ;;  %v2658_v34 = vpop.permute.xlu1 %2657 }
 0xd5e   :  { %2816 = vmatpush1.msra.mxu0 %v2666_v30 }
 0xd60   :  { %v2660_v21 = vpop.permute.xlu0 %2659 }
 0xd61   :  { %v2665_v36 = vsel %vm55_vm0, %v2658_v34, %v2660_v21  ;;  %2817 = vmatprep.subr.mxu0 %v2660_v21  ;;  %v2760_v38 = vpop.permute.xlu1 %2759  ;;  %vm2017_vm0 = vcmask 139264  }
 0xd62   :  { %2818 = vmatpush1.msra.mxu0 %v2665_v36 }
 0xd63   :  { %2819 = vmatprep.subr.mxu0 %v5526_v45 }
 0xd64   :  { %v2762_v54 = vpop.permute.xlu0 %2761  ;;  %2820 = vmatpush1.msra.mxu0 %v5519_v60 }
 0xd65   :  { %2821 = vmatprep.subr.mxu0 %v5492_v32  ;;  %v2764_v47 = vsel %vm111_vm8, %v2760_v38, %v2762_v54  ;;  %v2756_v31 = vpop.permute.xlu1 %2755  ;;  %v2771_v32 = vld [vmem:[#allocation3 + $0x30] sm:$0xff] }
 0xd66   :  { %2822 = vmatpush1.msra.mxu0 %v5486_v44 }
 0xd67   :  { %2851 = vmatprep.subr.mxu0 %v2762_v54 }
 0xd68   :  { %v2758_v56 = vpop.permute.xlu0 %2757  ;;  %2852 = vmatpush2.msra.mxu0 %v2764_v47 }
 0xd69   :  { %v2763_v2 = vsel %vm111_vm8, %v2756_v31, %v2758_v56  ;;  %2853 = vmatprep.subr.mxu0 %v2758_v56 }
 0xd6a   :  { %2854 = vmatpush2.msra.mxu0 %v2763_v2 }
 0xd6b   :  { %2856 = vmatmul.mubr.f32.vlgmr.msra.gmra.mxu0 %v2769_v33  ;;  %3305 = vmatprep.subr.mxu0 %v4227_v8 }
 0xd6c   :  { %4044 = vmatprep.mubr.msk.f32.mxu0 %vm152_vm15, %v2772_v9 }
 0xd6f   :  { %2862 = vmatmul.mubr.f32.gmra.mxu0 %v2771_v32 }
 0xd72   :  { %v2783_v45 = vpop.permute.xlu1 %2782 }
 0xd75   :  { %v2778_v44 = vpop.permute.xlu0 %2777 }
 0xe2b   :  { %v2857_v6 = vpop.f32.mrf.mxu0 }
 0xe2c   :  { %v5595_v51 = vadd.f32 %v2857_v6, %v2778_v44 }
 0xe2d   :  { %v2859_v62 = vpop.f32.mrf.mxu0 }
 0xe2e   :  { %v2872_v60 = vmul.f32 0.70710677, %v5595_v51  ;;  %v5598_v25 = vadd.f32 %v2859_v62, %v2778_v44 }
 0xe2f   :  { %v2863_v16 = vpop.f32.mrf.mxu0 }
 0xe30   :  { %v5600_v5 = vclamps-f32 %v2872_v60, 4.0  ;;  %v2873_v41 = vmul.f32 0.70710677, %v5598_v25  ;;  %v5603_v43 = vadd.f32 %v2863_v16, %v2783_v45 }
 0xe31   :  { %v2865_v58 = vpop.f32.mrf.mxu0 }
 0xe32   :  { %v5607_v28 = vmul.f32 %v5600_v5, %v5600_v5  ;;  %v5609_v49 = vclamps-f32 %v2873_v41, 4.0  ;;  %v2874_v13 = vmul.f32 0.70710677, %v5603_v43  ;;  %v5612_v15 = vadd.f32 %v2865_v58, %v2783_v45 }
 0xe34   :  { %v2888_v10 = vmul.f32 -2.7261424e-10, %v5607_v28  ;;  %v2940_v17 = vmul.f32 -1.45660715e-05, %v5607_v28  ;;  %v5618_v52 = vmul.f32 %v5609_v49, %v5609_v49  ;;  %v5620_v24 = vclamps-f32 %v2874_v13, 4.0 }
 0xe35   :  { %v2875_v53 = vmul.f32 0.70710677, %v5612_v15 }
 0xe36   :  { %v2892_v1 = vadd.f32 2.7706815e-08, %v2888_v10  ;;  %v2944_v4 = vadd.f32 -0.00021337405, %v2940_v17  ;;  %v2889_v61 = vmul.f32 -2.7261424e-10, %v5618_v52  ;;  %v5626_v42 = vmul.f32 %v5620_v24, %v5620_v24 }
 0xe37   :  { %v2941_v12 = vmul.f32 -1.45660715e-05, %v5618_v52  ;;  %v5629_v55 = vclamps-f32 %v2875_v53, 4.0 }
 0xe38   :  { %v2896_v14 = vmul.f32 %v2892_v1, %v5607_v28  ;;  %v2948_v29 = vmul.f32 %v2944_v4, %v5607_v28  ;;  %v2893_v48 = vadd.f32 2.7706815e-08, %v2889_v61  ;;  %v2890_v18 = vmul.f32 -2.7261424e-10, %v5626_v42 }
 0xe39   :  { %v2945_v23 = vadd.f32 -0.00021337405, %v2941_v12  ;;  %v2942_v46 = vmul.f32 -1.45660715e-05, %v5626_v42  ;;  %v5637_v35 = vmul.f32 %v5629_v55, %v5629_v55 }
 0xe3a   :  { %v2900_v0 = vadd.f32 -2.101024e-06, %v2896_v14  ;;  %v2952_v7 = vadd.f32 -0.001682827, %v2948_v29  ;;  %v2897_v26 = vmul.f32 %v2893_v48, %v5618_v52  ;;  %v2894_v50 = vadd.f32 2.7706815e-08, %v2890_v18 }
 0xe3b   :  { %v2949_v39 = vmul.f32 %v2945_v23, %v5618_v52  ;;  %v2946_v59 = vadd.f32 -0.00021337405, %v2942_v46  ;;  %v2891_v27 = vmul.f32 -2.7261424e-10, %v5637_v35  ;;  %v2943_v63 = vmul.f32 -1.45660715e-05, %v5637_v35 }
 0xe3c   :  { %v2904_v20 = vmul.f32 %v2900_v0, %v5607_v28  ;;  %v2956_v11 = vmul.f32 %v2952_v7, %v5607_v28  ;;  %v2901_v37 = vadd.f32 -2.101024e-06, %v2897_v26  ;;  %v2898_v40 = vmul.f32 %v2894_v50, %v5626_v42 }
 0xe3d   :  { %v2953_v19 = vadd.f32 -0.001682827, %v2949_v39  ;;  %v2950_v22 = vmul.f32 %v2946_v59, %v5626_v42  ;;  %v2895_v30 = vadd.f32 2.7706815e-08, %v2891_v27  ;;  %v2947_v34 = vadd.f32 -0.00021337405, %v2943_v63 }
 0xe3e   :  { %v2908_v21 = vadd.f32 -5.6925062e-05, %v2904_v20  ;;  %v2960_v36 = vadd.f32 -0.0073733293, %v2956_v11  ;;  %v2905_v38 = vmul.f32 %v2901_v37, %v5618_v52  ;;  %v2902_v54 = vadd.f32 -2.101024e-06, %v2898_v40 }
 0xe3f   :  { %v2957_v47 = vmul.f32 %v2953_v19, %v5618_v52  ;;  %v2954_v31 = vadd.f32 -0.001682827, %v2950_v22  ;;  %v2899_v56 = vmul.f32 %v2895_v30, %v5637_v35  ;;  %v2951_v33 = vmul.f32 %v2947_v34, %v5637_v35 }
 0xe40   :  { %v2912_v2 = vmul.f32 %v2908_v21, %v5607_v28  ;;  %v2964_v9 = vmul.f32 %v2960_v36, %v5607_v28  ;;  %v2909_v32 = vadd.f32 -5.6925062e-05, %v2905_v38  ;;  %v2906_v44 = vmul.f32 %v2902_v54, %v5626_v42 }
 0xe41   :  { %v2961_v6 = vadd.f32 -0.0073733293, %v2957_v47  ;;  %v2958_v62 = vmul.f32 %v2954_v31, %v5626_v42  ;;  %v2903_v60 = vadd.f32 -2.101024e-06, %v2899_v56  ;;  %v2955_v45 = vadd.f32 -0.001682827, %v2951_v33 }
 0xe42   :  { %v2916_v16 = vadd.f32 -0.00073499064, %v2912_v2  ;;  %v2968_v41 = vadd.f32 -0.014264739, %v2964_v9  ;;  %v2913_v58 = vmul.f32 %v2909_v32, %v5618_v52  ;;  %v2910_v13 = vadd.f32 -5.6925062e-05, %v2906_v44 }
 0xe43   :  { %v2965_v10 = vmul.f32 %v2961_v6, %v5618_v52  ;;  %v2962_v17 = vadd.f32 -0.0073733293, %v2958_v62  ;;  %v2907_v53 = vmul.f32 %v2903_v60, %v5637_v35  ;;  %v2959_v1 = vmul.f32 %v2955_v45, %v5637_v35 }
 0xe44   :  { %v2920_v4 = vmul.f32 %v2916_v16, %v5607_v28  ;;  %4168 = vrcp.f32 %v2968_v41  ;;  %v2917_v61 = vadd.f32 -0.00073499064, %v2913_v58  ;;  %v2914_v12 = vmul.f32 %v2910_v13, %v5626_v42  ;;  %v4049_v41 = vld [vmem:[%s5979_s3 + $0x30] sm:$0xff] }
 0xe45   :  { %v2969_v14 = vadd.f32 -0.014264739, %v2965_v10  ;;  %v2911_v29 = vadd.f32 -5.6925062e-05, %v2907_v53  ;;  %v2963_v48 = vadd.f32 -0.0073733293, %v2959_v1  ;;  %v2966_v46 = vmul.f32 %v2962_v17, %v5626_v42 }
 0xe46   :  { %v2924_v18 = vadd.f32 -0.0029546, %v2920_v4  ;;  %v2921_v23 = vmul.f32 %v2917_v61, %v5618_v52  ;;  %v2918_v50 = vadd.f32 -0.00073499064, %v2914_v12  ;;  %v2869_v33 = vmul.f32 0.5, %v5598_v25 }
 0xe47   :  { %4170 = vrcp.f32 %v2969_v14  ;;  %v2915_v0 = vmul.f32 %v2911_v29, %v5637_v35  ;;  %v2967_v39 = vmul.f32 %v2963_v48, %v5637_v35  ;;  %v2970_v59 = vadd.f32 -0.014264739, %v2966_v46 }
 0xe48   :  { %v2928_v7 = vmul.f32 %v2924_v18, %v5607_v28  ;;  %v2925_v26 = vadd.f32 -0.0029546, %v2921_v23  ;;  %v2922_v11 = vmul.f32 %v2918_v50, %v5626_v42  ;;  %v2870_v60 = vmul.f32 0.5, %v5603_v43  ;;  %v3077_v43 = vld [vmem:[#allocation3 + $0x48] sm:$0xff] }
 0xe49   :  { %v2919_v63 = vadd.f32 -0.00073499064, %v2915_v0  ;;  %v2971_v37 = vadd.f32 -0.014264739, %v2967_v39  ;;  %4172 = vrcp.f32 %v2970_v59  ;;  %v2871_v16 = vmul.f32 0.5, %v5612_v15  ;;  %4051 = vmatprep.mubr.msk.f32.mxu1 %vm152_vm15, %v3077_v43  ;;  %v4050_v15 = vld [vmem:[%s5979_s3 + $0x38] sm:$0xff] }
 0xe4a   :  { %v2929_v27 = vmul.f32 %v2925_v26, %v5618_v52  ;;  %v2932_v20 = vadd.f32 -0.016096033, %v2928_v7  ;;  %v2926_v30 = vadd.f32 -0.0029546, %v2922_v11  ;;  %v2868_v52 = vmul.f32 0.5, %v5595_v51 }
 0xe4b   :  { %v2923_v19 = vmul.f32 %v2919_v63, %v5637_v35  ;;  %4174 = vrcp.f32 %v2971_v37 }
 0xe4c   :  { %v2933_v40 = vadd.f32 -0.016096033, %v2929_v27  ;;  %v2936_v22 = vmul.f32 %v5600_v5, %v2932_v20  ;;  %v2930_v47 = vmul.f32 %v2926_v30, %v5626_v42 }
 0xe4d   :  { %v2927_v36 = vadd.f32 -0.0029546, %v2923_v19 }
 0xe4e   :  { %v2937_v21 = vmul.f32 %v5609_v49, %v2933_v40  ;;  %v2934_v9 = vadd.f32 -0.016096033, %v2930_v47 }
 0xe4f   :  { %v2931_v5 = vmul.f32 %v2927_v36, %v5637_v35 }
 0xe50   :  { %v2938_v51 = vmul.f32 %v5620_v24, %v2934_v9 }
 0xe51   :  { %v4169_v28 = vpop.eup %4168  ;;  %v2935_v44 = vadd.f32 -0.016096033, %v2931_v5  ;;  %v3079_v5 = vld [vmem:[#allocation3 + $0x58] sm:$0xff] }
 0xe52   :  { %v2973_v34 = vmul.f32 %v4169_v28, %v2936_v22 }
 0xe53   :  { %v2939_v25 = vmul.f32 %v5629_v55, %v2935_v44 }
 0xe54   :  { %v4171_v38 = vpop.eup %4170  ;;  %v2980_v54 = vadd.f32 1.0, %v2973_v34 }
 0xe55   :  { %v2975_v31 = vmul.f32 %v4171_v38, %v2937_v21 }
 0xe56   :  { %v5673_v56 = vmul.f32 %v2980_v54, %v2868_v52  ;;  %v4173_v32 = vpop.eup %4172 }
 0xe57   :  { %v2981_v2 = vadd.f32 1.0, %v2975_v31  ;;  %v2977_v6 = vmul.f32 %v4173_v32, %v2938_v51 }
 0xe58   :  { %3052 = vrot.lane.b32.xlu1 %v5673_v56, %s4231_s13  ;;  %v4175_v42 = vpop.eup %4174 }
 0xe59   :  { %v2985_v49 = vmul.f32 %v2981_v2, %v2869_v33  ;;  %v2979_v35 = vmul.f32 %v4175_v42, %v2939_v25  ;;  %v2982_v62 = vadd.f32 1.0, %v2977_v6  ;;  %v3076_v33 = vld [vmem:[#allocation3 + $0x40] sm:$0xff] }
 0xe5b   :  { %3054 = vrot.lane.b32.xlu0 %v2985_v49, %s4231_s13  ;;  %v2983_v24 = vadd.f32 1.0, %v2979_v35  ;;  %v5691_v45 = vmul.f32 %v2982_v62, %v2870_v60 }
 0xe5c   :  { %3040 = vrot.lane.b32.xlu1 %v5673_v56, %s4228_s11 }
 0xe5d   :  { %v2987_v55 = vmul.f32 %v2983_v24, %v2871_v16 }
 0xe5f   :  { %3042 = vrot.lane.b32.xlu0 %v2985_v49, %s4228_s11 }
 0xe60   :  { %3028 = vrot.lane.b32.xlu1 %v5673_v56, %s4226_s10 }
 0xe63   :  { %3030 = vrot.lane.b32.xlu0 %v2985_v49, %s4226_s10 }
 0xe64   :  { %3016 = vrot.lane.b32.xlu1 %v5673_v56, %s4225_s9 }
 0xe67   :  { %3018 = vrot.lane.b32.xlu0 %v2985_v49, %s4225_s9 }
 0xe68   :  { %3056 = vrot.lane.b32.xlu1 %v5691_v45, %s4231_s13 }
 0xe6b   :  { %3058 = vrot.lane.b32.xlu0 %v2987_v55, %s4231_s13 }
 0xe6c   :  { %3044 = vrot.lane.b32.xlu1 %v5691_v45, %s4228_s11 }
 0xe6f   :  { %3046 = vrot.lane.b32.xlu0 %v2987_v55, %s4228_s11 }
 0xe70   :  { %3032 = vrot.lane.b32.xlu1 %v5691_v45, %s4226_s10 }
 0xe73   :  { %3034 = vrot.lane.b32.xlu0 %v2987_v55, %s4226_s10 }
 0xe74   :  { %3020 = vrot.lane.b32.xlu1 %v5691_v45, %s4225_s9 }
 0xe77   :  { %3022 = vrot.lane.b32.xlu0 %v2987_v55, %s4225_s9 }
 0xe78   :  { %3008 = vrot.lane.b32.xlu1 %v5691_v45, %s4224_s8 }
 0xe7b   :  { %3010 = vrot.lane.b32.xlu0 %v2987_v55, %s4224_s8 }
 0xe7c   :  { %3004 = vrot.lane.b32.xlu1 %v5673_v56, %s4224_s8 }
 0xe7f   :  { %3006 = vrot.lane.b32.xlu0 %v2985_v49, %s4224_s8 }
 0xe80   :  { %2998 = vrot.lane.b32.xlu1 %v5691_v45, %s4222_s7 }
 0xe83   :  { %2996 = vrot.lane.b32.xlu0 %v5673_v56, %s4222_s7 }
 0xe84   :  { %2992 = vrot.lane.b32.xlu1 %v5691_v45, %s4223_s2 }
 0xe87   :  { %2990 = vrot.lane.b32.xlu0 %v5673_v56, %s4223_s2 }
 0xe88   :  { %3068 = vrot.lane.b32.xlu1 %v5691_v45, %s4230_s12 }
 0xe8b   :  { %3070 = vrot.lane.b32.xlu0 %v2987_v55, %s4230_s12 }
 0xe8c   :  { %3064 = vrot.lane.b32.xlu1 %v5673_v56, %s4230_s12 }
 0xe8f   :  { %3066 = vrot.lane.b32.xlu0 %v2985_v49, %s4230_s12 }
 0xe90   :  { %3089 = vperm.xlu1 %4111, %v4050_v15  }
 0xe93   :  { %3084 = vperm.xlu0 %4110, %v4049_v41  }
 0xeca   :  { %v3053_v58 = vpop.permute.xlu1 %3052 }
 0xecd   :  { %v3055_v13 = vpop.permute.xlu0 %3054 }
 0xece   :  { %v3041_v10 = vpop.permute.xlu1 %3040  ;;  %v3060_v18 = vsel %vm103_vm13, %v3053_v58, %v3055_v13 }
 0xed1   :  { %v3043_v17 = vpop.permute.xlu0 %3042 }
 0xed2   :  { %v3029_v53 = vpop.permute.xlu1 %3028  ;;  %v3048_v7 = vsel %vm95_vm11, %v3041_v10, %v3043_v17 }
 0xed5   :  { %v3031_v1 = vpop.permute.xlu0 %3030 }
 0xed6   :  { %v3017_v4 = vpop.permute.xlu1 %3016  ;;  %v3036_v59 = vsel %vm87_vm7, %v3029_v53, %v3031_v1 }
 0xed9   :  { %v3019_v61 = vpop.permute.xlu0 %3018 }
 0xeda   :  { %v3057_v12 = vpop.permute.xlu1 %3056  ;;  %v3024_v11 = vsel %vm79_vm6, %v3017_v4, %v3019_v61 }
 0xedd   :  { %v3059_v14 = vpop.permute.xlu0 %3058 }
 0xede   :  { %v3061_v29 = vsel %vm103_vm13, %v3057_v12, %v3059_v14  ;;  %v3045_v48 = vpop.permute.xlu1 %3044 }
 0xedf   :  { %3099 = vmatpush1.msra.mxu1 %v3061_v29 }
 0xee0   :  { %3100 = vmatprep.subr.mxu1 %v4227_v8 }
 0xee1   :  { %v3047_v23 = vpop.permute.xlu0 %3046  ;;  %3101 = vmatpush1.msra.mxu1 %v3060_v18 }
 0xee2   :  { %v3049_v46 = vsel %vm95_vm11, %v3045_v48, %v3047_v23  ;;  %3102 = vmatprep.subr.mxu1 %v4227_v8  ;;  %v3033_v0 = vpop.permute.xlu1 %3032 }
 0xee3   :  { %3103 = vmatpush1.msra.mxu1 %v3049_v46 }
 0xee4   :  { %3104 = vmatprep.subr.mxu1 %v4227_v8 }
 0xee5   :  { %v3035_v26 = vpop.permute.xlu0 %3034  ;;  %3105 = vmatpush1.msra.mxu1 %v3048_v7 }
 0xee6   :  { %v3037_v50 = vsel %vm87_vm7, %v3033_v0, %v3035_v26  ;;  %3106 = vmatprep.subr.mxu1 %v4227_v8  ;;  %v3021_v39 = vpop.permute.xlu1 %3020 }
 0xee7   :  { %3107 = vmatpush1.msra.mxu1 %v3037_v50 }
 0xee8   :  { %3108 = vmatprep.subr.mxu1 %v4227_v8 }
 0xee9   :  { %v3023_v27 = vpop.permute.xlu0 %3022  ;;  %3109 = vmatpush1.msra.mxu1 %v3036_v59 }
 0xeea   :  { %v3025_v63 = vsel %vm79_vm6, %v3021_v39, %v3023_v27  ;;  %3110 = vmatprep.subr.mxu1 %v4227_v8  ;;  %v3009_v20 = vpop.permute.xlu1 %3008 }
 0xeeb   :  { %3111 = vmatpush1.msra.mxu1 %v3025_v63 }
 0xeec   :  { %3112 = vmatprep.subr.mxu1 %v4227_v8 }
 0xeed   :  { %v3011_v37 = vpop.permute.xlu0 %3010  ;;  %3113 = vmatpush1.msra.mxu1 %v3024_v11 }
 0xeee   :  { %v3013_v40 = vsel %vm71_vm3, %v3009_v20, %v3011_v37  ;;  %3114 = vmatprep.subr.mxu1 %v4227_v8  ;;  %v3005_v19 = vpop.permute.xlu1 %3004 }
 0xeef   :  { %3115 = vmatpush1.msra.mxu1 %v3013_v40 }
 0xef0   :  { %3116 = vmatprep.subr.mxu1 %v4227_v8 }
 0xef1   :  { %v3007_v22 = vpop.permute.xlu0 %3006 }
 0xef2   :  { %v3012_v30 = vsel %vm71_vm3, %v3005_v19, %v3007_v22  ;;  %v2999_v28 = vpop.permute.xlu1 %2998 }
 0xef3   :  { %3117 = vmatpush1.msra.mxu1 %v3012_v30 }
 0xef4   :  { %3118 = vmatprep.subr.mxu1 %v4227_v8 }
 0xef5   :  { %v2997_v34 = vpop.permute.xlu0 %2996  ;;  %3119 = vmatpush1.msra.mxu1 %v2999_v28 }
 0xef6   :  { %3120 = vmatprep.subr.mxu1 %v4227_v8  ;;  %v2993_v21 = vpop.permute.xlu1 %2992 }
 0xef7   :  { %3121 = vmatpush1.msra.mxu1 %v2997_v34 }
 0xef8   :  { %3122 = vmatprep.subr.mxu1 %v4227_v8 }
 0xef9   :  { %v2991_v36 = vpop.permute.xlu0 %2990  ;;  %3123 = vmatpush1.msra.mxu1 %v2993_v21 }
 0xefa   :  { %3124 = vmatprep.subr.mxu1 %v4227_v8  ;;  %v3069_v38 = vpop.permute.xlu1 %3068 }
 0xefb   :  { %3125 = vmatpush1.msra.mxu1 %v2991_v36 }
 0xefc   :  { %3126 = vmatprep.subr.mxu1 %v4227_v8 }
 0xefd   :  { %v3071_v52 = vpop.permute.xlu0 %3070  ;;  %3127 = vmatpush1.msra.mxu1 %v5691_v45 }
 0xefe   :  { %3128 = vmatprep.subr.mxu1 %v4227_v8  ;;  %v3073_v54 = vsel %vm111_vm8, %v3069_v38, %v3071_v52  ;;  %v3065_v47 = vpop.permute.xlu1 %3064 }
 0xeff   :  { %3129 = vmatpush1.msra.mxu1 %v5673_v56  ;;  %v3078_v56 = vld [vmem:[#allocation3 + $0x50] sm:$0xff] }
 0xf00   :  { %3158 = vmatprep.subr.mxu1 %v4227_v8 }
 0xf01   :  { %v3067_v31 = vpop.permute.xlu0 %3066  ;;  %3159 = vmatpush2.msra.mxu1 %v3073_v54 }
 0xf02   :  { %v3072_v2 = vsel %vm111_vm8, %v3065_v47, %v3067_v31  ;;  %3160 = vmatprep.subr.mxu1 %v4227_v8 }
 0xf03   :  { %3161 = vmatpush2.msra.mxu1 %v3072_v2 }
 0xf04   :  { %3163 = vmatmul.mubr.f32.vlgmr.msra.gmra.mxu1 %v3076_v33  ;;  %3512 = vmatprep.subr.mxu1 %v4227_v8 }
 0xf05   :  { %4052 = vmatprep.mubr.msk.f32.mxu1 %vm152_vm15, %v3079_v5 }
 0xf08   :  { %3168 = vmatmul.mubr.f32.gmra.mxu1 %v3078_v56 }
 0xf0b   :  { %v3090_v42 = vpop.permute.xlu1 %3089 }
 0xf0e   :  { %v3085_v9 = vpop.permute.xlu0 %3084 }
 0xfc4   :  { %v3164_v49 = vpop.f32.mrf.mxu1 }
 0xfc5   :  { %v3165_v32 = vadd.f32 %v3164_v49, %v3085_v9 }
 0xfc6   :  { %v3166_v44 = vpop.f32.mrf.mxu1 }
 0xfc7   :  { %v3175_v51 = vmul.f32 0.70710677, %v3165_v32  ;;  %v3173_v33 = vmul.f32 0.5, %v3165_v32  ;;  %v3284_v32 = vld [vmem:[#allocation3 + $0x68] sm:$0xff] }
 0xfc8   :  { %v3169_v6 = vpop.f32.mrf.mxu1  ;;  %4057 = vmatprep.mubr.msk.f32.mxu0 %vm152_vm15, %v3284_v32 }
 0xfc9   :  { %v4053_v25 = vclamps-f32 %v3175_v51, 4.0  ;;  %v3170_v35 = vadd.f32 %v3169_v6, %v3090_v42  ;;  %v4055_v6 = vld [vmem:[%s5979_s3 + $0x40] sm:$0xff] }
 0xfca   :  { %v3171_v62 = vpop.f32.mrf.mxu1 }
 0xfcb   :  { %v3181_v60 = vmul.f32 %v4053_v25, %v4053_v25  ;;  %v3176_v24 = vmul.f32 0.70710677, %v3170_v35  ;;  %v3174_v44 = vmul.f32 0.5, %v3170_v35 }
 0xfcd   :  { %v3183_v45 = vmul.f32 -2.7261424e-10, %v3181_v60  ;;  %v3209_v16 = vmul.f32 -1.45660715e-05, %v3181_v60  ;;  %v4054_v55 = vclamps-f32 %v3176_v24, 4.0 }
 0xfcf   :  { %v3185_v43 = vadd.f32 2.7706815e-08, %v3183_v45  ;;  %v3211_v15 = vadd.f32 -0.00021337405, %v3209_v16  ;;  %v3182_v41 = vmul.f32 %v4054_v55, %v4054_v55 }
 0xfd1   :  { %v3187_v58 = vmul.f32 %v3185_v43, %v3181_v60  ;;  %v3213_v13 = vmul.f32 %v3211_v15, %v3181_v60  ;;  %v3184_v10 = vmul.f32 -2.7261424e-10, %v3182_v41  ;;  %v3210_v17 = vmul.f32 -1.45660715e-05, %v3182_v41 }
 0xfd3   :  { %v3189_v53 = vadd.f32 -2.101024e-06, %v3187_v58  ;;  %v3215_v1 = vadd.f32 -0.001682827, %v3213_v13  ;;  %v3186_v4 = vadd.f32 2.7706815e-08, %v3184_v10 }
 0xfd4   :  { %v3212_v61 = vadd.f32 -0.00021337405, %v3210_v17 }
 0xfd5   :  { %v3191_v12 = vmul.f32 %v3189_v53, %v3181_v60  ;;  %v3217_v14 = vmul.f32 %v3215_v1, %v3181_v60  ;;  %v3188_v29 = vmul.f32 %v3186_v4, %v3182_v41  ;;  %v3283_v1 = vld [vmem:[#allocation3 + $0x60] sm:$0xff] }
 0xfd6   :  { %v3214_v48 = vmul.f32 %v3212_v61, %v3182_v41  ;;  %v3286_v61 = vld [vmem:[#allocation3 + $0x78] sm:$0xff] }
 0xfd7   :  { %v3193_v18 = vadd.f32 -5.6925062e-05, %v3191_v12  ;;  %v3219_v23 = vadd.f32 -0.0073733293, %v3217_v14  ;;  %v3190_v46 = vadd.f32 -2.101024e-06, %v3188_v29 }
 0xfd8   :  { %v3216_v0 = vadd.f32 -0.001682827, %v3214_v48  ;;  %v3285_v12 = vld [vmem:[#allocation3 + $0x70] sm:$0xff] }
 0xfd9   :  { %v3195_v7 = vmul.f32 %v3193_v18, %v3181_v60  ;;  %v3221_v26 = vmul.f32 %v3219_v23, %v3181_v60  ;;  %v3192_v50 = vmul.f32 %v3190_v46, %v3182_v41 }
 0xfda   :  { %v3218_v39 = vmul.f32 %v3216_v0, %v3182_v41 }
 0xfdb   :  { %v3197_v59 = vadd.f32 -0.00073499064, %v3195_v7  ;;  %v3223_v27 = vadd.f32 -0.014264739, %v3221_v26  ;;  %v3194_v63 = vadd.f32 -5.6925062e-05, %v3192_v50 }
 0xfdc   :  { %v3220_v20 = vadd.f32 -0.0073733293, %v3218_v39 }
 0xfdd   :  { %v3199_v11 = vmul.f32 %v3197_v59, %v3181_v60  ;;  %4176 = vrcp.f32 %v3223_v27  ;;  %v3196_v37 = vmul.f32 %v3194_v63, %v3182_v41 }
 0xfde   :  { %v3222_v40 = vmul.f32 %v3220_v20, %v3182_v41 }
 0xfdf   :  { %v3201_v19 = vadd.f32 -0.0029546, %v3199_v11  ;;  %v3198_v22 = vadd.f32 -0.00073499064, %v3196_v37 }
 0xfe0   :  { %v3224_v30 = vadd.f32 -0.014264739, %v3222_v40 }
 0xfe1   :  { %v3203_v28 = vmul.f32 %v3201_v19, %v3181_v60  ;;  %v3200_v34 = vmul.f32 %v3198_v22, %v3182_v41 }
 0xfe2   :  { %4178 = vrcp.f32 %v3224_v30 }
 0xfe3   :  { %v3202_v21 = vadd.f32 -0.0029546, %v3200_v34  ;;  %v3205_v36 = vadd.f32 -0.016096033, %v3203_v28 }
 0xfe5   :  { %v3204_v38 = vmul.f32 %v3202_v21, %v3182_v41  ;;  %v3207_v52 = vmul.f32 %v4053_v25, %v3205_v36  ;;  %v4056_v25 = vld [vmem:[%s5979_s3 + $0x48] sm:$0xff] }
 0xfe7   :  { %v3206_v47 = vadd.f32 -0.016096033, %v3204_v38 }
 0xfe9   :  { %v3208_v5 = vmul.f32 %v4054_v55, %v3206_v47 }
 0xfea   :  { %v4177_v54 = vpop.eup %4176 }
 0xfeb   :  { %v3226_v31 = vmul.f32 %v4177_v54, %v3207_v52 }
 0xfed   :  { %v3229_v2 = vadd.f32 1.0, %v3226_v31 }
 0xfef   :  { %v4179_v56 = vpop.eup %4178  ;;  %v5767_v9 = vmul.f32 %v3229_v2, %v3173_v33 }
 0xff0   :  { %v3228_v49 = vmul.f32 %v4179_v56, %v3208_v5 }
 0xff1   :  { %3271 = vrot.lane.b32.xlu0 %v5767_v9, %s4231_s13 }
 0xff2   :  { %v3230_v51 = vadd.f32 1.0, %v3228_v49 }
 0xff4   :  { %v5771_v42 = vmul.f32 %v3230_v51, %v3174_v44 }
 0xff5   :  { %3265 = vrot.lane.b32.xlu0 %v5767_v9, %s4228_s11 }
 0xff6   :  { %3273 = vrot.lane.b32.xlu1 %v5771_v42, %s4231_s13 }
 0xff9   :  { %3259 = vrot.lane.b32.xlu0 %v5767_v9, %s4226_s10 }
 0xffa   :  { %3267 = vrot.lane.b32.xlu1 %v5771_v42, %s4228_s11 }
 0xffd   :  { %3253 = vrot.lane.b32.xlu0 %v5767_v9, %s4225_s9 }
 0xffe   :  { %3261 = vrot.lane.b32.xlu1 %v5771_v42, %s4226_s10 }
0x1001   :  { %3247 = vrot.lane.b32.xlu0 %v5767_v9, %s4224_s8 }
0x1002   :  { %3255 = vrot.lane.b32.xlu1 %v5771_v42, %s4225_s9 }
0x1005   :  { %3241 = vrot.lane.b32.xlu0 %v5767_v9, %s4222_s7 }
0x1006   :  { %3249 = vrot.lane.b32.xlu1 %v5771_v42, %s4224_s8 }
0x1009   :  { %3235 = vrot.lane.b32.xlu0 %v5767_v9, %s4223_s2 }
0x100a   :  { %3243 = vrot.lane.b32.xlu1 %v5771_v42, %s4222_s7 }
0x100d   :  { %3277 = vrot.lane.b32.xlu0 %v5767_v9, %s4230_s12 }
0x100e   :  { %3237 = vrot.lane.b32.xlu1 %v5771_v42, %s4223_s2 }
0x1011   :  { %3291 = vperm.xlu0 %4110, %v4055_v6  }
0x1012   :  { %3279 = vrot.lane.b32.xlu1 %v5771_v42, %s4230_s12 }
0x1016   :  { %3296 = vperm.xlu1 %4111, %v4056_v25  }
0x1063   :  { %v3272_v35 = vpop.permute.xlu0 %3271 }
0x1067   :  { %v3266_v62 = vpop.permute.xlu0 %3265 }
0x1068   :  { %v3274_v60 = vpop.permute.xlu1 %3273 }
0x1069   :  { %3306 = vmatpush1.msra.mxu0 %v3274_v60 }
0x106a   :  { %3307 = vmatprep.subr.mxu0 %v4227_v8 }
0x106b   :  { %3308 = vmatpush1.msra.mxu0 %v3272_v35  ;;  %v3260_v24 = vpop.permute.xlu0 %3259 }
0x106c   :  { %3309 = vmatprep.subr.mxu0 %v4227_v8  ;;  %v3268_v45 = vpop.permute.xlu1 %3267 }
0x106d   :  { %3310 = vmatpush1.msra.mxu0 %v3268_v45 }
0x106e   :  { %3311 = vmatprep.subr.mxu0 %v4227_v8 }
0x106f   :  { %3312 = vmatpush1.msra.mxu0 %v3266_v62  ;;  %v3254_v16 = vpop.permute.xlu0 %3253 }
0x1070   :  { %3313 = vmatprep.subr.mxu0 %v4227_v8  ;;  %v3262_v55 = vpop.permute.xlu1 %3261 }
0x1071   :  { %3314 = vmatpush1.msra.mxu0 %v3262_v55 }
0x1072   :  { %3315 = vmatprep.subr.mxu0 %v4227_v8 }
0x1073   :  { %3316 = vmatpush1.msra.mxu0 %v3260_v24  ;;  %v3248_v15 = vpop.permute.xlu0 %3247 }
0x1074   :  { %3317 = vmatprep.subr.mxu0 %v4227_v8  ;;  %v3256_v43 = vpop.permute.xlu1 %3255 }
0x1075   :  { %3318 = vmatpush1.msra.mxu0 %v3256_v43 }
0x1076   :  { %3319 = vmatprep.subr.mxu0 %v4227_v8 }
0x1077   :  { %3320 = vmatpush1.msra.mxu0 %v3254_v16  ;;  %v3242_v58 = vpop.permute.xlu0 %3241 }
0x1078   :  { %3321 = vmatprep.subr.mxu0 %v4227_v8  ;;  %v3250_v41 = vpop.permute.xlu1 %3249 }
0x1079   :  { %3322 = vmatpush1.msra.mxu0 %v3250_v41 }
0x107a   :  { %3323 = vmatprep.subr.mxu0 %v4227_v8 }
0x107b   :  { %3324 = vmatpush1.msra.mxu0 %v3248_v15  ;;  %v3236_v17 = vpop.permute.xlu0 %3235 }
0x107c   :  { %3325 = vmatprep.subr.mxu0 %v4227_v8  ;;  %v3244_v13 = vpop.permute.xlu1 %3243 }
0x107d   :  { %3326 = vmatpush1.msra.mxu0 %v3244_v13 }
0x107e   :  { %3327 = vmatprep.subr.mxu0 %v4227_v8 }
0x107f   :  { %3328 = vmatpush1.msra.mxu0 %v3242_v58  ;;  %v3278_v4 = vpop.permute.xlu0 %3277 }
0x1080   :  { %3329 = vmatprep.subr.mxu0 %v4227_v8  ;;  %v3238_v10 = vpop.permute.xlu1 %3237 }
0x1081   :  { %3330 = vmatpush1.msra.mxu0 %v3238_v10 }
0x1082   :  { %3331 = vmatprep.subr.mxu0 %v4227_v8 }
0x1083   :  { %3332 = vmatpush1.msra.mxu0 %v3236_v17 }
0x1084   :  { %3333 = vmatprep.subr.mxu0 %v4227_v8  ;;  %v3280_v53 = vpop.permute.xlu1 %3279 }
0x1085   :  { %3334 = vmatpush1.msra.mxu0 %v5771_v42 }
0x1086   :  { %3335 = vmatprep.subr.mxu0 %v4227_v8 }
0x1087   :  { %3336 = vmatpush1.msra.mxu0 %v5767_v9 }
0x1088   :  { %3365 = vmatprep.subr.mxu0 %v4227_v8 }
0x1089   :  { %3366 = vmatpush2.msra.mxu0 %v3280_v53 }
0x108a   :  { %3367 = vmatprep.subr.mxu0 %v4227_v8 }
0x108b   :  { %3368 = vmatpush2.msra.mxu0 %v3278_v4 }
0x108c   :  { %3370 = vmatmul.mubr.f32.vlgmr.msra.gmra.mxu0 %v3283_v1  ;;  %3719 = vmatprep.subr.mxu0 %v4227_v8  ;;  %v3292_v14 = vpop.permute.xlu0 %3291 }
0x108d   :  { %4058 = vmatprep.mubr.msk.f32.mxu0 %vm152_vm15, %v3286_v61 }
0x1090   :  { %3375 = vmatmul.mubr.f32.gmra.mxu0 %v3285_v12 }
0x1091   :  { %v3297_v46 = vpop.permute.xlu1 %3296 }
0x114c   :  { %v3371_v29 = vpop.f32.mrf.mxu0 }
0x114d   :  { %v3372_v48 = vadd.f32 %v3371_v29, %v3292_v14 }
0x114e   :  { %v3373_v18 = vpop.f32.mrf.mxu0 }
0x114f   :  { %v3382_v23 = vmul.f32 0.70710677, %v3372_v48  ;;  %v3380_v1 = vmul.f32 0.5, %v3372_v48  ;;  %v3491_v48 = vld [vmem:[#allocation3 + $0x88] sm:$0xff] }
0x1150   :  { %v3376_v0 = vpop.f32.mrf.mxu0  ;;  %4063 = vmatprep.mubr.msk.f32.mxu1 %vm152_vm15, %v3491_v48 }
0x1151   :  { %v4059_v7 = vclamps-f32 %v3382_v23, 4.0  ;;  %v3377_v26 = vadd.f32 %v3376_v0, %v3297_v46  ;;  %v4061_v0 = vld [vmem:[%s5979_s3 + $0x50] sm:$0xff] }
0x1152   :  { %v3378_v50 = vpop.f32.mrf.mxu0 }
0x1153   :  { %v3388_v39 = vmul.f32 %v4059_v7, %v4059_v7  ;;  %v3383_v59 = vmul.f32 0.70710677, %v3377_v26  ;;  %v3381_v18 = vmul.f32 0.5, %v3377_v26 }
0x1155   :  { %v3390_v27 = vmul.f32 -2.7261424e-10, %v3388_v39  ;;  %v3416_v63 = vmul.f32 -1.45660715e-05, %v3388_v39  ;;  %v4060_v20 = vclamps-f32 %v3383_v59, 4.0 }
0x1157   :  { %v3392_v11 = vadd.f32 2.7706815e-08, %v3390_v27  ;;  %v3418_v37 = vadd.f32 -0.00021337405, %v3416_v63  ;;  %v3389_v40 = vmul.f32 %v4060_v20, %v4060_v20 }
0x1159   :  { %v3394_v19 = vmul.f32 %v3392_v11, %v3388_v39  ;;  %v3420_v22 = vmul.f32 %v3418_v37, %v3388_v39  ;;  %v3391_v30 = vmul.f32 -2.7261424e-10, %v3389_v40  ;;  %v3417_v28 = vmul.f32 -1.45660715e-05, %v3389_v40 }
0x115b   :  { %v3396_v34 = vadd.f32 -2.101024e-06, %v3394_v19  ;;  %v3422_v21 = vadd.f32 -0.001682827, %v3420_v22  ;;  %v3393_v36 = vadd.f32 2.7706815e-08, %v3391_v30 }
0x115c   :  { %v3419_v38 = vadd.f32 -0.00021337405, %v3417_v28 }
0x115d   :  { %v3398_v52 = vmul.f32 %v3396_v34, %v3388_v39  ;;  %v3424_v54 = vmul.f32 %v3422_v21, %v3388_v39  ;;  %v3395_v47 = vmul.f32 %v3393_v36, %v3389_v40  ;;  %v3490_v21 = vld [vmem:[#allocation3 + $0x80] sm:$0xff] }
0x115e   :  { %v3421_v31 = vmul.f32 %v3419_v38, %v3389_v40  ;;  %v3493_v38 = vld [vmem:[#allocation3 + $0x98] sm:$0xff] }
0x115f   :  { %v3400_v33 = vadd.f32 -5.6925062e-05, %v3398_v52  ;;  %v3426_v2 = vadd.f32 -0.0073733293, %v3424_v54  ;;  %v3397_v5 = vadd.f32 -2.101024e-06, %v3395_v47 }
0x1160   :  { %v3423_v56 = vadd.f32 -0.001682827, %v3421_v31  ;;  %v3492_v52 = vld [vmem:[#allocation3 + $0x90] sm:$0xff] }
0x1161   :  { %v3402_v9 = vmul.f32 %v3400_v33, %v3388_v39  ;;  %v3428_v49 = vmul.f32 %v3426_v2, %v3388_v39  ;;  %v3399_v44 = vmul.f32 %v3397_v5, %v3389_v40 }
0x1162   :  { %v3425_v51 = vmul.f32 %v3423_v56, %v3389_v40 }
0x1163   :  { %v3404_v42 = vadd.f32 -0.00073499064, %v3402_v9  ;;  %v3430_v32 = vadd.f32 -0.014264739, %v3428_v49  ;;  %v3401_v6 = vadd.f32 -5.6925062e-05, %v3399_v44 }
0x1164   :  { %v3427_v25 = vadd.f32 -0.0073733293, %v3425_v51 }
0x1165   :  { %v3406_v35 = vmul.f32 %v3404_v42, %v3388_v39  ;;  %4180 = vrcp.f32 %v3430_v32  ;;  %v3403_v62 = vmul.f32 %v3401_v6, %v3389_v40 }
0x1166   :  { %v3429_v60 = vmul.f32 %v3427_v25, %v3389_v40 }
0x1167   :  { %v3408_v24 = vadd.f32 -0.0029546, %v3406_v35  ;;  %v3405_v45 = vadd.f32 -0.00073499064, %v3403_v62 }
0x1168   :  { %v3431_v16 = vadd.f32 -0.014264739, %v3429_v60 }
0x1169   :  { %v3410_v55 = vmul.f32 %v3408_v24, %v3388_v39  ;;  %v3407_v43 = vmul.f32 %v3405_v45, %v3389_v40 }
0x116a   :  { %4182 = vrcp.f32 %v3431_v16 }
0x116b   :  { %v3409_v15 = vadd.f32 -0.0029546, %v3407_v43  ;;  %v3412_v41 = vadd.f32 -0.016096033, %v3410_v55 }
0x116d   :  { %v3411_v58 = vmul.f32 %v3409_v15, %v3389_v40  ;;  %v3414_v13 = vmul.f32 %v4059_v7, %v3412_v41  ;;  %v4062_v7 = vld [vmem:[%s5979_s3 + $0x58] sm:$0xff] }
0x116f   :  { %v3413_v17 = vadd.f32 -0.016096033, %v3411_v58 }
0x1171   :  { %v3415_v61 = vmul.f32 %v4060_v20, %v3413_v17 }
0x1172   :  { %v4181_v10 = vpop.eup %4180 }
0x1173   :  { %v3433_v53 = vmul.f32 %v4181_v10, %v3414_v13 }
0x1175   :  { %v3436_v4 = vadd.f32 1.0, %v3433_v53 }
0x1177   :  { %v4183_v12 = vpop.eup %4182  ;;  %v5831_v14 = vmul.f32 %v3436_v4, %v3380_v1 }
0x1178   :  { %v3435_v29 = vmul.f32 %v4183_v12, %v3415_v61 }
0x1179   :  { %3478 = vrot.lane.b32.xlu0 %v5831_v14, %s4231_s13 }
0x117a   :  { %v3437_v23 = vadd.f32 1.0, %v3435_v29 }
0x117c   :  { %v5835_v46 = vmul.f32 %v3437_v23, %v3381_v18 }
0x117d   :  { %3472 = vrot.lane.b32.xlu0 %v5831_v14, %s4228_s11 }
0x117e   :  { %3480 = vrot.lane.b32.xlu1 %v5835_v46, %s4231_s13 }
0x1181   :  { %3466 = vrot.lane.b32.xlu0 %v5831_v14, %s4226_s10 }
0x1182   :  { %3474 = vrot.lane.b32.xlu1 %v5835_v46, %s4228_s11 }
0x1185   :  { %3460 = vrot.lane.b32.xlu0 %v5831_v14, %s4225_s9 }
0x1186   :  { %3468 = vrot.lane.b32.xlu1 %v5835_v46, %s4226_s10 }
0x1189   :  { %3454 = vrot.lane.b32.xlu0 %v5831_v14, %s4224_s8 }
0x118a   :  { %3462 = vrot.lane.b32.xlu1 %v5835_v46, %s4225_s9 }
0x118d   :  { %3448 = vrot.lane.b32.xlu0 %v5831_v14, %s4222_s7 }
0x118e   :  { %3456 = vrot.lane.b32.xlu1 %v5835_v46, %s4224_s8 }
0x1191   :  { %3442 = vrot.lane.b32.xlu0 %v5831_v14, %s4223_s2 }
0x1192   :  { %3450 = vrot.lane.b32.xlu1 %v5835_v46, %s4222_s7 }
0x1195   :  { %3484 = vrot.lane.b32.xlu0 %v5831_v14, %s4230_s12 }
0x1196   :  { %3444 = vrot.lane.b32.xlu1 %v5835_v46, %s4223_s2 }
0x1199   :  { %3498 = vperm.xlu0 %4110, %v4061_v0  }
0x119a   :  { %3486 = vrot.lane.b32.xlu1 %v5835_v46, %s4230_s12 }
0x119e   :  { %3503 = vperm.xlu1 %4111, %v4062_v7  }
0x11eb   :  { %v3479_v26 = vpop.permute.xlu0 %3478 }
0x11ef   :  { %v3473_v50 = vpop.permute.xlu0 %3472 }
0x11f0   :  { %v3481_v39 = vpop.permute.xlu1 %3480 }
0x11f1   :  { %3513 = vmatpush1.msra.mxu1 %v3481_v39 }
0x11f2   :  { %3514 = vmatprep.subr.mxu1 %v4227_v8 }
0x11f3   :  { %3515 = vmatpush1.msra.mxu1 %v3479_v26  ;;  %v3467_v59 = vpop.permute.xlu0 %3466 }
0x11f4   :  { %3516 = vmatprep.subr.mxu1 %v4227_v8  ;;  %v3475_v27 = vpop.permute.xlu1 %3474 }
0x11f5   :  { %3517 = vmatpush1.msra.mxu1 %v3475_v27 }
0x11f6   :  { %3518 = vmatprep.subr.mxu1 %v4227_v8 }
0x11f7   :  { %3519 = vmatpush1.msra.mxu1 %v3473_v50  ;;  %v3461_v63 = vpop.permute.xlu0 %3460 }
0x11f8   :  { %3520 = vmatprep.subr.mxu1 %v4227_v8  ;;  %v3469_v20 = vpop.permute.xlu1 %3468 }
0x11f9   :  { %3521 = vmatpush1.msra.mxu1 %v3469_v20 }
0x11fa   :  { %3522 = vmatprep.subr.mxu1 %v4227_v8 }
0x11fb   :  { %3523 = vmatpush1.msra.mxu1 %v3467_v59  ;;  %v3455_v37 = vpop.permute.xlu0 %3454 }
0x11fc   :  { %3524 = vmatprep.subr.mxu1 %v4227_v8  ;;  %v3463_v11 = vpop.permute.xlu1 %3462 }
0x11fd   :  { %3525 = vmatpush1.msra.mxu1 %v3463_v11 }
0x11fe   :  { %3526 = vmatprep.subr.mxu1 %v4227_v8 }
0x11ff   :  { %3527 = vmatpush1.msra.mxu1 %v3461_v63  ;;  %v3449_v19 = vpop.permute.xlu0 %3448 }
0x1200   :  { %3528 = vmatprep.subr.mxu1 %v4227_v8  ;;  %v3457_v40 = vpop.permute.xlu1 %3456 }
0x1201   :  { %3529 = vmatpush1.msra.mxu1 %v3457_v40 }
0x1202   :  { %3530 = vmatprep.subr.mxu1 %v4227_v8 }
0x1203   :  { %3531 = vmatpush1.msra.mxu1 %v3455_v37  ;;  %v3443_v28 = vpop.permute.xlu0 %3442 }
0x1204   :  { %3532 = vmatprep.subr.mxu1 %v4227_v8  ;;  %v3451_v22 = vpop.permute.xlu1 %3450 }
0x1205   :  { %3533 = vmatpush1.msra.mxu1 %v3451_v22 }
0x1206   :  { %3534 = vmatprep.subr.mxu1 %v4227_v8 }
0x1207   :  { %3535 = vmatpush1.msra.mxu1 %v3449_v19  ;;  %v3485_v36 = vpop.permute.xlu0 %3484 }
0x1208   :  { %3536 = vmatprep.subr.mxu1 %v4227_v8  ;;  %v3445_v30 = vpop.permute.xlu1 %3444 }
0x1209   :  { %3537 = vmatpush1.msra.mxu1 %v3445_v30 }
0x120a   :  { %3538 = vmatprep.subr.mxu1 %v4227_v8 }
0x120b   :  { %3539 = vmatpush1.msra.mxu1 %v3443_v28 }
0x120c   :  { %3540 = vmatprep.subr.mxu1 %v4227_v8  ;;  %v3487_v34 = vpop.permute.xlu1 %3486 }
0x120d   :  { %3541 = vmatpush1.msra.mxu1 %v5835_v46 }
0x120e   :  { %3542 = vmatprep.subr.mxu1 %v4227_v8 }
0x120f   :  { %3543 = vmatpush1.msra.mxu1 %v5831_v14 }
0x1210   :  { %3572 = vmatprep.subr.mxu1 %v4227_v8 }
0x1211   :  { %3573 = vmatpush2.msra.mxu1 %v3487_v34 }
0x1212   :  { %3574 = vmatprep.subr.mxu1 %v4227_v8 }
0x1213   :  { %3575 = vmatpush2.msra.mxu1 %v3485_v36 }
0x1214   :  { %3577 = vmatmul.mubr.f32.vlgmr.msra.gmra.mxu1 %v3490_v21  ;;  %4089 = vmatprep.subr.mxu1 %v4227_v8  ;;  %v3499_v54 = vpop.permute.xlu0 %3498 }
0x1215   :  { %4064 = vmatprep.mubr.msk.f32.mxu1 %vm152_vm15, %v3493_v38 }
0x1218   :  { %3582 = vmatmul.mubr.f32.gmra.mxu1 %v3492_v52 }
0x1219   :  { %4093 = vmatprep.mubr.msk.f32.mxu1 %vm4232_vm1, %v4227_v8  ;;  %v3504_v5 = vpop.permute.xlu1 %3503 }
0x12d4   :  { %v3578_v47 = vpop.f32.mrf.mxu1 }
0x12d5   :  { %v3579_v31 = vadd.f32 %v3578_v47, %v3499_v54 }
0x12d6   :  { %v3580_v33 = vpop.f32.mrf.mxu1 }
0x12d7   :  { %v3589_v2 = vmul.f32 0.70710677, %v3579_v31  ;;  %v3587_v21 = vmul.f32 0.5, %v3579_v31  ;;  %v3698_v31 = vld [vmem:[#allocation3 + $0xa8] sm:$0xff] }
0x12d8   :  { %v3583_v56 = vpop.f32.mrf.mxu1  ;;  %4069 = vmatprep.mubr.msk.f32.mxu0 %vm152_vm15, %v3698_v31 }
0x12d9   :  { %v4065_v9 = vclamps-f32 %v3589_v2, 4.0  ;;  %v3584_v49 = vadd.f32 %v3583_v56, %v3504_v5  ;;  %v4067_v56 = vld [vmem:[%s5979_s3 + $0x60] sm:$0xff] }
0x12da   :  { %v3585_v44 = vpop.f32.mrf.mxu1 }
0x12db   :  { %v3595_v51 = vmul.f32 %v4065_v9, %v4065_v9  ;;  %v3590_v42 = vmul.f32 0.70710677, %v3584_v49  ;;  %v3588_v33 = vmul.f32 0.5, %v3584_v49  ;;  %v4068_v49 = vld [vmem:[%s5979_s3 + $0x68] sm:$0xff]  ;;  %v1904_v44 = vld [vmem:[#allocation2] sm:$0x1] }
0x12dd   :  { %v3597_v32 = vmul.f32 -2.7261424e-10, %v3595_v51  ;;  %v3623_v6 = vmul.f32 -1.45660715e-05, %v3595_v51  ;;  %v4066_v25 = vclamps-f32 %v3590_v42, 4.0 }
0x12df   :  { %v3599_v35 = vadd.f32 2.7706815e-08, %v3597_v32  ;;  %v3625_v62 = vadd.f32 -0.00021337405, %v3623_v6  ;;  %v3596_v60 = vmul.f32 %v4066_v25, %v4066_v25 }
0x12e1   :  { %v3601_v24 = vmul.f32 %v3599_v35, %v3595_v51  ;;  %v3627_v45 = vmul.f32 %v3625_v62, %v3595_v51  ;;  %v3598_v16 = vmul.f32 -2.7261424e-10, %v3596_v60  ;;  %v3624_v55 = vmul.f32 -1.45660715e-05, %v3596_v60 }
0x12e3   :  { %v3603_v43 = vadd.f32 -2.101024e-06, %v3601_v24  ;;  %v3629_v15 = vadd.f32 -0.001682827, %v3627_v45  ;;  %v3600_v41 = vadd.f32 2.7706815e-08, %v3598_v16 }
0x12e4   :  { %v3626_v58 = vadd.f32 -0.00021337405, %v3624_v55 }
0x12e5   :  { %v3605_v13 = vmul.f32 %v3603_v43, %v3595_v51  ;;  %v3631_v10 = vmul.f32 %v3629_v15, %v3595_v51  ;;  %v3602_v17 = vmul.f32 %v3600_v41, %v3596_v60 }
0x12e6   :  { %v3628_v53 = vmul.f32 %v3626_v58, %v3596_v60  ;;  %v3697_v58 = vld [vmem:[#allocation3 + $0xa0] sm:$0xff] }
0x12e7   :  { %v3607_v1 = vadd.f32 -5.6925062e-05, %v3605_v13  ;;  %v3633_v4 = vadd.f32 -0.0073733293, %v3631_v10  ;;  %v3604_v61 = vadd.f32 -2.101024e-06, %v3602_v17 }
0x12e8   :  { %v3630_v12 = vadd.f32 -0.001682827, %v3628_v53  ;;  %v3700_v10 = vld [vmem:[#allocation3 + $0xb8] sm:$0xff]  ;;  %v3699_v17 = vld [vmem:[#allocation3 + $0xb0] sm:$0xff] }
0x12e9   :  { %v3609_v14 = vmul.f32 %v3607_v1, %v3595_v51  ;;  %v3635_v29 = vmul.f32 %v3633_v4, %v3595_v51  ;;  %v3606_v18 = vmul.f32 %v3604_v61, %v3596_v60 }
0x12ea   :  { %v3632_v23 = vmul.f32 %v3630_v12, %v3596_v60 }
0x12eb   :  { %v3611_v46 = vadd.f32 -0.00073499064, %v3609_v14  ;;  %v3637_v48 = vadd.f32 -0.014264739, %v3635_v29  ;;  %v3608_v0 = vadd.f32 -5.6925062e-05, %v3606_v18 }
0x12ec   :  { %v3634_v7 = vadd.f32 -0.0073733293, %v3632_v23 }
0x12ed   :  { %v3613_v26 = vmul.f32 %v3611_v46, %v3595_v51  ;;  %4184 = vrcp.f32 %v3637_v48  ;;  %v3610_v50 = vmul.f32 %v3608_v0, %v3596_v60 }
0x12ee   :  { %v3636_v39 = vmul.f32 %v3634_v7, %v3596_v60 }
0x12ef   :  { %v3615_v59 = vadd.f32 -0.0029546, %v3613_v26  ;;  %v3612_v27 = vadd.f32 -0.00073499064, %v3610_v50 }
0x12f0   :  { %v3638_v63 = vadd.f32 -0.014264739, %v3636_v39 }
0x12f1   :  { %v3617_v20 = vmul.f32 %v3615_v59, %v3595_v51  ;;  %v3614_v11 = vmul.f32 %v3612_v27, %v3596_v60 }
0x12f2   :  { %4186 = vrcp.f32 %v3638_v63 }
0x12f3   :  { %v3616_v37 = vadd.f32 -0.0029546, %v3614_v11  ;;  %v3619_v40 = vadd.f32 -0.016096033, %v3617_v20 }
0x12f5   :  { %v3618_v19 = vmul.f32 %v3616_v37, %v3596_v60  ;;  %v3621_v22 = vmul.f32 %v4065_v9, %v3619_v40  ;;  %v3855_v9 = vld [vmem:[#allocation2] sm:$0x1] }
0x12f7   :  { %v3620_v28 = vadd.f32 -0.016096033, %v3618_v19 }
0x12f9   :  { %v3622_v38 = vmul.f32 %v4066_v25, %v3620_v28 }
0x12fa   :  { %v4185_v30 = vpop.eup %4184 }
0x12fb   :  { %v3640_v34 = vmul.f32 %v4185_v30, %v3621_v22 }
0x12fd   :  { %v3643_v36 = vadd.f32 1.0, %v3640_v34 }
0x12ff   :  { %v4187_v52 = vpop.eup %4186  ;;  %v5897_v54 = vmul.f32 %v3643_v36, %v3587_v21 }
0x1300   :  { %v3642_v47 = vmul.f32 %v4187_v52, %v3622_v38 }
0x1301   :  { %3685 = vrot.lane.b32.xlu0 %v5897_v54, %s4231_s13 }
0x1302   :  { %v3644_v2 = vadd.f32 1.0, %v3642_v47 }
0x1304   :  { %v5901_v5 = vmul.f32 %v3644_v2, %v3588_v33 }
0x1305   :  { %3679 = vrot.lane.b32.xlu0 %v5897_v54, %s4228_s11 }
0x1306   :  { %3687 = vrot.lane.b32.xlu1 %v5901_v5, %s4231_s13 }
0x1309   :  { %3673 = vrot.lane.b32.xlu0 %v5897_v54, %s4226_s10 }
0x130a   :  { %3681 = vrot.lane.b32.xlu1 %v5901_v5, %s4228_s11 }
0x130d   :  { %3667 = vrot.lane.b32.xlu0 %v5897_v54, %s4225_s9 }
0x130e   :  { %3675 = vrot.lane.b32.xlu1 %v5901_v5, %s4226_s10 }
0x1311   :  { %3661 = vrot.lane.b32.xlu0 %v5897_v54, %s4224_s8 }
0x1312   :  { %3669 = vrot.lane.b32.xlu1 %v5901_v5, %s4225_s9 }
0x1315   :  { %3655 = vrot.lane.b32.xlu0 %v5897_v54, %s4222_s7 }
0x1316   :  { %3663 = vrot.lane.b32.xlu1 %v5901_v5, %s4224_s8 }
0x1319   :  { %3649 = vrot.lane.b32.xlu0 %v5897_v54, %s4223_s2 }
0x131a   :  { %3657 = vrot.lane.b32.xlu1 %v5901_v5, %s4222_s7 }
0x131d   :  { %3691 = vrot.lane.b32.xlu0 %v5897_v54, %s4230_s12 }
0x131e   :  { %3651 = vrot.lane.b32.xlu1 %v5901_v5, %s4223_s2 }
0x1321   :  { %3705 = vperm.xlu0 %4110, %v4067_v56  }
0x1322   :  { %3693 = vrot.lane.b32.xlu1 %v5901_v5, %s4230_s12 }
0x1325   :  { %3858 = vperm.xlu0 %4110, %v3855_v9  }
0x1326   :  { %3710 = vperm.xlu1 %4111, %v4068_v49  }
0x132a   :  { %1907 = vperm.xlu1 %4111, %v1904_v44  }
0x1373   :  { %v3686_v51 = vpop.permute.xlu0 %3685 }
0x1377   :  { %v3680_v42 = vpop.permute.xlu0 %3679 }
0x1378   :  { %v3688_v32 = vpop.permute.xlu1 %3687 }
0x1379   :  { %3720 = vmatpush1.msra.mxu0 %v3688_v32 }
0x137a   :  { %3721 = vmatprep.subr.mxu0 %v4227_v8 }
0x137b   :  { %3722 = vmatpush1.msra.mxu0 %v3686_v51  ;;  %v3674_v6 = vpop.permute.xlu0 %3673 }
0x137c   :  { %3723 = vmatprep.subr.mxu0 %v4227_v8  ;;  %v3682_v25 = vpop.permute.xlu1 %3681 }
0x137d   :  { %3724 = vmatpush1.msra.mxu0 %v3682_v25 }
0x137e   :  { %3725 = vmatprep.subr.mxu0 %v4227_v8 }
0x137f   :  { %3726 = vmatpush1.msra.mxu0 %v3680_v42  ;;  %v3668_v35 = vpop.permute.xlu0 %3667 }
0x1380   :  { %3727 = vmatprep.subr.mxu0 %v4227_v8  ;;  %v3676_v62 = vpop.permute.xlu1 %3675 }
0x1381   :  { %3728 = vmatpush1.msra.mxu0 %v3676_v62 }
0x1382   :  { %3729 = vmatprep.subr.mxu0 %v4227_v8 }
0x1383   :  { %3730 = vmatpush1.msra.mxu0 %v3674_v6  ;;  %v3662_v24 = vpop.permute.xlu0 %3661 }
0x1384   :  { %3731 = vmatprep.subr.mxu0 %v4227_v8  ;;  %v3670_v60 = vpop.permute.xlu1 %3669 }
0x1385   :  { %3732 = vmatpush1.msra.mxu0 %v3670_v60 }
0x1386   :  { %3733 = vmatprep.subr.mxu0 %v4227_v8 }
0x1387   :  { %3734 = vmatpush1.msra.mxu0 %v3668_v35  ;;  %v3656_v16 = vpop.permute.xlu0 %3655 }
0x1388   :  { %3735 = vmatprep.subr.mxu0 %v4227_v8  ;;  %v3664_v45 = vpop.permute.xlu1 %3663 }
0x1389   :  { %3736 = vmatpush1.msra.mxu0 %v3664_v45 }
0x138a   :  { %3737 = vmatprep.subr.mxu0 %v4227_v8 }
0x138b   :  { %3738 = vmatpush1.msra.mxu0 %v3662_v24  ;;  %v3650_v15 = vpop.permute.xlu0 %3649 }
0x138c   :  { %3739 = vmatprep.subr.mxu0 %v4227_v8  ;;  %v3658_v55 = vpop.permute.xlu1 %3657 }
0x138d   :  { %3740 = vmatpush1.msra.mxu0 %v3658_v55 }
0x138e   :  { %3741 = vmatprep.subr.mxu0 %v4227_v8 }
0x138f   :  { %3742 = vmatpush1.msra.mxu0 %v3656_v16  ;;  %v3692_v13 = vpop.permute.xlu0 %3691 }
0x1390   :  { %3743 = vmatprep.subr.mxu0 %v4227_v8  ;;  %v3652_v43 = vpop.permute.xlu1 %3651 }
0x1391   :  { %3744 = vmatpush1.msra.mxu0 %v3652_v43 }
0x1392   :  { %3745 = vmatprep.subr.mxu0 %v4227_v8 }
0x1393   :  { %3746 = vmatpush1.msra.mxu0 %v3650_v15 }
0x1394   :  { %3747 = vmatprep.subr.mxu0 %v4227_v8  ;;  %v3694_v41 = vpop.permute.xlu1 %3693 }
0x1395   :  { %3748 = vmatpush1.msra.mxu0 %v5901_v5 }
0x1396   :  { %3749 = vmatprep.subr.mxu0 %v4227_v8 }
0x1397   :  { %3750 = vmatpush1.msra.mxu0 %v5897_v54 }
0x1398   :  { %3779 = vmatprep.subr.mxu0 %v4227_v8 }
0x1399   :  { %3780 = vmatpush2.msra.mxu0 %v3694_v41 }
0x139a   :  { %3781 = vmatprep.subr.mxu0 %v4227_v8 }
0x139b   :  { %3782 = vmatpush2.msra.mxu0 %v3692_v13 }
0x139c   :  { %3784 = vmatmul.mubr.f32.vlgmr.msra.gmra.mxu0 %v3697_v58  ;;  %v3706_v54 = vpop.permute.xlu0 %3705 }
0x139d   :  { %4070 = vmatprep.mubr.msk.f32.mxu0 %vm152_vm15, %v3700_v10 }
0x13a0   :  { %3789 = vmatmul.mubr.f32.gmra.mxu0 %v3699_v17 }
0x13a1   :  { %v3711_v53 = vpop.permute.xlu1 %3710 }
0x13a5   :  { %v1908_v1 = vpop.permute.xlu1 %1907 }
0x13a6   :  { %v1913_v4 = vrot.slane %v1908_v1, %v4277_v3 }
0x13a8   :  { %v1984_v61 = vadd.f32 %v5408_v57, %v1913_v4 }
0x13aa   :  { %v1988_v12 = vmul.f32 0.70710677, %v1984_v61  ;;  %v1987_v36 = vmul.f32 0.5, %v1984_v61 }
0x13ac   :  { %v4024_v14 = vclamps-f32 %v1988_v12, 4.0 }
0x13ae   :  { %v1991_v29 = vmul.f32 %v4024_v14, %v4024_v14 }
0x13b0   :  { %v1992_v18 = vmul.f32 -2.7261424e-10, %v1991_v29  ;;  %v2005_v23 = vmul.f32 -1.45660715e-05, %v1991_v29 }
0x13b2   :  { %v1993_v46 = vadd.f32 2.7706815e-08, %v1992_v18  ;;  %v2006_v48 = vadd.f32 -0.00021337405, %v2005_v23 }
0x13b4   :  { %v1994_v0 = vmul.f32 %v1993_v46, %v1991_v29  ;;  %v2007_v7 = vmul.f32 %v2006_v48, %v1991_v29 }
0x13b6   :  { %v1995_v26 = vadd.f32 -2.101024e-06, %v1994_v0  ;;  %v2008_v50 = vadd.f32 -0.001682827, %v2007_v7 }
0x13b8   :  { %v1996_v39 = vmul.f32 %v1995_v26, %v1991_v29  ;;  %v2009_v59 = vmul.f32 %v2008_v50, %v1991_v29 }
0x13ba   :  { %v1997_v27 = vadd.f32 -5.6925062e-05, %v1996_v39  ;;  %v2010_v63 = vadd.f32 -0.0073733293, %v2009_v59 }
0x13bc   :  { %v1998_v20 = vmul.f32 %v1997_v27, %v1991_v29  ;;  %v2011_v11 = vmul.f32 %v2010_v63, %v1991_v29 }
0x13be   :  { %v1999_v37 = vadd.f32 -0.00073499064, %v1998_v20  ;;  %v2012_v40 = vadd.f32 -0.014264739, %v2011_v11 }
0x13c0   :  { %v2000_v57 = vmul.f32 %v1999_v37, %v1991_v29  ;;  %4188 = vrcp.f32 %v2012_v40 }
0x13c2   :  { %v2001_v19 = vadd.f32 -0.0029546, %v2000_v57 }
0x13c4   :  { %v2002_v22 = vmul.f32 %v2001_v19, %v1991_v29 }
0x13c6   :  { %v2003_v30 = vadd.f32 -0.016096033, %v2002_v22 }
0x13c8   :  { %v2004_v28 = vmul.f32 %v4024_v14, %v2003_v30 }
0x13cd   :  { %v4189_v34 = vpop.eup %4188 }
0x13ce   :  { %v2014_v21 = vmul.f32 %v4189_v34, %v2004_v28 }
0x13d0   :  { %v2015_v38 = vadd.f32 1.0, %v2014_v21 }
0x13d2   :  { %v2016_v52 = vmul.f32 %v2015_v38, %v1987_v36 }
0x13d4   :  { %2018 = vst.msk [vmem:[%s5982_s6] sm:$0x1] %vm2017_vm0, %v2016_v52 }
0x145c   :  { %v3785_v47 = vpop.f32.mrf.mxu0 }
0x145d   :  { %v3786_v33 = vadd.f32 %v3785_v47, %v3706_v54 }
0x145e   :  { %v3787_v2 = vpop.f32.mrf.mxu0 }
0x145f   :  { %v3796_v5 = vmul.f32 0.70710677, %v3786_v33  ;;  %v3794_v54 = vmul.f32 0.5, %v3786_v33 }
0x1460   :  { %v3790_v31 = vpop.f32.mrf.mxu0 }
0x1461   :  { %v4071_v56 = vclamps-f32 %v3796_v5, 4.0  ;;  %v3791_v9 = vadd.f32 %v3790_v31, %v3711_v53  ;;  %v3854_v5 = vld [vmem:[%s5980_s4] sm:$0x1]  ;;  %v3859_v31 = vpop.permute.xlu0 %3858 }
0x1462   :  { %v3792_v49 = vpop.f32.mrf.mxu0 }
0x1463   :  { %v3802_v44 = vmul.f32 %v4071_v56, %v4071_v56  ;;  %v3797_v51 = vmul.f32 0.70710677, %v3791_v9  ;;  %v3795_v38 = vmul.f32 0.5, %v3791_v9 }
0x1465   :  { %v3804_v42 = vmul.f32 -2.7261424e-10, %v3802_v44  ;;  %v3830_v32 = vmul.f32 -1.45660715e-05, %v3802_v44  ;;  %v4072_v6 = vclamps-f32 %v3797_v51, 4.0 }
0x1467   :  { %v3806_v25 = vadd.f32 2.7706815e-08, %v3804_v42  ;;  %v3832_v35 = vadd.f32 -0.00021337405, %v3830_v32  ;;  %v3803_v62 = vmul.f32 %v4072_v6, %v4072_v6 }
0x1469   :  { %v3808_v60 = vmul.f32 %v3806_v25, %v3802_v44  ;;  %v3834_v24 = vmul.f32 %v3832_v35, %v3802_v44  ;;  %v3805_v45 = vmul.f32 -2.7261424e-10, %v3803_v62  ;;  %v3831_v16 = vmul.f32 -1.45660715e-05, %v3803_v62 }
0x146b   :  { %v3810_v55 = vadd.f32 -2.101024e-06, %v3808_v60  ;;  %v3836_v43 = vadd.f32 -0.001682827, %v3834_v24  ;;  %v3807_v15 = vadd.f32 2.7706815e-08, %v3805_v45 }
0x146c   :  { %v3833_v41 = vadd.f32 -0.00021337405, %v3831_v16 }
0x146d   :  { %v3812_v58 = vmul.f32 %v3810_v55, %v3802_v44  ;;  %v3838_v13 = vmul.f32 %v3836_v43, %v3802_v44  ;;  %v3809_v10 = vmul.f32 %v3807_v15, %v3803_v62 }
0x146e   :  { %v3835_v17 = vmul.f32 %v3833_v41, %v3803_v62 }
0x146f   :  { %v3814_v53 = vadd.f32 -5.6925062e-05, %v3812_v58  ;;  %v3840_v1 = vadd.f32 -0.0073733293, %v3838_v13  ;;  %v3811_v4 = vadd.f32 -2.101024e-06, %v3809_v10 }
0x1470   :  { %v3837_v61 = vadd.f32 -0.001682827, %v3835_v17 }
0x1471   :  { %v3816_v12 = vmul.f32 %v3814_v53, %v3802_v44  ;;  %v3842_v14 = vmul.f32 %v3840_v1, %v3802_v44  ;;  %v3813_v29 = vmul.f32 %v3811_v4, %v3803_v62 }
0x1472   :  { %v3839_v18 = vmul.f32 %v3837_v61, %v3803_v62 }
0x1473   :  { %v3818_v23 = vadd.f32 -0.00073499064, %v3816_v12  ;;  %v3844_v46 = vadd.f32 -0.014264739, %v3842_v14  ;;  %v3815_v48 = vadd.f32 -5.6925062e-05, %v3813_v29 }
0x1474   :  { %v3841_v0 = vadd.f32 -0.0073733293, %v3839_v18 }
0x1475   :  { %v3820_v7 = vmul.f32 %v3818_v23, %v3802_v44  ;;  %v3817_v26 = vmul.f32 %v3815_v48, %v3803_v62  ;;  %4190 = vrcp.f32 %v3844_v46 }
0x1476   :  { %v3843_v50 = vmul.f32 %v3841_v0, %v3803_v62 }
0x1477   :  { %v3819_v39 = vadd.f32 -0.00073499064, %v3817_v26  ;;  %v3822_v59 = vadd.f32 -0.0029546, %v3820_v7 }
0x1478   :  { %v3845_v27 = vadd.f32 -0.014264739, %v3843_v50 }
0x1479   :  { %v3821_v63 = vmul.f32 %v3819_v39, %v3803_v62  ;;  %v3824_v11 = vmul.f32 %v3822_v59, %v3802_v44 }
0x147a   :  { %4192 = vrcp.f32 %v3845_v27 }
0x147b   :  { %v3823_v20 = vadd.f32 -0.0029546, %v3821_v63  ;;  %v3826_v40 = vadd.f32 -0.016096033, %v3824_v11 }
0x147d   :  { %v3825_v37 = vmul.f32 %v3823_v20, %v3803_v62  ;;  %v3828_v22 = vmul.f32 %v4071_v56, %v3826_v40  ;;  %v3864_v56 = vrot.slane %v3859_v31, %v4277_v3 }
0x147f   :  { %v3827_v57 = vadd.f32 -0.016096033, %v3825_v37 }
0x1481   :  { %v3829_v28 = vmul.f32 %v4072_v6, %v3827_v57 }
0x1482   :  { %v4191_v19 = vpop.eup %4190 }
0x1483   :  { %v3847_v30 = vmul.f32 %v4191_v19, %v3828_v22 }
0x1485   :  { %v3850_v36 = vadd.f32 1.0, %v3847_v30 }
0x1487   :  { %v4193_v34 = vpop.eup %4192  ;;  %v3852_v2 = vmul.f32 %v3850_v36, %v3794_v54 }
0x1488   :  { %v3849_v21 = vmul.f32 %v4193_v34, %v3829_v28 }
0x148a   :  { %v3851_v52 = vadd.f32 1.0, %v3849_v21 }
0x148c   :  { %v3853_v47 = vmul.f32 %v3851_v52, %v3795_v38 }
0x148e   :  { %4090 = vmatpush3.msra.mxu1 %v3853_v47 }
0x148f   :  { %4091 = vmatprep.subr.mxu1 %v4227_v8 }
0x1490   :  { %4092 = vmatpush3.msra.mxu1 %v3852_v2 }
0x1491   :  { %4094 = vmatmul.mubr.msk.f32.vlgmr.msra.gmra.mxu1 %vm152_vm15, %v3854_v5 }
0x1551   :  { %v3934_v49 = vpop.f32.mrf.mxu1 }
0x1552   :  { %v3935_v44 = vadd.f32 %v3934_v49, %v3864_v56 }
0x1553   :  { %v4095_v9 = vpop.f32.mrf.mxu1 }
0x1554   :  { %v3939_v51 = vmul.f32 0.70710677, %v3935_v44  ;;  %v3938_v12 = vmul.f32 0.5, %v3935_v44 }
0x1556   :  { %v4074_v33 = vclamps-f32 %v3939_v51, 4.0 }
0x1558   :  { %v3942_v42 = vmul.f32 %v4074_v33, %v4074_v33 }
0x155a   :  { %v3943_v32 = vmul.f32 -2.7261424e-10, %v3942_v42  ;;  %v3956_v6 = vmul.f32 -1.45660715e-05, %v3942_v42 }
0x155c   :  { %v3944_v25 = vadd.f32 2.7706815e-08, %v3943_v32  ;;  %v3957_v35 = vadd.f32 -0.00021337405, %v3956_v6 }
0x155e   :  { %v3945_v62 = vmul.f32 %v3944_v25, %v3942_v42  ;;  %v3958_v60 = vmul.f32 %v3957_v35, %v3942_v42 }
0x1560   :  { %v3946_v24 = vadd.f32 -2.101024e-06, %v3945_v62  ;;  %v3959_v8 = vadd.f32 -0.001682827, %v3958_v60 }
0x1562   :  { %v3947_v45 = vmul.f32 %v3946_v24, %v3942_v42  ;;  %v3960_v16 = vmul.f32 %v3959_v8, %v3942_v42 }
0x1564   :  { %v3948_v55 = vadd.f32 -5.6925062e-05, %v3947_v45  ;;  %v3961_v43 = vadd.f32 -0.0073733293, %v3960_v16 }
0x1566   :  { %v3949_v15 = vmul.f32 %v3948_v55, %v3942_v42  ;;  %v3962_v3 = vmul.f32 %v3961_v43, %v3942_v42 }
0x1568   :  { %v3950_v41 = vadd.f32 -0.00073499064, %v3949_v15  ;;  %v3963_v58 = vadd.f32 -0.014264739, %v3962_v3 }
0x156a   :  { %v3951_v13 = vmul.f32 %v3950_v41, %v3942_v42  ;;  %4194 = vrcp.f32 %v3963_v58 }
0x156c   :  { %v3952_v10 = vadd.f32 -0.0029546, %v3951_v13 }
0x156e   :  { %v3953_v17 = vmul.f32 %v3952_v10, %v3942_v42 }
0x1570   :  { %v3954_v53 = vadd.f32 -0.016096033, %v3953_v17 }
0x1572   :  { %v3955_v1 = vmul.f32 %v4074_v33, %v3954_v53 }
0x1577   :  { %v4195_v4 = vpop.eup %4194 }
0x1578   :  { %v3965_v61 = vmul.f32 %v4195_v4, %v3955_v1 }
0x157a   :  { %v3966_v14 = vadd.f32 1.0, %v3965_v61 }
0x157c   :  { %v3967_v29 = vmul.f32 %v3966_v14, %v3938_v12 }
0x157e   :  { %4075 = vst.msk [vmem:[%s5982_s6 + $0x1] sm:$0x1] %vm2017_vm0, %v3967_v29 }
0x157f   :  { %3974 = vsyncpa [#allocation4], 1 }

</bundles_post_ra>
